<compile_context>
chip_gen: v5e
topology: v5e:2x2
jax: 0.10.0
libtpu: 0.0.40
codegen_flags: <defaults>
</compile_context>

<pallas_src>
import functools

import numpy as np

import jax
import jax.numpy as jnp
from jax.experimental import pallas as pl
from jax.experimental.pallas import tpu as pltpu


# ------------------------------ Pallas kernel ------------------------------ #

def _woodbury_glow_step_kernel(x_ref, masks_ref, ac_ref, cc_ref, ms_ref,
                               w1_ref, b1_ref, w2_ref, b2_ref, w3_ref, b3_ref,
                               zo_ref, dld_ref, *, W):
    B, C, N = x_ref.shape
    BN = B * N
    Ch = C // 2
    f32 = jnp.float32

    # Pack the batch into the 128-lane axis: activations are (channels, B*N).
    x = jnp.concatenate([x_ref[b] for b in range(B)], axis=-1)           # (C, BN)

    # Actnorm + Woodbury channel transform fused:  z = A x + c
    # where A = (I + UcVc) diag(exp(logs)),  c = (I + UcVc)(exp(logs)*bias).
    z = jnp.dot(ac_ref[...], x, preferred_element_type=f32) + cc_ref[...]

    # Woodbury spatial transform  z_b <- z_b (I_N + Us Vs)  (Ms precomputed, per sample).
    ms = ms_ref[...]
    z = jnp.concatenate(
        [jnp.dot(z[:, b * N:(b + 1) * N], ms, preferred_element_type=f32)
         for b in range(B)],
        axis=-1)

    z1 = z[:Ch]                                                           # passed through
    z2 = z[Ch:]

    # 3x3 "same" conv = 9 accumulating matmuls over lane-rolled, boundary-masked views.
    def conv3x3(inp, w_taps_ref, b_ref):
        cout = w_taps_ref.shape[1]
        acc = jnp.zeros((cout, BN), f32)
        k = 0
        for dy in (-1, 0, 1):
            for dx in (-1, 0, 1):
                s = dy * W + dx                       # src index offset: p -> p + s
                if s == 0:
                    src = inp
                else:
                    src = pltpu.roll(inp, shift=(-s) % BN, axis=1) * masks_ref[k]
                acc = acc + jnp.dot(w_taps_ref[k], src, preferred_element_type=f32)
                k += 1
        return acc + b_ref[...]

    # NN(z1): 3x3 conv -> ReLU -> 1x1 conv -> ReLU -> 3x3 conv (Conv2dZeros exp(3*logs3) folded).
    h = jnp.maximum(conv3x3(z1, w1_ref, b1_ref), 0.0)                     # (hidden, BN)
    h = jnp.maximum(jnp.dot(w2_ref[...], h, preferred_element_type=f32) + b2_ref[...], 0.0)
    h = conv3x3(h, w3_ref, b3_ref)     # rows pre-permuted (cross split): shift rows, then scale rows

    shift = h[:Ch]
    pre = h[Ch:] + 2.0
    scale = jax.nn.sigmoid(pre)
    # numerically stable log(sigmoid(pre))
    log_scale = jnp.minimum(pre, 0.0) - jnp.log(1.0 + jnp.exp(-jnp.abs(pre)))
    z2n = (z2 + shift) * scale

    # Lane-dense outputs: one full (C, N) store per sample + per-sample coupling logdet.
    for b in range(B):
        sl = slice(b * N, (b + 1) * N)
        zo_ref[b] = jnp.concatenate([z1[:, sl], z2n[:, sl]], axis=0)
        dld_ref[b] = jnp.reshape(jnp.sum(log_scale[:, sl]), (1, 1))


# --------------------------------- wrappers --------------------------------- #

def prepare_params(params, H, W):
    """Hoist all parameter-only work out of the forward pass (runs once)."""
    f32 = jnp.float32
    C = params["an_bias"].shape[0]
    Ch = C // 2
    N = H * W
    hidden = params["w2"].shape[0]
    Uc, Vc, Us, Vs = params["Uc"], params["Vc"], params["Us"], params["Vs"]

    Mc = jnp.eye(C, dtype=f32) + Uc @ Vc                       # (C, C)
    Ms = jnp.eye(N, dtype=f32) + Us @ Vs                       # (N, N)

    # Fold Actnorm into the channel Woodbury transform:
    #   Mc((x + b) * s) = (Mc diag(s)) x + Mc (s*b) = A x + c
    s = jnp.exp(params["an_logs"])                             # (C, 1)
    A = Mc * jnp.reshape(s, (1, C))                            # column scaling
    c = Mc @ (s * params["an_bias"])                           # (C, 1)

    # tap-major conv weights: taps ordered k = (dy+1)*3 + (dx+1)
    w1_taps = jnp.transpose(params["w1"], (2, 3, 0, 1)).reshape(9, hidden, Ch)

    # Glow "cross" split: even output channels -> shift, odd -> scale.
    perm = np.concatenate([np.arange(0, C, 2), np.arange(1, C, 2)])
    e3 = jnp.exp(3.0 * params["logs3"])                        # Conv2dZeros scale, (C, 1)
    w3_eff = (params["w3"] * e3[:, :, None, None])[perm]       # fold scale + cross perm
    b3_eff = (params["b3"] * e3)[perm]
    w3_taps = jnp.transpose(w3_eff, (2, 3, 0, 1)).reshape(9, C, hidden)

    # Parameter-only log-determinants (tiny d x d slogdets -> plain JAX).
    an_logdet = N * jnp.sum(params["an_logs"])
    _, ld_c = jnp.linalg.slogdet(jnp.eye(Uc.shape[1], dtype=f32) + Vc @ Uc)
    _, ld_s = jnp.linalg.slogdet(jnp.eye(Us.shape[1], dtype=f32) + Vs @ Us)
    const_logdet = an_logdet + N * ld_c + C * ld_s

    return dict(
        Ac=A, cc=c, Ms=Ms,
        w1_taps=w1_taps, b1=params["b1"],
        w2=params["w2"], b2=params["b2"],
        w3_taps=w3_taps, b3=b3_eff,
        const_logdet=const_logdet,
    )


def woodbury_glow_step_forward(x, prep, logdet=0.0):
    """Forward (normal_flow) pass of WoodburyGlowStep as one fused Pallas kernel."""
    B, C, H, W = x.shape
    assert C % 2 == 0
    N = H * W
    f32 = jnp.float32

    xf = x.reshape(B, C, N).astype(f32)

    # Static per-tap boundary masks for the in-kernel 3x3 convs (trace-time constant).
    pos = np.arange(B * N) % N
    yy, xx = pos // W, pos % W
    masks = []
    for dy in (-1, 0, 1):
        for dx in (-1, 0, 1):
            m = np.ones(B * N, np.float32)
            if dy == -1:
                m *= (yy >= 1)
            elif dy == 1:
                m *= (yy <= H - 2)
            if dx == -1:
                m *= (xx >= 1)
            elif dx == 1:
                m *= (xx <= W - 2)
            masks.append(m)
    conv_masks = jnp.asarray(np.stack(masks).reshape(9, 1, B * N))

    vmem = lambda: pl.BlockSpec(memory_space=pltpu.MemorySpace.VMEM)
    z_flat, dld = pl.pallas_call(
        functools.partial(_woodbury_glow_step_kernel, W=W),
        out_shape=(jax.ShapeDtypeStruct((B, C, N), f32),
                   jax.ShapeDtypeStruct((B, 1, 1), f32)),
        in_specs=[vmem() for _ in range(11)],
        out_specs=(vmem(), vmem()),
    )(xf, conv_masks, prep["Ac"], prep["cc"], prep["Ms"],
      prep["w1_taps"], prep["b1"], prep["w2"], prep["b2"],
      prep["w3_taps"], prep["b3"])

    z = z_flat.reshape(B, C, H, W)
    logdet_out = logdet + prep["const_logdet"] + dld.reshape(B)
    return z, logdet_out


# --------------------------- params + JAX reference -------------------------- #

def init_params(key, C, H, W, dc, ds, hidden):
    """Deterministic synthetic parameters (shapes follow the PyTorch module)."""
    ks = jax.random.split(key, 11)
    N = H * W
    f32 = jnp.float32
    p = {}
    p["an_bias"] = 0.10 * jax.random.normal(ks[0], (C, 1), f32)
    p["an_logs"] = 0.05 * jax.random.normal(ks[1], (C, 1), f32)
    p["Uc"] = 0.05 * jax.random.normal(ks[2], (C, dc), f32)
    p["Vc"] = 0.05 * jax.random.normal(ks[3], (dc, C), f32)
    p["Us"] = 0.02 * jax.random.normal(ks[4], (N, ds), f32)
    p["Vs"] = 0.02 * jax.random.normal(ks[5], (ds, N), f32)
    p["w1"] = 0.05 * jax.random.normal(ks[6], (hidden, C // 2, 3, 3), f32)
    p["b1"] = jnp.zeros((hidden, 1), f32)
    p["w2"] = 0.05 * jax.random.normal(ks[7], (hidden, hidden), f32)   # 1x1 conv
    p["b2"] = jnp.zeros((hidden, 1), f32)
    # Conv2dZeros is zero-init in Glow; use small nonzero values so the path is exercised.
    p["w3"] = 0.01 * jax.random.normal(ks[8], (C, hidden, 3, 3), f32)
    p["b3"] = 0.01 * jax.random.normal(ks[9], (C, 1), f32)
    p["logs3"] = 0.01 * jax.random.normal(ks[10], (C, 1), f32)
    return p


def reference_forward(x, params, logdet=0.0):
    """Pure-JAX reference with the same forward semantics (validation only)."""
    B, C, H, W = x.shape
    N = H * W
    hp = jax.lax.Precision.HIGHEST

    z = (x.reshape(B, C, N) + params["an_bias"]) * jnp.exp(params["an_logs"])
    logdet = logdet + N * jnp.sum(params["an_logs"])

    Uc, Vc, Us, Vs = params["Uc"], params["Vc"], params["Us"], params["Vs"]
    z = z + jnp.einsum("cd,bdn->bcn", Uc @ Vc, z, precision=hp)
    z = z + jnp.einsum("bcn,nm->bcm", z, Us @ Vs, precision=hp)
    _, ld_c = jnp.linalg.slogdet(jnp.eye(Uc.shape[1]) + Vc @ Uc)
    _, ld_s = jnp.linalg.slogdet(jnp.eye(Us.shape[1]) + Vs @ Us)
    logdet = logdet + N * ld_c + C * ld_s

    z1, z2 = z[:, :C // 2], z[:, C // 2:]

    def conv3x3(t, w, b):
        out = jax.lax.conv_general_dilated(
            t.reshape(B, -1, H, W), w, (1, 1), "SAME",
            dimension_numbers=("NCHW", "OIHW", "NCHW"), precision=hp)
        return out.reshape(B, -1, N) + b

    h = jax.nn.relu(conv3x3(z1, params["w1"], params["b1"]))
    h = jax.nn.relu(jnp.einsum("oh,bhn->bon", params["w2"], h, precision=hp)
                    + params["b2"])
    h = conv3x3(h, params["w3"], params["b3"]) * jnp.exp(3.0 * params["logs3"])

    shift, scale_pre = h[:, 0::2], h[:, 1::2]          # "cross" split: even=shift, odd=scale
    scale = jax.nn.sigmoid(scale_pre + 2.0)
    z2n = (z2 + shift) * scale
    logdet = logdet + jnp.sum(jnp.log(scale), axis=(1, 2))
    z_out = jnp.concatenate([z1, z2n], axis=1).reshape(B, C, H, W)
    return z_out, logdet


if __name__ == "__main__":
    # WoodburyGlowStep(C, H, W, d, is_me=False, hidden_channels)
    B, C, H, W = 2, 4, 16, 16
    d = (2, 16)                  # (channel rank d_c, spatial rank d_s) for WTrans
    hidden_channels = 32

    key = jax.random.PRNGKey(0)
    kx, kp = jax.random.split(key)
    x = jax.random.normal(kx, (B, C, H, W), jnp.float32)      # NCHW like PyTorch
    params = init_params(kp, C, H, W, d[0], d[1], hidden_channels)
    prep = prepare_params(params, H, W)                       # hoisted parameter-only work

    fwd = jax.jit(woodbury_glow_step_forward)
    z, logdet = fwd(x, prep, 0.0)
    jax.block_until_ready((z, logdet))

    assert z.shape == (B, C, H, W), z.shape
    assert logdet.shape == (B,), logdet.shape
    assert bool(jnp.all(jnp.isfinite(z))) and bool(jnp.all(jnp.isfinite(logdet)))

    # Validate against the pure-JAX reference of the same forward pass.
    z_ref, logdet_ref = reference_forward(x, params, 0.0)
    err_z = float(jnp.max(jnp.abs(z - z_ref)))
    err_ld = float(jnp.max(jnp.abs(logdet - logdet_ref)))
    assert err_z < 5e-2, ("z mismatch vs reference", err_z)
    assert err_ld < 5e-1, ("logdet mismatch vs reference", err_ld)

    print("KERNEL_OK")
</pallas_src>

<mosaic_0001>
module attributes {stable_mosaic.version = 11 : i64} {
  func.func @_woodbury_glow_step_kernel(%arg0: memref<2x4x256xf32, #tpu.memory_space<vmem>>, %arg1: memref<9x1x512xf32, #tpu.memory_space<vmem>>, %arg2: memref<4x4xf32, #tpu.memory_space<vmem>>, %arg3: memref<4x1xf32, #tpu.memory_space<vmem>>, %arg4: memref<256x256xf32, #tpu.memory_space<vmem>>, %arg5: memref<9x32x2xf32, #tpu.memory_space<vmem>>, %arg6: memref<32x1xf32, #tpu.memory_space<vmem>>, %arg7: memref<32x32xf32, #tpu.memory_space<vmem>>, %arg8: memref<32x1xf32, #tpu.memory_space<vmem>>, %arg9: memref<9x4x32xf32, #tpu.memory_space<vmem>>, %arg10: memref<4x1xf32, #tpu.memory_space<vmem>>, %arg11: memref<2x4x256xf32, #tpu.memory_space<vmem>>, %arg12: memref<2x1x1xf32, #tpu.memory_space<vmem>>) attributes {dimension_semantics = [], scalar_prefetch = 0 : i64, scratch_operands = 0 : i64, tpu.core_type = #tpu.core_type<tc>} {
    %c0 = arith.constant 0 : index
    %c0_0 = arith.constant 0 : index
    %c0_1 = arith.constant 0 : index
    %0 = vector.load %arg0[%c0, %c0_0, %c0_1] : memref<2x4x256xf32, #tpu.memory_space<vmem>>, vector<1x4x256xf32>
    %1 = vector.shape_cast %0 : vector<1x4x256xf32> to vector<4x256xf32>
    %c1 = arith.constant 1 : index
    %c0_2 = arith.constant 0 : index
    %c0_3 = arith.constant 0 : index
    %2 = vector.load %arg0[%c1, %c0_2, %c0_3] : memref<2x4x256xf32, #tpu.memory_space<vmem>>, vector<1x4x256xf32>
    %3 = vector.shape_cast %2 : vector<1x4x256xf32> to vector<4x256xf32>
    %4 = tpu.concatenate %1, %3 in 1 : vector<4x256xf32>, vector<4x256xf32> -> vector<4x512xf32>
    %c0_4 = arith.constant 0 : index
    %c0_5 = arith.constant 0 : index
    %5 = vector.load %arg2[%c0_4, %c0_5] : memref<4x4xf32, #tpu.memory_space<vmem>>, vector<4x4xf32>
    %cst = arith.constant dense<0.000000e+00> : vector<4x512xf32>
    %6 = tpu.matmul %5, %4, %cst {dimension_numbers = #tpu.dot_dimension_numbers<[1], [0], [0], [1], [0, 0, 1, 1], [], []>} : vector<4x4xf32>, vector<4x512xf32>, vector<4x512xf32> -> vector<4x512xf32>
    %c0_6 = arith.constant 0 : index
    %c0_7 = arith.constant 0 : index
    %7 = vector.load %arg3[%c0_6, %c0_7] : memref<4x1xf32, #tpu.memory_space<vmem>>, vector<4x1xf32>
    %8 = vector.broadcast %7 : vector<4x1xf32> to vector<4x512xf32>
    %9 = arith.addf %6, %8 : vector<4x512xf32>
    %c0_8 = arith.constant 0 : index
    %c0_9 = arith.constant 0 : index
    %10 = vector.load %arg4[%c0_8, %c0_9] : memref<256x256xf32, #tpu.memory_space<vmem>>, vector<256x256xf32>
    %11 = vector.extract_strided_slice %9 {offsets = [0, 0], sizes = [4, 256], strides = [1, 1]} : vector<4x512xf32> to vector<4x256xf32>
    %cst_10 = arith.constant dense<0.000000e+00> : vector<4x256xf32>
    %12 = tpu.matmul %11, %10, %cst_10 {dimension_numbers = #tpu.dot_dimension_numbers<[1], [0], [0], [1], [0, 0, 1, 1], [], []>} : vector<4x256xf32>, vector<256x256xf32>, vector<4x256xf32> -> vector<4x256xf32>
    %13 = vector.extract_strided_slice %9 {offsets = [0, 256], sizes = [4, 256], strides = [1, 1]} : vector<4x512xf32> to vector<4x256xf32>
    %cst_11 = arith.constant dense<0.000000e+00> : vector<4x256xf32>
    %14 = tpu.matmul %13, %10, %cst_11 {dimension_numbers = #tpu.dot_dimension_numbers<[1], [0], [0], [1], [0, 0, 1, 1], [], []>} : vector<4x256xf32>, vector<256x256xf32>, vector<4x256xf32> -> vector<4x256xf32>
    %15 = tpu.concatenate %12, %14 in 1 : vector<4x256xf32>, vector<4x256xf32> -> vector<4x512xf32>
    %16 = vector.extract_strided_slice %15 {offsets = [0, 0], sizes = [2, 512], strides = [1, 1]} : vector<4x512xf32> to vector<2x512xf32>
    %17 = vector.extract_strided_slice %15 {offsets = [2, 0], sizes = [2, 512], strides = [1, 1]} : vector<4x512xf32> to vector<2x512xf32>
    %cst_12 = arith.constant 0.000000e+00 : f32
    %18 = vector.broadcast %cst_12 : f32 to vector<32x512xf32>
    %c17_i32 = arith.constant 17 : i32
    %19 = tpu.dynamic_rotate %16 by %c17_i32 dim 1 : vector<2x512xf32>, i32 -> vector<2x512xf32>
    %c0_13 = arith.constant 0 : index
    %c0_14 = arith.constant 0 : index
    %c0_15 = arith.constant 0 : index
    %20 = vector.load %arg1[%c0_13, %c0_14, %c0_15] : memref<9x1x512xf32, #tpu.memory_space<vmem>>, vector<1x1x512xf32>
    %21 = vector.shape_cast %20 : vector<1x1x512xf32> to vector<1x512xf32>
    %22 = vector.broadcast %21 : vector<1x512xf32> to vector<2x512xf32>
    %23 = arith.mulf %19, %22 : vector<2x512xf32>
    %c0_16 = arith.constant 0 : index
    %c0_17 = arith.constant 0 : index
    %c0_18 = arith.constant 0 : index
    %24 = vector.load %arg5[%c0_16, %c0_17, %c0_18] : memref<9x32x2xf32, #tpu.memory_space<vmem>>, vector<1x32x2xf32>
    %25 = vector.shape_cast %24 : vector<1x32x2xf32> to vector<32x2xf32>
    %cst_19 = arith.constant dense<0.000000e+00> : vector<32x512xf32>
    %26 = tpu.matmul %25, %23, %cst_19 {dimension_numbers = #tpu.dot_dimension_numbers<[1], [0], [0], [1], [0, 0, 1, 1], [], []>} : vector<32x2xf32>, vector<2x512xf32>, vector<32x512xf32> -> vector<32x512xf32>
    %27 = arith.addf %18, %26 : vector<32x512xf32>
    %c16_i32 = arith.constant 16 : i32
    %28 = tpu.dynamic_rotate %16 by %c16_i32 dim 1 : vector<2x512xf32>, i32 -> vector<2x512xf32>
    %c1_20 = arith.constant 1 : index
    %c0_21 = arith.constant 0 : index
    %c0_22 = arith.constant 0 : index
    %29 = vector.load %arg1[%c1_20, %c0_21, %c0_22] : memref<9x1x512xf32, #tpu.memory_space<vmem>>, vector<1x1x512xf32>
    %30 = vector.shape_cast %29 : vector<1x1x512xf32> to vector<1x512xf32>
    %31 = vector.broadcast %30 : vector<1x512xf32> to vector<2x512xf32>
    %32 = arith.mulf %28, %31 : vector<2x512xf32>
    %c1_23 = arith.constant 1 : index
    %c0_24 = arith.constant 0 : index
    %c0_25 = arith.constant 0 : index
    %33 = vector.load %arg5[%c1_23, %c0_24, %c0_25] : memref<9x32x2xf32, #tpu.memory_space<vmem>>, vector<1x32x2xf32>
    %34 = vector.shape_cast %33 : vector<1x32x2xf32> to vector<32x2xf32>
    %cst_26 = arith.constant dense<0.000000e+00> : vector<32x512xf32>
    %35 = tpu.matmul %34, %32, %cst_26 {dimension_numbers = #tpu.dot_dimension_numbers<[1], [0], [0], [1], [0, 0, 1, 1], [], []>} : vector<32x2xf32>, vector<2x512xf32>, vector<32x512xf32> -> vector<32x512xf32>
    %36 = arith.addf %27, %35 : vector<32x512xf32>
    %c15_i32 = arith.constant 15 : i32
    %37 = tpu.dynamic_rotate %16 by %c15_i32 dim 1 : vector<2x512xf32>, i32 -> vector<2x512xf32>
    %c2 = arith.constant 2 : index
    %c0_27 = arith.constant 0 : index
    %c0_28 = arith.constant 0 : index
    %38 = vector.load %arg1[%c2, %c0_27, %c0_28] : memref<9x1x512xf32, #tpu.memory_space<vmem>>, vector<1x1x512xf32>
    %39 = vector.shape_cast %38 : vector<1x1x512xf32> to vector<1x512xf32>
    %40 = vector.broadcast %39 : vector<1x512xf32> to vector<2x512xf32>
    %41 = arith.mulf %37, %40 : vector<2x512xf32>
    %c2_29 = arith.constant 2 : index
    %c0_30 = arith.constant 0 : index
    %c0_31 = arith.constant 0 : index
    %42 = vector.load %arg5[%c2_29, %c0_30, %c0_31] : memref<9x32x2xf32, #tpu.memory_space<vmem>>, vector<1x32x2xf32>
    %43 = vector.shape_cast %42 : vector<1x32x2xf32> to vector<32x2xf32>
    %cst_32 = arith.constant dense<0.000000e+00> : vector<32x512xf32>
    %44 = tpu.matmul %43, %41, %cst_32 {dimension_numbers = #tpu.dot_dimension_numbers<[1], [0], [0], [1], [0, 0, 1, 1], [], []>} : vector<32x2xf32>, vector<2x512xf32>, vector<32x512xf32> -> vector<32x512xf32>
    %45 = arith.addf %36, %44 : vector<32x512xf32>
    %c1_i32 = arith.constant 1 : i32
    %46 = tpu.dynamic_rotate %16 by %c1_i32 dim 1 : vector<2x512xf32>, i32 -> vector<2x512xf32>
    %c3 = arith.constant 3 : index
    %c0_33 = arith.constant 0 : index
    %c0_34 = arith.constant 0 : index
    %47 = vector.load %arg1[%c3, %c0_33, %c0_34] : memref<9x1x512xf32, #tpu.memory_space<vmem>>, vector<1x1x512xf32>
    %48 = vector.shape_cast %47 : vector<1x1x512xf32> to vector<1x512xf32>
    %49 = vector.broadcast %48 : vector<1x512xf32> to vector<2x512xf32>
    %50 = arith.mulf %46, %49 : vector<2x512xf32>
    %c3_35 = arith.constant 3 : index
    %c0_36 = arith.constant 0 : index
    %c0_37 = arith.constant 0 : index
    %51 = vector.load %arg5[%c3_35, %c0_36, %c0_37] : memref<9x32x2xf32, #tpu.memory_space<vmem>>, vector<1x32x2xf32>
    %52 = vector.shape_cast %51 : vector<1x32x2xf32> to vector<32x2xf32>
    %cst_38 = arith.constant dense<0.000000e+00> : vector<32x512xf32>
    %53 = tpu.matmul %52, %50, %cst_38 {dimension_numbers = #tpu.dot_dimension_numbers<[1], [0], [0], [1], [0, 0, 1, 1], [], []>} : vector<32x2xf32>, vector<2x512xf32>, vector<32x512xf32> -> vector<32x512xf32>
    %54 = arith.addf %45, %53 : vector<32x512xf32>
    %c4 = arith.constant 4 : index
    %c0_39 = arith.constant 0 : index
    %c0_40 = arith.constant 0 : index
    %55 = vector.load %arg5[%c4, %c0_39, %c0_40] : memref<9x32x2xf32, #tpu.memory_space<vmem>>, vector<1x32x2xf32>
    %56 = vector.shape_cast %55 : vector<1x32x2xf32> to vector<32x2xf32>
    %cst_41 = arith.constant dense<0.000000e+00> : vector<32x512xf32>
    %57 = tpu.matmul %56, %16, %cst_41 {dimension_numbers = #tpu.dot_dimension_numbers<[1], [0], [0], [1], [0, 0, 1, 1], [], []>} : vector<32x2xf32>, vector<2x512xf32>, vector<32x512xf32> -> vector<32x512xf32>
    %58 = arith.addf %54, %57 : vector<32x512xf32>
    %c511_i32 = arith.constant 511 : i32
    %59 = tpu.dynamic_rotate %16 by %c511_i32 dim 1 : vector<2x512xf32>, i32 -> vector<2x512xf32>
    %c5 = arith.constant 5 : index
    %c0_42 = arith.constant 0 : index
    %c0_43 = arith.constant 0 : index
    %60 = vector.load %arg1[%c5, %c0_42, %c0_43] : memref<9x1x512xf32, #tpu.memory_space<vmem>>, vector<1x1x512xf32>
    %61 = vector.shape_cast %60 : vector<1x1x512xf32> to vector<1x512xf32>
    %62 = vector.broadcast %61 : vector<1x512xf32> to vector<2x512xf32>
    %63 = arith.mulf %59, %62 : vector<2x512xf32>
    %c5_44 = arith.constant 5 : index
    %c0_45 = arith.constant 0 : index
    %c0_46 = arith.constant 0 : index
    %64 = vector.load %arg5[%c5_44, %c0_45, %c0_46] : memref<9x32x2xf32, #tpu.memory_space<vmem>>, vector<1x32x2xf32>
    %65 = vector.shape_cast %64 : vector<1x32x2xf32> to vector<32x2xf32>
    %cst_47 = arith.constant dense<0.000000e+00> : vector<32x512xf32>
    %66 = tpu.matmul %65, %63, %cst_47 {dimension_numbers = #tpu.dot_dimension_numbers<[1], [0], [0], [1], [0, 0, 1, 1], [], []>} : vector<32x2xf32>, vector<2x512xf32>, vector<32x512xf32> -> vector<32x512xf32>
    %67 = arith.addf %58, %66 : vector<32x512xf32>
    %c497_i32 = arith.constant 497 : i32
    %68 = tpu.dynamic_rotate %16 by %c497_i32 dim 1 : vector<2x512xf32>, i32 -> vector<2x512xf32>
    %c6 = arith.constant 6 : index
    %c0_48 = arith.constant 0 : index
    %c0_49 = arith.constant 0 : index
    %69 = vector.load %arg1[%c6, %c0_48, %c0_49] : memref<9x1x512xf32, #tpu.memory_space<vmem>>, vector<1x1x512xf32>
    %70 = vector.shape_cast %69 : vector<1x1x512xf32> to vector<1x512xf32>
    %71 = vector.broadcast %70 : vector<1x512xf32> to vector<2x512xf32>
    %72 = arith.mulf %68, %71 : vector<2x512xf32>
    %c6_50 = arith.constant 6 : index
    %c0_51 = arith.constant 0 : index
    %c0_52 = arith.constant 0 : index
    %73 = vector.load %arg5[%c6_50, %c0_51, %c0_52] : memref<9x32x2xf32, #tpu.memory_space<vmem>>, vector<1x32x2xf32>
    %74 = vector.shape_cast %73 : vector<1x32x2xf32> to vector<32x2xf32>
    %cst_53 = arith.constant dense<0.000000e+00> : vector<32x512xf32>
    %75 = tpu.matmul %74, %72, %cst_53 {dimension_numbers = #tpu.dot_dimension_numbers<[1], [0], [0], [1], [0, 0, 1, 1], [], []>} : vector<32x2xf32>, vector<2x512xf32>, vector<32x512xf32> -> vector<32x512xf32>
    %76 = arith.addf %67, %75 : vector<32x512xf32>
    %c496_i32 = arith.constant 496 : i32
    %77 = tpu.dynamic_rotate %16 by %c496_i32 dim 1 : vector<2x512xf32>, i32 -> vector<2x512xf32>
    %c7 = arith.constant 7 : index
    %c0_54 = arith.constant 0 : index
    %c0_55 = arith.constant 0 : index
    %78 = vector.load %arg1[%c7, %c0_54, %c0_55] : memref<9x1x512xf32, #tpu.memory_space<vmem>>, vector<1x1x512xf32>
    %79 = vector.shape_cast %78 : vector<1x1x512xf32> to vector<1x512xf32>
    %80 = vector.broadcast %79 : vector<1x512xf32> to vector<2x512xf32>
    %81 = arith.mulf %77, %80 : vector<2x512xf32>
    %c7_56 = arith.constant 7 : index
    %c0_57 = arith.constant 0 : index
    %c0_58 = arith.constant 0 : index
    %82 = vector.load %arg5[%c7_56, %c0_57, %c0_58] : memref<9x32x2xf32, #tpu.memory_space<vmem>>, vector<1x32x2xf32>
    %83 = vector.shape_cast %82 : vector<1x32x2xf32> to vector<32x2xf32>
    %cst_59 = arith.constant dense<0.000000e+00> : vector<32x512xf32>
    %84 = tpu.matmul %83, %81, %cst_59 {dimension_numbers = #tpu.dot_dimension_numbers<[1], [0], [0], [1], [0, 0, 1, 1], [], []>} : vector<32x2xf32>, vector<2x512xf32>, vector<32x512xf32> -> vector<32x512xf32>
    %85 = arith.addf %76, %84 : vector<32x512xf32>
    %c495_i32 = arith.constant 495 : i32
    %86 = tpu.dynamic_rotate %16 by %c495_i32 dim 1 : vector<2x512xf32>, i32 -> vector<2x512xf32>
    %c8 = arith.constant 8 : index
    %c0_60 = arith.constant 0 : index
    %c0_61 = arith.constant 0 : index
    %87 = vector.load %arg1[%c8, %c0_60, %c0_61] : memref<9x1x512xf32, #tpu.memory_space<vmem>>, vector<1x1x512xf32>
    %88 = vector.shape_cast %87 : vector<1x1x512xf32> to vector<1x512xf32>
    %89 = vector.broadcast %88 : vector<1x512xf32> to vector<2x512xf32>
    %90 = arith.mulf %86, %89 : vector<2x512xf32>
    %c8_62 = arith.constant 8 : index
    %c0_63 = arith.constant 0 : index
    %c0_64 = arith.constant 0 : index
    %91 = vector.load %arg5[%c8_62, %c0_63, %c0_64] : memref<9x32x2xf32, #tpu.memory_space<vmem>>, vector<1x32x2xf32>
    %92 = vector.shape_cast %91 : vector<1x32x2xf32> to vector<32x2xf32>
    %cst_65 = arith.constant dense<0.000000e+00> : vector<32x512xf32>
    %93 = tpu.matmul %92, %90, %cst_65 {dimension_numbers = #tpu.dot_dimension_numbers<[1], [0], [0], [1], [0, 0, 1, 1], [], []>} : vector<32x2xf32>, vector<2x512xf32>, vector<32x512xf32> -> vector<32x512xf32>
    %94 = arith.addf %85, %93 : vector<32x512xf32>
    %c0_66 = arith.constant 0 : index
    %c0_67 = arith.constant 0 : index
    %95 = vector.load %arg6[%c0_66, %c0_67] : memref<32x1xf32, #tpu.memory_space<vmem>>, vector<32x1xf32>
    %96 = vector.broadcast %95 : vector<32x1xf32> to vector<32x512xf32>
    %97 = arith.addf %94, %96 : vector<32x512xf32>
    %cst_68 = arith.constant 0.000000e+00 : f32
    %98 = vector.broadcast %cst_68 : f32 to vector<32x512xf32>
    %99 = arith.maximumf %97, %98 : vector<32x512xf32>
    %c0_69 = arith.constant 0 : index
    %c0_70 = arith.constant 0 : index
    %100 = vector.load %arg7[%c0_69, %c0_70] : memref<32x32xf32, #tpu.memory_space<vmem>>, vector<32x32xf32>
    %cst_71 = arith.constant dense<0.000000e+00> : vector<32x512xf32>
    %101 = tpu.matmul %100, %99, %cst_71 {dimension_numbers = #tpu.dot_dimension_numbers<[1], [0], [0], [1], [0, 0, 1, 1], [], []>} : vector<32x32xf32>, vector<32x512xf32>, vector<32x512xf32> -> vector<32x512xf32>
    %c0_72 = arith.constant 0 : index
    %c0_73 = arith.constant 0 : index
    %102 = vector.load %arg8[%c0_72, %c0_73] : memref<32x1xf32, #tpu.memory_space<vmem>>, vector<32x1xf32>
    %103 = vector.broadcast %102 : vector<32x1xf32> to vector<32x512xf32>
    %104 = arith.addf %101, %103 : vector<32x512xf32>
    %cst_74 = arith.constant 0.000000e+00 : f32
    %105 = vector.broadcast %cst_74 : f32 to vector<32x512xf32>
    %106 = arith.maximumf %104, %105 : vector<32x512xf32>
    %cst_75 = arith.constant 0.000000e+00 : f32
    %107 = vector.broadcast %cst_75 : f32 to vector<4x512xf32>
    %c17_i32_76 = arith.constant 17 : i32
    %108 = tpu.dynamic_rotate %106 by %c17_i32_76 dim 1 : vector<32x512xf32>, i32 -> vector<32x512xf32>
    %c0_77 = arith.constant 0 : index
    %c0_78 = arith.constant 0 : index
    %c0_79 = arith.constant 0 : index
    %109 = vector.load %arg1[%c0_77, %c0_78, %c0_79] : memref<9x1x512xf32, #tpu.memory_space<vmem>>, vector<1x1x512xf32>
    %110 = vector.shape_cast %109 : vector<1x1x512xf32> to vector<1x512xf32>
    %111 = vector.broadcast %110 : vector<1x512xf32> to vector<32x512xf32>
    %112 = arith.mulf %108, %111 : vector<32x512xf32>
    %c0_80 = arith.constant 0 : index
    %c0_81 = arith.constant 0 : index
    %c0_82 = arith.constant 0 : index
    %113 = vector.load %arg9[%c0_80, %c0_81, %c0_82] : memref<9x4x32xf32, #tpu.memory_space<vmem>>, vector<1x4x32xf32>
    %114 = vector.shape_cast %113 : vector<1x4x32xf32> to vector<4x32xf32>
    %cst_83 = arith.constant dense<0.000000e+00> : vector<4x512xf32>
    %115 = tpu.matmul %114, %112, %cst_83 {dimension_numbers = #tpu.dot_dimension_numbers<[1], [0], [0], [1], [0, 0, 1, 1], [], []>} : vector<4x32xf32>, vector<32x512xf32>, vector<4x512xf32> -> vector<4x512xf32>
    %116 = arith.addf %107, %115 : vector<4x512xf32>
    %c16_i32_84 = arith.constant 16 : i32
    %117 = tpu.dynamic_rotate %106 by %c16_i32_84 dim 1 : vector<32x512xf32>, i32 -> vector<32x512xf32>
    %c1_85 = arith.constant 1 : index
    %c0_86 = arith.constant 0 : index
    %c0_87 = arith.constant 0 : index
    %118 = vector.load %arg1[%c1_85, %c0_86, %c0_87] : memref<9x1x512xf32, #tpu.memory_space<vmem>>, vector<1x1x512xf32>
    %119 = vector.shape_cast %118 : vector<1x1x512xf32> to vector<1x512xf32>
    %120 = vector.broadcast %119 : vector<1x512xf32> to vector<32x512xf32>
    %121 = arith.mulf %117, %120 : vector<32x512xf32>
    %c1_88 = arith.constant 1 : index
    %c0_89 = arith.constant 0 : index
    %c0_90 = arith.constant 0 : index
    %122 = vector.load %arg9[%c1_88, %c0_89, %c0_90] : memref<9x4x32xf32, #tpu.memory_space<vmem>>, vector<1x4x32xf32>
    %123 = vector.shape_cast %122 : vector<1x4x32xf32> to vector<4x32xf32>
    %cst_91 = arith.constant dense<0.000000e+00> : vector<4x512xf32>
    %124 = tpu.matmul %123, %121, %cst_91 {dimension_numbers = #tpu.dot_dimension_numbers<[1], [0], [0], [1], [0, 0, 1, 1], [], []>} : vector<4x32xf32>, vector<32x512xf32>, vector<4x512xf32> -> vector<4x512xf32>
    %125 = arith.addf %116, %124 : vector<4x512xf32>
    %c15_i32_92 = arith.constant 15 : i32
    %126 = tpu.dynamic_rotate %106 by %c15_i32_92 dim 1 : vector<32x512xf32>, i32 -> vector<32x512xf32>
    %c2_93 = arith.constant 2 : index
    %c0_94 = arith.constant 0 : index
    %c0_95 = arith.constant 0 : index
    %127 = vector.load %arg1[%c2_93, %c0_94, %c0_95] : memref<9x1x512xf32, #tpu.memory_space<vmem>>, vector<1x1x512xf32>
    %128 = vector.shape_cast %127 : vector<1x1x512xf32> to vector<1x512xf32>
    %129 = vector.broadcast %128 : vector<1x512xf32> to vector<32x512xf32>
    %130 = arith.mulf %126, %129 : vector<32x512xf32>
    %c2_96 = arith.constant 2 : index
    %c0_97 = arith.constant 0 : index
    %c0_98 = arith.constant 0 : index
    %131 = vector.load %arg9[%c2_96, %c0_97, %c0_98] : memref<9x4x32xf32, #tpu.memory_space<vmem>>, vector<1x4x32xf32>
    %132 = vector.shape_cast %131 : vector<1x4x32xf32> to vector<4x32xf32>
    %cst_99 = arith.constant dense<0.000000e+00> : vector<4x512xf32>
    %133 = tpu.matmul %132, %130, %cst_99 {dimension_numbers = #tpu.dot_dimension_numbers<[1], [0], [0], [1], [0, 0, 1, 1], [], []>} : vector<4x32xf32>, vector<32x512xf32>, vector<4x512xf32> -> vector<4x512xf32>
    %134 = arith.addf %125, %133 : vector<4x512xf32>
    %c1_i32_100 = arith.constant 1 : i32
    %135 = tpu.dynamic_rotate %106 by %c1_i32_100 dim 1 : vector<32x512xf32>, i32 -> vector<32x512xf32>
    %c3_101 = arith.constant 3 : index
    %c0_102 = arith.constant 0 : index
    %c0_103 = arith.constant 0 : index
    %136 = vector.load %arg1[%c3_101, %c0_102, %c0_103] : memref<9x1x512xf32, #tpu.memory_space<vmem>>, vector<1x1x512xf32>
    %137 = vector.shape_cast %136 : vector<1x1x512xf32> to vector<1x512xf32>
    %138 = vector.broadcast %137 : vector<1x512xf32> to vector<32x512xf32>
    %139 = arith.mulf %135, %138 : vector<32x512xf32>
    %c3_104 = arith.constant 3 : index
    %c0_105 = arith.constant 0 : index
    %c0_106 = arith.constant 0 : index
    %140 = vector.load %arg9[%c3_104, %c0_105, %c0_106] : memref<9x4x32xf32, #tpu.memory_space<vmem>>, vector<1x4x32xf32>
    %141 = vector.shape_cast %140 : vector<1x4x32xf32> to vector<4x32xf32>
    %cst_107 = arith.constant dense<0.000000e+00> : vector<4x512xf32>
    %142 = tpu.matmul %141, %139, %cst_107 {dimension_numbers = #tpu.dot_dimension_numbers<[1], [0], [0], [1], [0, 0, 1, 1], [], []>} : vector<4x32xf32>, vector<32x512xf32>, vector<4x512xf32> -> vector<4x512xf32>
    %143 = arith.addf %134, %142 : vector<4x512xf32>
    %c4_108 = arith.constant 4 : index
    %c0_109 = arith.constant 0 : index
    %c0_110 = arith.constant 0 : index
    %144 = vector.load %arg9[%c4_108, %c0_109, %c0_110] : memref<9x4x32xf32, #tpu.memory_space<vmem>>, vector<1x4x32xf32>
    %145 = vector.shape_cast %144 : vector<1x4x32xf32> to vector<4x32xf32>
    %cst_111 = arith.constant dense<0.000000e+00> : vector<4x512xf32>
    %146 = tpu.matmul %145, %106, %cst_111 {dimension_numbers = #tpu.dot_dimension_numbers<[1], [0], [0], [1], [0, 0, 1, 1], [], []>} : vector<4x32xf32>, vector<32x512xf32>, vector<4x512xf32> -> vector<4x512xf32>
    %147 = arith.addf %143, %146 : vector<4x512xf32>
    %c511_i32_112 = arith.constant 511 : i32
    %148 = tpu.dynamic_rotate %106 by %c511_i32_112 dim 1 : vector<32x512xf32>, i32 -> vector<32x512xf32>
    %c5_113 = arith.constant 5 : index
    %c0_114 = arith.constant 0 : index
    %c0_115 = arith.constant 0 : index
    %149 = vector.load %arg1[%c5_113, %c0_114, %c0_115] : memref<9x1x512xf32, #tpu.memory_space<vmem>>, vector<1x1x512xf32>
    %150 = vector.shape_cast %149 : vector<1x1x512xf32> to vector<1x512xf32>
    %151 = vector.broadcast %150 : vector<1x512xf32> to vector<32x512xf32>
    %152 = arith.mulf %148, %151 : vector<32x512xf32>
    %c5_116 = arith.constant 5 : index
    %c0_117 = arith.constant 0 : index
    %c0_118 = arith.constant 0 : index
    %153 = vector.load %arg9[%c5_116, %c0_117, %c0_118] : memref<9x4x32xf32, #tpu.memory_space<vmem>>, vector<1x4x32xf32>
    %154 = vector.shape_cast %153 : vector<1x4x32xf32> to vector<4x32xf32>
    %cst_119 = arith.constant dense<0.000000e+00> : vector<4x512xf32>
    %155 = tpu.matmul %154, %152, %cst_119 {dimension_numbers = #tpu.dot_dimension_numbers<[1], [0], [0], [1], [0, 0, 1, 1], [], []>} : vector<4x32xf32>, vector<32x512xf32>, vector<4x512xf32> -> vector<4x512xf32>
    %156 = arith.addf %147, %155 : vector<4x512xf32>
    %c497_i32_120 = arith.constant 497 : i32
    %157 = tpu.dynamic_rotate %106 by %c497_i32_120 dim 1 : vector<32x512xf32>, i32 -> vector<32x512xf32>
    %c6_121 = arith.constant 6 : index
    %c0_122 = arith.constant 0 : index
    %c0_123 = arith.constant 0 : index
    %158 = vector.load %arg1[%c6_121, %c0_122, %c0_123] : memref<9x1x512xf32, #tpu.memory_space<vmem>>, vector<1x1x512xf32>
    %159 = vector.shape_cast %158 : vector<1x1x512xf32> to vector<1x512xf32>
    %160 = vector.broadcast %159 : vector<1x512xf32> to vector<32x512xf32>
    %161 = arith.mulf %157, %160 : vector<32x512xf32>
    %c6_124 = arith.constant 6 : index
    %c0_125 = arith.constant 0 : index
    %c0_126 = arith.constant 0 : index
    %162 = vector.load %arg9[%c6_124, %c0_125, %c0_126] : memref<9x4x32xf32, #tpu.memory_space<vmem>>, vector<1x4x32xf32>
    %163 = vector.shape_cast %162 : vector<1x4x32xf32> to vector<4x32xf32>
    %cst_127 = arith.constant dense<0.000000e+00> : vector<4x512xf32>
    %164 = tpu.matmul %163, %161, %cst_127 {dimension_numbers = #tpu.dot_dimension_numbers<[1], [0], [0], [1], [0, 0, 1, 1], [], []>} : vector<4x32xf32>, vector<32x512xf32>, vector<4x512xf32> -> vector<4x512xf32>
    %165 = arith.addf %156, %164 : vector<4x512xf32>
    %c496_i32_128 = arith.constant 496 : i32
    %166 = tpu.dynamic_rotate %106 by %c496_i32_128 dim 1 : vector<32x512xf32>, i32 -> vector<32x512xf32>
    %c7_129 = arith.constant 7 : index
    %c0_130 = arith.constant 0 : index
    %c0_131 = arith.constant 0 : index
    %167 = vector.load %arg1[%c7_129, %c0_130, %c0_131] : memref<9x1x512xf32, #tpu.memory_space<vmem>>, vector<1x1x512xf32>
    %168 = vector.shape_cast %167 : vector<1x1x512xf32> to vector<1x512xf32>
    %169 = vector.broadcast %168 : vector<1x512xf32> to vector<32x512xf32>
    %170 = arith.mulf %166, %169 : vector<32x512xf32>
    %c7_132 = arith.constant 7 : index
    %c0_133 = arith.constant 0 : index
    %c0_134 = arith.constant 0 : index
    %171 = vector.load %arg9[%c7_132, %c0_133, %c0_134] : memref<9x4x32xf32, #tpu.memory_space<vmem>>, vector<1x4x32xf32>
    %172 = vector.shape_cast %171 : vector<1x4x32xf32> to vector<4x32xf32>
    %cst_135 = arith.constant dense<0.000000e+00> : vector<4x512xf32>
    %173 = tpu.matmul %172, %170, %cst_135 {dimension_numbers = #tpu.dot_dimension_numbers<[1], [0], [0], [1], [0, 0, 1, 1], [], []>} : vector<4x32xf32>, vector<32x512xf32>, vector<4x512xf32> -> vector<4x512xf32>
    %174 = arith.addf %165, %173 : vector<4x512xf32>
    %c495_i32_136 = arith.constant 495 : i32
    %175 = tpu.dynamic_rotate %106 by %c495_i32_136 dim 1 : vector<32x512xf32>, i32 -> vector<32x512xf32>
    %c8_137 = arith.constant 8 : index
    %c0_138 = arith.constant 0 : index
    %c0_139 = arith.constant 0 : index
    %176 = vector.load %arg1[%c8_137, %c0_138, %c0_139] : memref<9x1x512xf32, #tpu.memory_space<vmem>>, vector<1x1x512xf32>
    %177 = vector.shape_cast %176 : vector<1x1x512xf32> to vector<1x512xf32>
    %178 = vector.broadcast %177 : vector<1x512xf32> to vector<32x512xf32>
    %179 = arith.mulf %175, %178 : vector<32x512xf32>
    %c8_140 = arith.constant 8 : index
    %c0_141 = arith.constant 0 : index
    %c0_142 = arith.constant 0 : index
    %180 = vector.load %arg9[%c8_140, %c0_141, %c0_142] : memref<9x4x32xf32, #tpu.memory_space<vmem>>, vector<1x4x32xf32>
    %181 = vector.shape_cast %180 : vector<1x4x32xf32> to vector<4x32xf32>
    %cst_143 = arith.constant dense<0.000000e+00> : vector<4x512xf32>
    %182 = tpu.matmul %181, %179, %cst_143 {dimension_numbers = #tpu.dot_dimension_numbers<[1], [0], [0], [1], [0, 0, 1, 1], [], []>} : vector<4x32xf32>, vector<32x512xf32>, vector<4x512xf32> -> vector<4x512xf32>
    %183 = arith.addf %174, %182 : vector<4x512xf32>
    %c0_144 = arith.constant 0 : index
    %c0_145 = arith.constant 0 : index
    %184 = vector.load %arg10[%c0_144, %c0_145] : memref<4x1xf32, #tpu.memory_space<vmem>>, vector<4x1xf32>
    %185 = vector.broadcast %184 : vector<4x1xf32> to vector<4x512xf32>
    %186 = arith.addf %183, %185 : vector<4x512xf32>
    %187 = vector.extract_strided_slice %186 {offsets = [0, 0], sizes = [2, 512], strides = [1, 1]} : vector<4x512xf32> to vector<2x512xf32>
    %188 = vector.extract_strided_slice %186 {offsets = [2, 0], sizes = [2, 512], strides = [1, 1]} : vector<4x512xf32> to vector<2x512xf32>
    %cst_146 = arith.constant 2.000000e+00 : f32
    %189 = vector.broadcast %cst_146 : f32 to vector<2x512xf32>
    %190 = arith.addf %188, %189 : vector<2x512xf32>
    %191 = arith.negf %190 : vector<2x512xf32>
    %192 = math.exp %191 : vector<2x512xf32>
    %cst_147 = arith.constant 1.000000e+00 : f32
    %193 = vector.broadcast %cst_147 : f32 to vector<2x512xf32>
    %194 = arith.addf %193, %192 : vector<2x512xf32>
    %195 = arith.divf %193, %194 : vector<2x512xf32>
    %cst_148 = arith.constant 0.000000e+00 : f32
    %196 = vector.broadcast %cst_148 : f32 to vector<2x512xf32>
    %197 = arith.minimumf %190, %196 : vector<2x512xf32>
    %198 = math.absf %190 : vector<2x512xf32>
    %cst_149 = arith.constant 0.000000e+00 : f32
    %199 = vector.broadcast %cst_149 : f32 to vector<2x512xf32>
    %200 = arith.subf %199, %198 : vector<2x512xf32>
    %201 = math.exp %200 : vector<2x512xf32>
    %cst_150 = arith.constant 1.000000e+00 : f32
    %202 = vector.broadcast %cst_150 : f32 to vector<2x512xf32>
    %203 = arith.addf %202, %201 : vector<2x512xf32>
    %204 = math.log %203 : vector<2x512xf32>
    %205 = arith.subf %197, %204 : vector<2x512xf32>
    %206 = arith.addf %17, %187 : vector<2x512xf32>
    %207 = arith.mulf %206, %195 : vector<2x512xf32>
    %208 = vector.extract_strided_slice %16 {offsets = [0, 0], sizes = [2, 256], strides = [1, 1]} : vector<2x512xf32> to vector<2x256xf32>
    %209 = vector.extract_strided_slice %207 {offsets = [0, 0], sizes = [2, 256], strides = [1, 1]} : vector<2x512xf32> to vector<2x256xf32>
    %210 = tpu.concatenate %208, %209 in 0 : vector<2x256xf32>, vector<2x256xf32> -> vector<4x256xf32>
    %c0_151 = arith.constant 0 : index
    %c0_152 = arith.constant 0 : index
    %c0_153 = arith.constant 0 : index
    %211 = vector.load %arg11[%c0_151, %c0_152, %c0_153] : memref<2x4x256xf32, #tpu.memory_space<vmem>>, vector<1x4x256xf32>
    %212 = vector.shape_cast %211 : vector<1x4x256xf32> to vector<4x256xf32>
    %213 = vector.shape_cast %210 : vector<4x256xf32> to vector<1x4x256xf32>
    tpu.vector_store %arg11[%c0_151, %c0_152, %c0_153], %213 {strides = array<i32>} : memref<2x4x256xf32, #tpu.memory_space<vmem>>, vector<1x4x256xf32>,
    %214 = vector.extract_strided_slice %205 {offsets = [0, 0], sizes = [2, 256], strides = [1, 1]} : vector<2x512xf32> to vector<2x256xf32>
    %215 = vector.shape_cast %214 : vector<2x256xf32> to vector<1x2x256xf32>
    %cst_154 = arith.constant dense<0.000000e+00> : vector<1xf32>
    %216 = vector.multi_reduction <add>, %215, %cst_154 [1, 2] : vector<1x2x256xf32> to vector<1xf32>
    %217 = vector.shape_cast %216 : vector<1xf32> to vector<1x1x1xf32>
    %218 = vector.extract %217[0, 0, 0] : f32 from vector<1x1x1xf32>
    %219 = vector.broadcast %218 : f32 to vector<1x1xf32>
    %c0_155 = arith.constant 0 : index
    %c0_156 = arith.constant 0 : index
    %c0_157 = arith.constant 0 : index
    %220 = vector.load %arg12[%c0_155, %c0_156, %c0_157] : memref<2x1x1xf32, #tpu.memory_space<vmem>>, vector<1x1x1xf32>
    %221 = vector.shape_cast %220 : vector<1x1x1xf32> to vector<1x1xf32>
    %222 = vector.shape_cast %219 : vector<1x1xf32> to vector<1x1x1xf32>
    tpu.vector_store %arg12[%c0_155, %c0_156, %c0_157], %222 {strides = array<i32>} : memref<2x1x1xf32, #tpu.memory_space<vmem>>, vector<1x1x1xf32>,
    %223 = vector.extract_strided_slice %16 {offsets = [0, 256], sizes = [2, 256], strides = [1, 1]} : vector<2x512xf32> to vector<2x256xf32>
    %224 = vector.extract_strided_slice %207 {offsets = [0, 256], sizes = [2, 256], strides = [1, 1]} : vector<2x512xf32> to vector<2x256xf32>
    %225 = tpu.concatenate %223, %224 in 0 : vector<2x256xf32>, vector<2x256xf32> -> vector<4x256xf32>
    %c1_158 = arith.constant 1 : index
    %c0_159 = arith.constant 0 : index
    %c0_160 = arith.constant 0 : index
    %226 = vector.load %arg11[%c1_158, %c0_159, %c0_160] : memref<2x4x256xf32, #tpu.memory_space<vmem>>, vector<1x4x256xf32>
    %227 = vector.shape_cast %226 : vector<1x4x256xf32> to vector<4x256xf32>
    %228 = vector.shape_cast %225 : vector<4x256xf32> to vector<1x4x256xf32>
    tpu.vector_store %arg11[%c1_158, %c0_159, %c0_160], %228 {strides = array<i32>} : memref<2x4x256xf32, #tpu.memory_space<vmem>>, vector<1x4x256xf32>,
    %229 = vector.extract_strided_slice %205 {offsets = [0, 256], sizes = [2, 256], strides = [1, 1]} : vector<2x512xf32> to vector<2x256xf32>
    %230 = vector.shape_cast %229 : vector<2x256xf32> to vector<1x2x256xf32>
    %cst_161 = arith.constant dense<0.000000e+00> : vector<1xf32>
    %231 = vector.multi_reduction <add>, %230, %cst_161 [1, 2] : vector<1x2x256xf32> to vector<1xf32>
    %232 = vector.shape_cast %231 : vector<1xf32> to vector<1x1x1xf32>
    %233 = vector.extract %232[0, 0, 0] : f32 from vector<1x1x1xf32>
    %234 = vector.broadcast %233 : f32 to vector<1x1xf32>
    %c1_162 = arith.constant 1 : index
    %c0_163 = arith.constant 0 : index
    %c0_164 = arith.constant 0 : index
    %235 = vector.load %arg12[%c1_162, %c0_163, %c0_164] : memref<2x1x1xf32, #tpu.memory_space<vmem>>, vector<1x1x1xf32>
    %236 = vector.shape_cast %235 : vector<1x1x1xf32> to vector<1x1xf32>
    %237 = vector.shape_cast %234 : vector<1x1xf32> to vector<1x1x1xf32>
    tpu.vector_store %arg12[%c1_162, %c0_163, %c0_164], %237 {strides = array<i32>} : memref<2x1x1xf32, #tpu.memory_space<vmem>>, vector<1x1x1xf32>,
    return
  }
}

</mosaic_0001>

<bundles_post_ra>
// kernel: woodbury_glow_step_forward.1
= control target key start
LH: loop header
LB: loop body
LE: loop exit
PB: predicated region body
PF: predicated region fallthrough
CT: control target
= control target key end

     0   :  { %18 = vsyncpa [#allocation3], 0  ;;  %s4151_s24 = smov [#allocation2]   ;;  %s4152_s26 = smov 256   ;;  %s6925_s0 = inlined_call_operand.vmem [shape: f32[2,4,256], index: 0, kind: input, shape index: {}]   ;;  %s6926_s1 = inlined_call_operand.vmem [shape: f32[9,1,512], index: 1, kind: input, shape index: {}]   ;;  %s6927_s2 = inlined_call_operand.vmem [shape: f32[4,4], index: 2, kind: input, shape index: {}]   ;;  %s6928_s3 = inlined_call_operand.vmem [shape: f32[4,1], index: 3, kind: input, shape index: {}]   ;;  %s6929_s4 = inlined_call_operand.hbm [shape: f32[256,256], index: 4, kind: input, shape index: {}]   ;;  %s6930_s5 = inlined_call_operand.vmem [shape: f32[9,32,2], index: 5, kind: input, shape index: {}]   ;;  %s6931_s6 = inlined_call_operand.vmem [shape: f32[32,1], index: 6, kind: input, shape index: {}]   ;;  %s6932_s7 = inlined_call_operand.vmem [shape: f32[32,32], index: 7, kind: input, shape index: {}]   ;;  %s6933_s8 = inlined_call_operand.vmem [shape: f32[32,1], index: 8, kind: input, shape index: {}]   ;;  %s6934_s9 = inlined_call_operand.vmem [shape: f32[9,4,32], index: 9, kind: input, shape index: {}]   ;;  %s6935_s10 = inlined_call_operand.vmem [shape: f32[4,1], index: 10, kind: input, shape index: {}]   ;;  %s6936_s11 = inlined_call_operand.vmem [shape: f32[2,4,256], index: 11, kind: output, shape index: {0}]   ;;  %s6937_s12 = inlined_call_operand.vmem [shape: f32[2,1,1], index: 12, kind: output, shape index: {1}]  }
   0x1   :  { %s31_s23 = sshll.u32 %s6929_s4, 4  ;;  %s33_s25 = sshll.u32 %s4151_s24, 4  ;;  %s32_s23 = int_to_ptr.hbm [resolvable:$true] %s31_s23  ;;  %s34_s25 = int_to_ptr.vmem [resolvable:$true] %s33_s25 }
   0x2   :  { %s4153_s27 = smov 16  }
   0x3   :  { %39 = dma.hbm_to_vmem [thread:$0]  %s32_s23, 8192, %s34_s25, [#allocation3], %s4152_s26, %s4152_s26, %s4153_s27  }
   0x4   :  { %4149 = dma.done.wait [#allocation3], 8192  }
   0x5   :  { %4150 = vsyncadd [#allocation3], 4294959104  ;;  %v4154_v0 = vmov 0   ;;  %v56_v1 = vld [vmem:[%s6925_s0] sm:$0xff]  ;;  %vm78_vm0 = vcmask 1043456   ;;  %v3781_v3 = vld [vmem:[%s6925_s0 + $0x8] sm:$0xff] }
   0x6   :  { %4090 = vset.pattern.permute.xlu0 %v4154_v0  ;;  %4091 = vset.pattern.permute.xlu1 %v4154_v0  ;;  %60 = vst [vmem:[#allocation1] ss:$2 sm:$0xff] %v56_v1  ;;  %v68_v2 = vld [vmem:[%s6928_s3] sm:$0xf]  ;;  %vm74_vm1 = vcmask 31744   ;;  %v4243_v5 = vld [vmem:[#allocation2 + $0xf0] sm:$0xff] }
   0x7   :  { %4092 = vset.pattern.permute.xlu2 %v4154_v0  ;;  %71 = vperm.xlu0 %4090, %v68_v2   ;;  %v67_v4 = vld [vmem:[%s6927_s2] sm:$0xf]  ;;  %v4245_v6 = vld [vmem:[#allocation2 + $0x1f0] sm:$0xff]  ;;  %v4251_v9 = vld [vmem:[#allocation2 + $0xe0] sm:$0xff]  ;;  %s4155_s0 = smov 17   ;;  %s4156_s2 = smov 15  }
   0x8   :  { %v4253_v10 = vld [vmem:[#allocation2 + $0x1e0] sm:$0xff]  ;;  %v4257_v11 = vld [vmem:[#allocation2 + $0xd0] sm:$0xff]  ;;  %v4263_v13 = vld [vmem:[#allocation2 + $0xf8] sm:$0xff]  ;;  %s4157_s3 = smov 1   ;;  %s4158_s17 = smov 127   ;;  %vm470_vm4 = vcmask 1041408  }
   0x9   :  { %v4259_v12 = vld [vmem:[#allocation2 + $0x1d0] sm:$0xff]  ;;  %v4265_v14 = vld [vmem:[#allocation2 + $0x1f8] sm:$0xff]  ;;  %v4271_v17 = vld [vmem:[#allocation2 + $0xc0] sm:$0xff]  ;;  %s4159_s18 = smov 113   ;;  %s4160_s19 = smov 112   ;;  %vm457_vm5 = vcmask 15360  }
   0xa   :  { %v4273_v18 = vld [vmem:[#allocation2 + $0x1c0] sm:$0xff]  ;;  %v4277_v19 = vld [vmem:[#allocation2 + $0xe8] sm:$0xff]  ;;  %v4283_v21 = vld [vmem:[#allocation2 + $0xb0] sm:$0xff]  ;;  %s4161_s20 = smov 111   ;;  %vm2118_vm12 = vcmask 261120  }
   0xb   :  { %v4279_v20 = vld [vmem:[#allocation2 + $0x1e8] sm:$0xff]  ;;  %v4285_v22 = vld [vmem:[#allocation2 + $0x1b0] sm:$0xff]  ;;  %v4287_v23 = vld [vmem:[#allocation2 + $0xd8] sm:$0xff] }
   0xc   :  { %v4289_v24 = vld [vmem:[#allocation2 + $0x1d8] sm:$0xff]  ;;  %v4295_v25 = vld [vmem:[#allocation2 + $0xa0] sm:$0xff]  ;;  %v4299_v27 = vld [vmem:[#allocation2 + $0xc8] sm:$0xff] }
   0xd   :  { %v61_v7 = vld.sshfl [vmem:[#allocation1] sm:$0xff pattern:$0x75316420]  ;;  %v62_v8 = vld.sshfl [vmem:[#allocation1 + $0x8] sm:$0xff pattern:$0x75316420] }
   0xe   :  { %3782 = vmatpush.msk.msra.mxu0 %vm78_vm0, %v61_v7  ;;  %64 = vst [vmem:[#allocation1] ss:$2 sm:$0xff] %v3781_v3  ;;  %3784 = vmatpush.msk.msra.mxu1 %vm78_vm0, %v62_v8  ;;  %v4297_v26 = vld [vmem:[#allocation2 + $0x1a0] sm:$0xff]  ;;  %v4301_v28 = vld [vmem:[#allocation2 + $0x1c8] sm:$0xff]  ;;  %v4307_v29 = vld [vmem:[#allocation2 + $0x90] sm:$0xff] }
   0xf   :  { %3783 = vmatmul.msk.f32.vlgmr.msra.gmra.mxu0 %vm74_vm1, %v67_v4  ;;  %3785 = vmatmul.msk.f32.vlgmr.msra.gmra.mxu1 %vm74_vm1, %v67_v4  ;;  %v4309_v30 = vld [vmem:[#allocation2 + $0x190] sm:$0xff]  ;;  %v4311_v31 = vld [vmem:[#allocation2 + $0xb8] sm:$0xff]  ;;  %v4319_v33 = vld [vmem:[#allocation2 + $0x80] sm:$0xff] }
  0x10   :  { %231 = vmatpush.msrb.mxu0 %v4243_v5  ;;  %251 = vmatpush.msrb.mxu1 %v4245_v6  ;;  %v4313_v32 = vld [vmem:[#allocation2 + $0x1b8] sm:$0xff]  ;;  %v4321_v34 = vld [vmem:[#allocation2 + $0x180] sm:$0xff]  ;;  %v4323_v35 = vld [vmem:[#allocation2 + $0xa8] sm:$0xff] }
  0x11   :  { %v4325_v36 = vld [vmem:[#allocation2 + $0x1a8] sm:$0xff]  ;;  %v4331_v37 = vld [vmem:[#allocation2 + $0x70] sm:$0xff]  ;;  %v4335_v39 = vld [vmem:[#allocation2 + $0x98] sm:$0xff] }
  0x12   :  { %232 = vmatpush.msrb.mxu0 %v4251_v9  ;;  %252 = vmatpush.msrb.mxu1 %v4253_v10  ;;  %v4333_v38 = vld [vmem:[#allocation2 + $0x170] sm:$0xff]  ;;  %v4337_v40 = vld [vmem:[#allocation2 + $0x198] sm:$0xff]  ;;  %v4343_v41 = vld [vmem:[#allocation2 + $0x60] sm:$0xff] }
  0x13   :  { %v4345_v42 = vld [vmem:[#allocation2 + $0x160] sm:$0xff]  ;;  %v4347_v43 = vld [vmem:[#allocation2 + $0x88] sm:$0xff]  ;;  %v4355_v45 = vld [vmem:[#allocation2 + $0x50] sm:$0xff] }
  0x14   :  { %233 = vmatpush.msrb.mxu0 %v4257_v11  ;;  %253 = vmatpush.msrb.mxu1 %v4259_v12  ;;  %v4349_v44 = vld [vmem:[#allocation2 + $0x188] sm:$0xff]  ;;  %v4357_v46 = vld [vmem:[#allocation2 + $0x150] sm:$0xff]  ;;  %v4359_v47 = vld [vmem:[#allocation2 + $0x78] sm:$0xff] }
  0x15   :  { %v65_v15 = vld.sshfl [vmem:[#allocation1] sm:$0xff pattern:$0x75316420]  ;;  %v66_v16 = vld.sshfl [vmem:[#allocation1 + $0x8] sm:$0xff pattern:$0x75316420] }
  0x16   :  { %3786 = vmatpush.msk.msra.mxu2 %vm78_vm0, %v65_v15  ;;  %3788 = vmatpush.msk.msra.mxu3 %vm78_vm0, %v66_v16  ;;  %v4361_v48 = vld [vmem:[#allocation2 + $0x178] sm:$0xff]  ;;  %v4367_v49 = vld [vmem:[#allocation2 + $0x40] sm:$0xff]  ;;  %v4371_v51 = vld [vmem:[#allocation2 + $0x68] sm:$0xff] }
  0x17   :  { %3787 = vmatmul.msk.f32.vlgmr.msra.gmra.mxu2 %vm74_vm1, %v67_v4  ;;  %3789 = vmatmul.msk.f32.vlgmr.msra.gmra.mxu3 %vm74_vm1, %v67_v4  ;;  %v4369_v50 = vld [vmem:[#allocation2 + $0x140] sm:$0xff]  ;;  %v4373_v52 = vld [vmem:[#allocation2 + $0x168] sm:$0xff]  ;;  %v4379_v53 = vld [vmem:[#allocation2 + $0x30] sm:$0xff] }
  0x18   :  { %271 = vmatpush.msrb.mxu2 %v4263_v13  ;;  %291 = vmatpush.msrb.mxu3 %v4265_v14  ;;  %v4381_v54 = vld [vmem:[#allocation2 + $0x130] sm:$0xff]  ;;  %v4383_v55 = vld [vmem:[#allocation2 + $0x58] sm:$0xff]  ;;  %v4391_v57 = vld [vmem:[#allocation2 + $0x20] sm:$0xff] }
  0x19   :  { %234 = vmatpush.msrb.mxu0 %v4271_v17  ;;  %254 = vmatpush.msrb.mxu1 %v4273_v18  ;;  %v4385_v56 = vld [vmem:[#allocation2 + $0x158] sm:$0xff]  ;;  %v4393_v58 = vld [vmem:[#allocation2 + $0x120] sm:$0xff]  ;;  %v4395_v59 = vld [vmem:[#allocation2 + $0x48] sm:$0xff] }
  0x1a   :  { %272 = vmatpush.msrb.mxu2 %v4277_v19  ;;  %292 = vmatpush.msrb.mxu3 %v4279_v20  ;;  %v4397_v60 = vld [vmem:[#allocation2 + $0x148] sm:$0xff]  ;;  %v4403_v61 = vld [vmem:[#allocation2 + $0x10] sm:$0xff]  ;;  %v4407_v63 = vld [vmem:[#allocation2 + $0x38] sm:$0xff] }
  0x1b   :  { %235 = vmatpush.msrb.mxu0 %v4283_v21  ;;  %255 = vmatpush.msrb.mxu1 %v4285_v22  ;;  %v4405_v62 = vld [vmem:[#allocation2 + $0x110] sm:$0xff]  ;;  %v4409_v0 = vld [vmem:[#allocation2 + $0x138] sm:$0xff]  ;;  %v4415_v1 = vld [vmem:[#allocation2] sm:$0xff] }
  0x1c   :  { %273 = vmatpush.msrb.mxu2 %v4287_v23  ;;  %293 = vmatpush.msrb.mxu3 %v4289_v24  ;;  %v4417_v2 = vld [vmem:[#allocation2 + $0x100] sm:$0xff]  ;;  %v4419_v3 = vld [vmem:[#allocation2 + $0x28] sm:$0xff]  ;;  %v4427_v7 = vld [vmem:[#allocation2 + $0x18] sm:$0xff] }
  0x1d   :  { %236 = vmatpush.msrb.mxu0 %v4295_v25  ;;  %256 = vmatpush.msrb.mxu1 %v4297_v26  ;;  %v4421_v4 = vld [vmem:[#allocation2 + $0x128] sm:$0xff]  ;;  %v4429_v8 = vld [vmem:[#allocation2 + $0x118] sm:$0xff] }
  0x1e   :  { %274 = vmatpush.msrb.mxu2 %v4299_v27  ;;  %294 = vmatpush.msrb.mxu3 %v4301_v28  ;;  %v4435_v15 = vld [vmem:[#allocation2 + $0x8] sm:$0xff] }
  0x1f   :  { %237 = vmatpush.msrb.mxu0 %v4307_v29  ;;  %257 = vmatpush.msrb.mxu1 %v4309_v30  ;;  %v4437_v16 = vld [vmem:[#allocation2 + $0x108] sm:$0xff] }
  0x20   :  { %275 = vmatpush.msrb.mxu2 %v4311_v31  ;;  %295 = vmatpush.msrb.mxu3 %v4313_v32 }
  0x21   :  { %238 = vmatpush.msrb.mxu0 %v4319_v33  ;;  %258 = vmatpush.msrb.mxu1 %v4321_v34 }
  0x22   :  { %276 = vmatpush.msrb.mxu2 %v4323_v35  ;;  %296 = vmatpush.msrb.mxu3 %v4325_v36 }
  0x23   :  { %239 = vmatpush.msrb.mxu0 %v4331_v37  ;;  %259 = vmatpush.msrb.mxu1 %v4333_v38 }
  0x24   :  { %277 = vmatpush.msrb.mxu2 %v4335_v39  ;;  %297 = vmatpush.msrb.mxu3 %v4337_v40 }
  0x25   :  { %240 = vmatpush.msrb.mxu0 %v4343_v41  ;;  %260 = vmatpush.msrb.mxu1 %v4345_v42 }
  0x26   :  { %278 = vmatpush.msrb.mxu2 %v4347_v43  ;;  %298 = vmatpush.msrb.mxu3 %v4349_v44 }
  0x27   :  { %241 = vmatpush.msrb.mxu0 %v4355_v45  ;;  %261 = vmatpush.msrb.mxu1 %v4357_v46 }
  0x28   :  { %279 = vmatpush.msrb.mxu2 %v4359_v47  ;;  %299 = vmatpush.msrb.mxu3 %v4361_v48 }
  0x29   :  { %242 = vmatpush.msrb.mxu0 %v4367_v49  ;;  %262 = vmatpush.msrb.mxu1 %v4369_v50 }
  0x2a   :  { %280 = vmatpush.msrb.mxu2 %v4371_v51  ;;  %300 = vmatpush.msrb.mxu3 %v4373_v52 }
  0x2b   :  { %243 = vmatpush.msrb.mxu0 %v4379_v53  ;;  %263 = vmatpush.msrb.mxu1 %v4381_v54 }
  0x2c   :  { %281 = vmatpush.msrb.mxu2 %v4383_v55  ;;  %301 = vmatpush.msrb.mxu3 %v4385_v56 }
  0x2d   :  { %244 = vmatpush.msrb.mxu0 %v4391_v57  ;;  %264 = vmatpush.msrb.mxu1 %v4393_v58 }
  0x2e   :  { %282 = vmatpush.msrb.mxu2 %v4395_v59  ;;  %302 = vmatpush.msrb.mxu3 %v4397_v60 }
  0x2f   :  { %245 = vmatpush.msrb.mxu0 %v4403_v61  ;;  %265 = vmatpush.msrb.mxu1 %v4405_v62 }
  0x30   :  { %283 = vmatpush.msrb.mxu2 %v4407_v63  ;;  %303 = vmatpush.msrb.mxu3 %v4409_v0 }
  0x31   :  { %246 = vmatpush.msrb.mxu0 %v4415_v1  ;;  %266 = vmatpush.msrb.mxu1 %v4417_v2 }
  0x32   :  { %284 = vmatpush.msrb.mxu2 %v4419_v3  ;;  %304 = vmatpush.msrb.mxu3 %v4421_v4 }
  0x33   :  { %311 = vmatpush.msra.mxu0 %v4243_v5  ;;  %331 = vmatpush.msra.mxu1 %v4245_v6 }
  0x34   :  { %285 = vmatpush.msrb.mxu2 %v4427_v7  ;;  %305 = vmatpush.msrb.mxu3 %v4429_v8 }
  0x35   :  { %312 = vmatpush.msra.mxu0 %v4251_v9  ;;  %332 = vmatpush.msra.mxu1 %v4253_v10 }
  0x36   :  { %286 = vmatpush.msrb.mxu2 %v4435_v15  ;;  %306 = vmatpush.msrb.mxu3 %v4437_v16 }
  0x37   :  { %313 = vmatpush.msra.mxu0 %v4257_v11  ;;  %333 = vmatpush.msra.mxu1 %v4259_v12 }
  0x38   :  { %351 = vmatpush.msra.mxu2 %v4263_v13  ;;  %371 = vmatpush.msra.mxu3 %v4265_v14 }
  0x39   :  { %314 = vmatpush.msra.mxu0 %v4271_v17  ;;  %334 = vmatpush.msra.mxu1 %v4273_v18 }
  0x3a   :  { %352 = vmatpush.msra.mxu2 %v4277_v19  ;;  %372 = vmatpush.msra.mxu3 %v4279_v20 }
  0x3b   :  { %315 = vmatpush.msra.mxu0 %v4283_v21  ;;  %335 = vmatpush.msra.mxu1 %v4285_v22 }
  0x3c   :  { %353 = vmatpush.msra.mxu2 %v4287_v23  ;;  %373 = vmatpush.msra.mxu3 %v4289_v24 }
  0x3d   :  { %316 = vmatpush.msra.mxu0 %v4295_v25  ;;  %336 = vmatpush.msra.mxu1 %v4297_v26 }
  0x3e   :  { %354 = vmatpush.msra.mxu2 %v4299_v27  ;;  %374 = vmatpush.msra.mxu3 %v4301_v28 }
  0x3f   :  { %317 = vmatpush.msra.mxu0 %v4307_v29  ;;  %337 = vmatpush.msra.mxu1 %v4309_v30  ;;  %v2037_v30 = vld [vmem:[%s6931_s6 + $0x18] sm:$0xff] }
  0x40   :  { %355 = vmatpush.msra.mxu2 %v4311_v31  ;;  %375 = vmatpush.msra.mxu3 %v4313_v32  ;;  %v2034_v31 = vld [vmem:[%s6931_s6] sm:$0xff] }
  0x41   :  { %318 = vmatpush.msra.mxu0 %v4319_v33  ;;  %338 = vmatpush.msra.mxu1 %v4321_v34  ;;  %v2096_v33 = vld [vmem:[%s6933_s8 + $0x10] sm:$0xff] }
  0x42   :  { %356 = vmatpush.msra.mxu2 %v4323_v35  ;;  %376 = vmatpush.msra.mxu3 %v4325_v36  ;;  %v399_v35 = vlaneseq }
  0x43   :  { %319 = vmatpush.msra.mxu0 %v4331_v37  ;;  %339 = vmatpush.msra.mxu1 %v4333_v38  ;;  %v3790_v37 = vld [vmem:[%s6926_s1 + $0x4] sm:$0xf]  ;;  %v406_v38 = vld [vmem:[%s6926_s1] sm:$0xf] }
  0x44   :  { %357 = vmatpush.msra.mxu2 %v4335_v39  ;;  %377 = vmatpush.msra.mxu3 %v4337_v40  ;;  %v4588_v36 = vand.u32 127, %v399_v35  ;;  %v4598_v40 = vperm.slane %v3790_v37, 1 }
  0x45   :  { %320 = vmatpush.msra.mxu0 %v4343_v41  ;;  %340 = vmatpush.msra.mxu1 %v4345_v42  ;;  %v4600_v41 = vperm.slane %v406_v38, 1 }
  0x46   :  { %358 = vmatpush.msra.mxu2 %v4347_v43  ;;  %378 = vmatpush.msra.mxu3 %v4349_v44  ;;  %7071 = vst [vmem:[#allocation9_spill] sm:$0xff] %v4588_v36  ;;  %vm401_vm2 = vcmp.lt.s32.totalorder %v4588_v36, 17  ;;  %vm432_vm3 = vcmp.lt.s32.totalorder %v4588_v36, 16  ;;  %vm747_vm6 = vcmp.lt.s32.totalorder %v4588_v36, 15  ;;  %vm936_vm7 = vcmp.lt.s32.totalorder %v4588_v36, 1 }
  0x47   :  { %321 = vmatpush.msra.mxu0 %v4355_v45  ;;  %341 = vmatpush.msra.mxu1 %v4357_v46  ;;  %7072 = vst [vmem:[#allocation10_spill] sm:$0xff] %v4598_v40  ;;  %v3791_v46 = vld [vmem:[%s6930_s5 + $0x20] sm:$0xff]  ;;  %vm1286_vm8 = vcmp.lt.s32.totalorder %v4588_v36, 127  ;;  %vm1475_vm9 = vcmp.lt.s32.totalorder %v4588_v36, 113  ;;  %vm1664_vm10 = vcmp.lt.s32.totalorder %v4588_v36, 112  ;;  %vm1853_vm11 = vcmp.lt.s32.totalorder %v4588_v36, 111 }
  0x48   :  { %359 = vmatpush.msra.mxu2 %v4359_v47  ;;  %379 = vmatpush.msra.mxu3 %v4361_v48  ;;  %7073 = vst [vmem:[#allocation11_spill] sm:$0xff] %v4600_v41  ;;  %v4613_v48 = vperm.slane %v3790_v37, 2 }
  0x49   :  { %322 = vmatpush.msra.mxu0 %v4367_v49  ;;  %342 = vmatpush.msra.mxu1 %v4369_v50  ;;  %v4616_v49 = vperm.slane %v406_v38, 2 }
  0x4a   :  { %360 = vmatpush.msra.mxu2 %v4371_v51  ;;  %380 = vmatpush.msra.mxu3 %v4373_v52  ;;  %7074 = vst [vmem:[#allocation12_spill] sm:$0xff] %v4613_v48 }
  0x4b   :  { %323 = vmatpush.msra.mxu0 %v4379_v53  ;;  %343 = vmatpush.msra.mxu1 %v4381_v54  ;;  %7075 = vst [vmem:[#allocation13_spill] sm:$0xff] %v4616_v49 }
  0x4c   :  { %361 = vmatpush.msra.mxu2 %v4383_v55  ;;  %381 = vmatpush.msra.mxu3 %v4385_v56  ;;  %v3792_v56 = vld [vmem:[%s6930_s5 + $0x28] sm:$0xff] }
  0x4d   :  { %324 = vmatpush.msra.mxu0 %v4391_v57  ;;  %344 = vmatpush.msra.mxu1 %v4393_v58  ;;  %v4631_v57 = vperm.slane %v3790_v37, 0  ;;  %v4633_v58 = vperm.slane %v3790_v37, 3 }
  0x4e   :  { %362 = vmatpush.msra.mxu2 %v4395_v59  ;;  %382 = vmatpush.msra.mxu3 %v4397_v60 }
  0x4f   :  { %325 = vmatpush.msra.mxu0 %v4403_v61  ;;  %345 = vmatpush.msra.mxu1 %v4405_v62  ;;  %7076 = vst [vmem:[#allocation14_spill] sm:$0xff] %v4631_v57 }
  0x50   :  { %363 = vmatpush.msra.mxu2 %v4407_v63  ;;  %383 = vmatpush.msra.mxu3 %v4409_v0  ;;  %7077 = vst [vmem:[#allocation15_spill] sm:$0xff] %v4633_v58 }
  0x51   :  { %326 = vmatpush.msra.mxu0 %v4415_v1  ;;  %346 = vmatpush.msra.mxu1 %v4417_v2  ;;  %v3793_v1 = vld [vmem:[%s6930_s5 + $0x30] sm:$0xff]  ;;  %v3835_v2 = vld [vmem:[%s6926_s1 + $0x8] sm:$0xf] }
  0x52   :  { %364 = vmatpush.msra.mxu2 %v4419_v3  ;;  %384 = vmatpush.msra.mxu3 %v4421_v4  ;;  %v4653_v3 = vperm.slane %v406_v38, 0  ;;  %v4655_v4 = vperm.slane %v406_v38, 3  ;;  %v421_v38 = vld [vmem:[%s6930_s5 + $0x8] sm:$0xff] }
  0x54   :  { %365 = vmatpush.msra.mxu2 %v4427_v7  ;;  %385 = vmatpush.msra.mxu3 %v4429_v8  ;;  %7078 = vst [vmem:[#allocation16_spill] sm:$0xff] %v4653_v3  ;;  %v4658_v7 = vperm.slane %v3835_v2, 0  ;;  %v4660_v8 = vperm.slane %v3835_v2, 1 }
  0x55   :  { %7079 = vst [vmem:[#allocation17_spill] sm:$0xff] %v4655_v4 }
  0x56   :  { %366 = vmatpush.msra.mxu2 %v4435_v15  ;;  %386 = vmatpush.msra.mxu3 %v4437_v16  ;;  %7080 = vst [vmem:[#allocation18_spill] sm:$0xff] %v4658_v7 }
  0x57   :  { %7081 = vst [vmem:[#allocation19_spill] sm:$0xff] %v4660_v8 }
  0x79   :  { %v72_v5 = vpop.permute.xlu0 %71 }
  0x8c   :  { %v104_v6 = vpop.f32.mrf.mxu0  ;;  %v124_v9 = vpop.f32.mrf.mxu1 }
  0x8d   :  { %v105_v10 = vadd.f32 %v104_v6, %v72_v5  ;;  %v125_v11 = vadd.f32 %v124_v9, %v72_v5 }
  0x8f   :  { %247 = vmatmul.f32.vlgmr.msrb.gmra.mxu0 %v105_v10  ;;  %267 = vmatmul.f32.vlgmr.msrb.gmra.mxu1 %v125_v11 }
  0x90   :  { %287 = vmatmul.f32.vlgmr.msrb.gmra.mxu2 %v105_v10  ;;  %307 = vmatmul.f32.vlgmr.msrb.gmra.mxu3 %v125_v11 }
  0x9a   :  { %v144_v12 = vpop.f32.mrf.mxu2  ;;  %v164_v13 = vpop.f32.mrf.mxu3 }
  0x9b   :  { %v145_v14 = vadd.f32 %v144_v12, %v72_v5  ;;  %v165_v17 = vadd.f32 %v164_v13, %v72_v5 }
  0x9d   :  { %327 = vmatmul.f32.vlgmr.msra.gmra.mxu0 %v145_v14  ;;  %347 = vmatmul.f32.vlgmr.msra.gmra.mxu1 %v165_v17 }
  0x9e   :  { %367 = vmatmul.f32.vlgmr.msra.gmra.mxu2 %v145_v14  ;;  %387 = vmatmul.f32.vlgmr.msra.gmra.mxu3 %v165_v17 }
 0x10c   :  { %v248_v18 = vpop.f32.mrf.mxu0  ;;  %v268_v19 = vpop.f32.mrf.mxu1 }
 0x10d   :  { %v4507_v20 = vadd.f32 %v268_v19, %v248_v18  ;;  %v3794_v18 = vld [vmem:[%s6930_s5 + $0x38] sm:$0xff]  ;;  %v4683_v19 = vperm.slane %v3835_v2, 2 }
 0x10f   :  { %7067 = vst [vmem:[#allocation5_spill] sm:$0xff] %v4507_v20  ;;  %424 = vrot.lane.b32.xlu2 %v4507_v20, %s4153_s27 }
 0x110   :  { %7082 = vst [vmem:[#allocation20_spill] sm:$0xff] %v4683_v19 }
 0x113   :  { %v288_v21 = vpop.f32.mrf.mxu2  ;;  %v308_v22 = vpop.f32.mrf.mxu3 }
 0x114   :  { %v4511_v23 = vadd.f32 %v308_v22, %v288_v21  ;;  %v4685_v21 = vperm.slane %v3835_v2, 3 }
 0x116   :  { %7068 = vst [vmem:[#allocation6_spill] sm:$0xff] %v4511_v23  ;;  %426 = vrot.lane.b32.xlu0 %v4511_v23, %s4153_s27 }
 0x117   :  { %393 = vrot.lane.b32.xlu2 %v4511_v23, %s4155_s0  ;;  %7083 = vst [vmem:[#allocation21_spill] sm:$0xff] %v4685_v21 }
 0x11a   :  { %v328_v24 = vpop.f32.mrf.mxu0  ;;  %v348_v25 = vpop.f32.mrf.mxu1 }
 0x11b   :  { %v4517_v26 = vadd.f32 %v348_v25, %v328_v24 }
 0x11d   :  { %7069 = vst [vmem:[#allocation7_spill] sm:$0xff] %v4517_v26  ;;  %428 = vrot.lane.b32.xlu1 %v4517_v26, %s4153_s27 }
 0x11e   :  { %395 = vrot.lane.b32.xlu0 %v4517_v26, %s4155_s0 }
 0x11f   :  { %391 = vrot.lane.b32.xlu2 %v4507_v20, %s4155_s0 }
 0x121   :  { %v368_v27 = vpop.f32.mrf.mxu2  ;;  %v388_v28 = vpop.f32.mrf.mxu3 }
 0x122   :  { %v4525_v29 = vadd.f32 %v388_v28, %v368_v27 }
 0x124   :  { %7070 = vst [vmem:[#allocation8_spill] sm:$0xff] %v4525_v29 }
 0x125   :  { %430 = vrot.lane.b32.xlu1 %v4525_v29, %s4153_s27 }
 0x126   :  { %741 = vrot.lane.b32.xlu0 %v4511_v23, %s4156_s2 }
 0x127   :  { %745 = vrot.lane.b32.xlu2 %v4525_v29, %s4156_s2 }
 0x12d   :  { %397 = vrot.lane.b32.xlu1 %v4525_v29, %s4155_s0 }
 0x12e   :  { %739 = vrot.lane.b32.xlu0 %v4507_v20, %s4156_s2 }
 0x12f   :  { %932 = vrot.lane.b32.xlu2 %v4517_v26, %s4157_s3 }
 0x135   :  { %743 = vrot.lane.b32.xlu1 %v4517_v26, %s4156_s2 }
 0x136   :  { %934 = vrot.lane.b32.xlu0 %v4525_v29, %s4157_s3 }
 0x137   :  { %1278 = vrot.lane.b32.xlu2 %v4507_v20, %s4158_s17 }
 0x13d   :  { %930 = vrot.lane.b32.xlu1 %v4511_v23, %s4157_s3 }
 0x13e   :  { %1282 = vrot.lane.b32.xlu0 %v4517_v26, %s4158_s17 }
 0x13f   :  { %1280 = vrot.lane.b32.xlu2 %v4511_v23, %s4158_s17 }
 0x145   :  { %928 = vrot.lane.b32.xlu1 %v4507_v20, %s4157_s3 }
 0x146   :  { %1467 = vrot.lane.b32.xlu0 %v4507_v20, %s4159_s18 }
 0x147   :  { %1473 = vrot.lane.b32.xlu2 %v4525_v29, %s4159_s18 }
 0x14d   :  { %1284 = vrot.lane.b32.xlu1 %v4525_v29, %s4158_s17 }
 0x14e   :  { %1469 = vrot.lane.b32.xlu0 %v4511_v23, %s4159_s18 }
 0x14f   :  { %1660 = vrot.lane.b32.xlu2 %v4517_v26, %s4160_s19 }
 0x155   :  { %1471 = vrot.lane.b32.xlu1 %v4517_v26, %s4159_s18 }
 0x156   :  { %1662 = vrot.lane.b32.xlu0 %v4525_v29, %s4160_s19 }
 0x157   :  { %1845 = vrot.lane.b32.xlu2 %v4507_v20, %s4161_s20 }
 0x15d   :  { %1656 = vrot.lane.b32.xlu1 %v4507_v20, %s4160_s19 }
 0x15e   :  { %1849 = vrot.lane.b32.xlu0 %v4517_v26, %s4161_s20 }
 0x15f   :  { %1847 = vrot.lane.b32.xlu2 %v4511_v23, %s4161_s20 }
 0x165   :  { %1658 = vrot.lane.b32.xlu1 %v4511_v23, %s4160_s19 }
 0x166   :  { %2055 = vperm.xlu0 %4090, %v2037_v30   ;;  %v420_v30 = vld [vmem:[%s6930_s5] sm:$0xff] }
 0x169   :  { %v425_v32 = vpop.permute.xlu2 %424 }
 0x16d   :  { %1851 = vrot.lane.b32.xlu1 %v4525_v29, %s4161_s20 }
 0x16e   :  { %2040 = vperm.xlu0 %4090, %v2034_v31   ;;  %v3860_v31 = vld [vmem:[%s6926_s1 + $0xc] sm:$0xf] }
 0x171   :  { %v394_v34 = vpop.permute.xlu2 %393 }
 0x176   :  { %2110 = vperm.xlu0 %4090, %v2096_v33  }
 0x179   :  { %v392_v39 = vpop.permute.xlu2 %391 }
 0x17a   :  { %v404_v43 = vsel %vm401_vm2, %v392_v39, %v394_v34 }
 0x17b   :  { %v417_v47 = vmul.f32 %v4600_v41, %v404_v43  ;;  %v2035_v41 = vld [vmem:[%s6931_s6 + $0x8] sm:$0xff] }
 0x17c   :  { %2045 = vperm.xlu2 %4092, %v2035_v41  }
 0x181   :  { %v746_v16 = vpop.permute.xlu2 %745 }
 0x188   :  { %v427_v42 = vpop.permute.xlu0 %426 }
 0x189   :  { %v435_v44 = vsel %vm432_vm3, %v425_v32, %v427_v42  ;;  %v933_v33 = vpop.permute.xlu2 %932 }
 0x18a   :  { %v449_v45 = vmul.f32 %v4598_v40, %v435_v44 }
 0x18c   :  { %3800 = vmatpush.msk.msrb.mxu1 %vm470_vm4, %v449_v45 }
 0x18d   :  { %3801 = vmatmul.msk.f32.vlgmr.msrb.gmra.mxu1 %vm457_vm5, %v3791_v46 }
 0x18e   :  { %3820 = vmatpush.msk.msra.mxu1 %vm470_vm4, %v417_v47  ;;  %v4729_v47 = vperm.slane %v3860_v31, 3 }
 0x18f   :  { %v429_v50 = vpop.permute.xlu1 %428 }
 0x190   :  { %v396_v51 = vpop.permute.xlu0 %395  ;;  %v434_v52 = vsel %vm432_vm3, %v427_v42, %v429_v50  ;;  %v4723_v42 = vperm.slane %v3860_v31, 0  ;;  %7087 = vst [vmem:[#allocation25_spill] sm:$0xff] %v4729_v47 }
 0x191   :  { %v403_v53 = vsel %vm401_vm2, %v394_v34, %v396_v51  ;;  %v450_v54 = vmul.f32 %v4613_v48, %v434_v52 }
 0x192   :  { %v418_v55 = vmul.f32 %v4616_v49, %v403_v53  ;;  %7086 = vst [vmem:[#allocation24_spill] sm:$0xff] %v4723_v42  ;;  %v422_v53 = vld [vmem:[%s6930_s5 + $0x10] sm:$0xff]  ;;  %v3988_v49 = vld [vmem:[%s6930_s5 + $0x118] sm:$0xff] }
 0x193   :  { %3805 = vmatpush.msk.msrb.mxu2 %vm470_vm4, %v450_v54 }
 0x194   :  { %3806 = vmatmul.msk.f32.vlgmr.msrb.gmra.mxu2 %vm457_vm5, %v3791_v46 }
 0x195   :  { %3802 = vmatmul.msk.f32.gmra.mxu1 %vm457_vm5, %v3792_v56  ;;  %3825 = vmatpush.msk.msra.mxu2 %vm470_vm4, %v418_v55  ;;  %v423_v55 = vld [vmem:[%s6930_s5 + $0x18] sm:$0xff] }
 0x197   :  { %v431_v59 = vpop.permute.xlu1 %430 }
 0x198   :  { %v742_v60 = vpop.permute.xlu0 %741  ;;  %v433_v61 = vsel %vm432_vm3, %v429_v50, %v431_v59  ;;  %v436_v62 = vsel %vm432_vm3, %v431_v59, %v425_v32  ;;  %v4707_v32 = vperm.slane %v3860_v31, 2  ;;  %v3837_v59 = vld [vmem:[%s6930_s5 + $0x48] sm:$0xff] }
 0x199   :  { %v448_v63 = vmul.f32 %v4631_v57, %v436_v62  ;;  %v451_v0 = vmul.f32 %v4633_v58, %v433_v61  ;;  %v1279_v61 = vpop.permute.xlu2 %1278  ;;  %v3839_v62 = vld [vmem:[%s6930_s5 + $0x58] sm:$0xff]  ;;  %v3986_v58 = vld [vmem:[%s6930_s5 + $0x108] sm:$0xff] }
 0x19a   :  { %7084 = vst [vmem:[#allocation22_spill] sm:$0xff] %v4707_v32 }
 0x19b   :  { %3795 = vmatpush.msk.msrb.mxu0 %vm470_vm4, %v448_v63  ;;  %3810 = vmatpush.msk.msrb.mxu3 %vm470_vm4, %v451_v0  ;;  %v3909_v0 = vld [vmem:[%s6926_s1 + $0x14] sm:$0xf] }
 0x19c   :  { %3796 = vmatmul.msk.f32.vlgmr.msrb.gmra.mxu0 %vm457_vm5, %v3791_v46  ;;  %3807 = vmatmul.msk.f32.gmra.mxu2 %vm457_vm5, %v3792_v56  ;;  %v4793_v2 = vperm.slane %v3909_v0, 1 }
 0x19d   :  { %3803 = vmatmul.msk.f32.gmra.mxu1 %vm457_vm5, %v3793_v1  ;;  %3811 = vmatmul.msk.f32.vlgmr.msrb.gmra.mxu3 %vm457_vm5, %v3791_v46 }
 0x19e   :  { %7088 = vst [vmem:[#allocation26_spill] sm:$0xff] %v4793_v2 }
 0x19f   :  { %v398_v15 = vpop.permute.xlu1 %397 }
 0x1a0   :  { %v740_v5 = vpop.permute.xlu0 %739  ;;  %v402_v6 = vsel %vm401_vm2, %v396_v51, %v398_v15  ;;  %v405_v9 = vsel %vm401_vm2, %v398_v15, %v392_v39  ;;  %v4719_v39 = vperm.slane %v3860_v31, 1  ;;  %v3934_v31 = vld [vmem:[%s6926_s1 + $0x18] sm:$0xf] }
 0x1a1   :  { %v750_v10 = vsel %vm747_vm6, %v740_v5, %v742_v60  ;;  %v751_v11 = vsel %vm747_vm6, %v746_v16, %v740_v5  ;;  %v416_v12 = vmul.f32 %v4653_v3, %v405_v9  ;;  %v419_v13 = vmul.f32 %v4655_v4, %v402_v6 }
 0x1a2   :  { %v763_v14 = vmul.f32 %v4658_v7, %v751_v11  ;;  %v764_v17 = vmul.f32 %v4660_v8, %v750_v10  ;;  %7085 = vst [vmem:[#allocation23_spill] sm:$0xff] %v4719_v39  ;;  %v4806_v9 = vperm.slane %v3909_v0, 2  ;;  %v3862_v11 = vld [vmem:[%s6930_s5 + $0x68] sm:$0xff]  ;;  %v3987_v8 = vld [vmem:[%s6930_s5 + $0x110] sm:$0xff] }
 0x1a3   :  { %3815 = vmatpush.msk.msra.mxu0 %vm470_vm4, %v416_v12  ;;  %3830 = vmatpush.msk.msra.mxu3 %vm470_vm4, %v419_v13  ;;  %v4819_v13 = vperm.slane %v3909_v0, 0 }
 0x1a4   :  { %3845 = vmatpush.msk.msrb.mxu1 %vm470_vm4, %v764_v17  ;;  %3797 = vmatmul.msk.f32.gmra.mxu0 %vm457_vm5, %v3792_v56  ;;  %7089 = vst [vmem:[#allocation27_spill] sm:$0xff] %v4806_v9  ;;  %v4823_v17 = vperm.slane %v3909_v0, 3 }
 0x1a5   :  { %3804 = vmatmul.msk.f32.gmra.mxu1 %vm457_vm5, %v3794_v18  ;;  %3808 = vmatmul.msk.f32.gmra.mxu2 %vm457_vm5, %v3793_v1  ;;  %7090 = vst [vmem:[#allocation28_spill] sm:$0xff] %v4819_v13 }
 0x1a6   :  { %3812 = vmatmul.msk.f32.gmra.mxu3 %vm457_vm5, %v3792_v56  ;;  %3840 = vmatpush.msk.msrb.mxu0 %vm470_vm4, %v763_v14  ;;  %v3836_v56 = vld [vmem:[%s6930_s5 + $0x40] sm:$0xff]  ;;  %7091 = vst [vmem:[#allocation29_spill] sm:$0xff] %v4823_v17 }
 0x1a7   :  { %v744_v22 = vpop.permute.xlu1 %743 }
 0x1a8   :  { %v748_v24 = vsel %vm747_vm6, %v744_v22, %v746_v16  ;;  %v749_v25 = vsel %vm747_vm6, %v742_v60, %v744_v22  ;;  %v935_v43 = vpop.permute.xlu0 %934  ;;  %v3838_v60 = vld [vmem:[%s6930_s5 + $0x50] sm:$0xff]  ;;  %v3861_v16 = vld [vmem:[%s6930_s5 + $0x60] sm:$0xff] }
 0x1a9   :  { %v765_v27 = vmul.f32 %v4683_v19, %v749_v25  ;;  %v766_v28 = vmul.f32 %v4685_v21, %v748_v24  ;;  %v937_v51 = vsel %vm936_vm7, %v933_v33, %v935_v43  ;;  %v3863_v22 = vld [vmem:[%s6930_s5 + $0x70] sm:$0xff] }
 0x1aa   :  { %v955_v54 = vmul.f32 %v4729_v47, %v937_v51  ;;  %v3886_v51 = vld [vmem:[%s6930_s5 + $0x88] sm:$0xff]  ;;  %v3963_v47 = vld [vmem:[%s6930_s5 + $0xf8] sm:$0xff] }
 0x1ab   :  { %3850 = vmatpush.msk.msrb.mxu2 %vm470_vm4, %v765_v27  ;;  %3855 = vmatpush.msk.msrb.mxu3 %vm470_vm4, %v766_v28  ;;  %v3864_v28 = vld [vmem:[%s6930_s5 + $0x78] sm:$0xff] }
 0x1ac   :  { %3798 = vmatmul.msk.f32.gmra.mxu0 %vm457_vm5, %v3793_v1 }
 0x1ad   :  { %3809 = vmatmul.msk.f32.gmra.mxu2 %vm457_vm5, %v3794_v18  ;;  %3821 = vmatmul.msk.f32.vlgmr.msra.gmra.mxu1 %vm457_vm5, %v420_v30 }
 0x1ae   :  { %3813 = vmatmul.msk.f32.gmra.mxu3 %vm457_vm5, %v3793_v1  ;;  %v1281_v1 = vpop.permute.xlu2 %1280 }
 0x1af   :  { %v931_v34 = vpop.permute.xlu1 %930  ;;  %v1289_v14 = vsel %vm1286_vm8, %v1279_v61, %v1281_v1 }
 0x1b0   :  { %v938_v35 = vsel %vm936_vm7, %v931_v34, %v933_v33  ;;  %v1283_v63 = vpop.permute.xlu0 %1282  ;;  %v1302_v24 = vmul.f32 %v4819_v13, %v1289_v14  ;;  %v3937_v13 = vld [vmem:[%s6930_s5 + $0xd0] sm:$0xff] }
 0x1b1   :  { %v954_v37 = vmul.f32 %v4707_v32, %v938_v35  ;;  %v1288_v15 = vsel %vm1286_vm8, %v1281_v1, %v1283_v63 }
 0x1b2   :  { %v1303_v5 = vmul.f32 %v4793_v2, %v1288_v15 }
 0x1b4   :  { %3799 = vmatmul.msk.f32.gmra.mxu0 %vm457_vm5, %v3794_v18 }
 0x1b5   :  { %3822 = vmatmul.msk.f32.gmra.mxu1 %vm457_vm5, %v421_v38  ;;  %3826 = vmatmul.msk.f32.vlgmr.msra.gmra.mxu2 %vm457_vm5, %v420_v30 }
 0x1b6   :  { %3814 = vmatmul.msk.f32.gmra.mxu3 %vm457_vm5, %v3794_v18  ;;  %3875 = vmatpush.msk.msra.mxu2 %vm470_vm4, %v954_v37 }
 0x1b7   :  { %v929_v44 = vpop.permute.xlu1 %928 }
 0x1b8   :  { %v939_v45 = vsel %vm936_vm7, %v929_v44, %v931_v34  ;;  %v940_v46 = vsel %vm936_vm7, %v935_v43, %v929_v44  ;;  %v1468_v27 = vpop.permute.xlu0 %1467  ;;  %v4849_v34 = vperm.slane %v3934_v31, 1  ;;  %v1474_v44 = vpop.permute.xlu2 %1473 }
 0x1b9   :  { %v953_v50 = vmul.f32 %v4719_v39, %v939_v45  ;;  %v952_v52 = vmul.f32 %v4723_v42, %v940_v46  ;;  %v4864_v45 = vperm.slane %v3934_v31, 2 }
 0x1ba   :  { %7092 = vst [vmem:[#allocation30_spill] sm:$0xff] %v4849_v34 }
 0x1bb   :  { %3870 = vmatpush.msk.msra.mxu1 %vm470_vm4, %v953_v50  ;;  %7093 = vst [vmem:[#allocation31_spill] sm:$0xff] %v4864_v45 }
 0x1bc   :  { %3816 = vmatmul.msk.f32.vlgmr.msra.gmra.mxu0 %vm457_vm5, %v420_v30 }
 0x1bd   :  { %3823 = vmatmul.msk.f32.gmra.mxu1 %vm457_vm5, %v422_v53  ;;  %3827 = vmatmul.msk.f32.gmra.mxu2 %vm457_vm5, %v421_v38 }
 0x1be   :  { %3831 = vmatmul.msk.f32.vlgmr.msra.gmra.mxu3 %vm457_vm5, %v420_v30  ;;  %3865 = vmatpush.msk.msra.mxu0 %vm470_vm4, %v952_v52 }
 0x1bf   :  { %3880 = vmatpush.msk.msra.mxu3 %vm470_vm4, %v955_v54  ;;  %v1285_v6 = vpop.permute.xlu1 %1284  ;;  %v4879_v54 = vperm.slane %v3934_v31, 0 }
 0x1c0   :  { %v1287_v10 = vsel %vm1286_vm8, %v1283_v63, %v1285_v6  ;;  %v1290_v18 = vsel %vm1286_vm8, %v1285_v6, %v1279_v61  ;;  %v1470_v33 = vpop.permute.xlu0 %1469  ;;  %v1661_v14 = vpop.permute.xlu2 %1660 }
 0x1c1   :  { %v1304_v12 = vmul.f32 %v4806_v9, %v1287_v10  ;;  %v1305_v25 = vmul.f32 %v4823_v17, %v1290_v18  ;;  %7094 = vst [vmem:[#allocation32_spill] sm:$0xff] %v4879_v54  ;;  %v3888_v10 = vld [vmem:[%s6930_s5 + $0x98] sm:$0xff]  ;;  %v3985_v9 = vld [vmem:[%s6930_s5 + $0x100] sm:$0xff] }
 0x1c4   :  { %3817 = vmatmul.msk.f32.gmra.mxu0 %vm457_vm5, %v421_v38 }
 0x1c5   :  { %3824 = vmatmul.msk.f32.gmra.mxu1 %vm457_vm5, %v423_v55  ;;  %3828 = vmatmul.msk.f32.gmra.mxu2 %vm457_vm5, %v422_v53 }
 0x1c6   :  { %3832 = vmatmul.msk.f32.gmra.mxu3 %vm457_vm5, %v421_v38  ;;  %v3885_v38 = vld [vmem:[%s6930_s5 + $0x80] sm:$0xff] }
 0x1c7   :  { %v1472_v30 = vpop.permute.xlu1 %1471 }
 0x1c8   :  { %v1477_v35 = vsel %vm1475_vm9, %v1470_v33, %v1472_v30  ;;  %v1476_v46 = vsel %vm1475_vm9, %v1472_v30, %v1474_v44  ;;  %v3910_v30 = vld [vmem:[%s6930_s5 + $0xa0] sm:$0xff] }
 0x1c9   :  { %v1492_v43 = vmul.f32 %v4849_v34, %v1477_v35  ;;  %v1493_v52 = vmul.f32 %v4864_v45, %v1476_v46 }
 0x1cc   :  { %3818 = vmatmul.msk.f32.gmra.mxu0 %vm457_vm5, %v422_v53 }
 0x1cd   :  { %3829 = vmatmul.msk.f32.gmra.mxu2 %vm457_vm5, %v423_v55  ;;  %3846 = vmatmul.msk.f32.vlgmr.msrb.gmra.mxu1 %vm457_vm5, %v3836_v56 }
 0x1ce   :  { %3833 = vmatmul.msk.f32.gmra.mxu3 %vm457_vm5, %v422_v53  ;;  %3894 = vmatpush.msk.msrb.mxu1 %vm470_vm4, %v4511_v23 }
 0x1cf   :  { %v1657_v0 = vpop.permute.xlu1 %1656 }
 0x1d4   :  { %3819 = vmatmul.msk.f32.gmra.mxu0 %vm457_vm5, %v423_v55 }
 0x1d5   :  { %3847 = vmatmul.msk.f32.gmra.mxu1 %vm457_vm5, %v3837_v59  ;;  %3851 = vmatmul.msk.f32.vlgmr.msrb.gmra.mxu2 %vm457_vm5, %v3836_v56 }
 0x1d6   :  { %3834 = vmatmul.msk.f32.gmra.mxu3 %vm457_vm5, %v423_v55  ;;  %3899 = vmatpush.msk.msrb.mxu2 %vm470_vm4, %v4517_v26  ;;  %v4881_v55 = vperm.slane %v3934_v31, 3 }
 0x1d8   :  { %7095 = vst [vmem:[#allocation33_spill] sm:$0xff] %v4881_v55 }
 0x1dc   :  { %3841 = vmatmul.msk.f32.vlgmr.msrb.gmra.mxu0 %vm457_vm5, %v3836_v56 }
 0x1dd   :  { %3848 = vmatmul.msk.f32.gmra.mxu1 %vm457_vm5, %v3838_v60  ;;  %3852 = vmatmul.msk.f32.gmra.mxu2 %vm457_vm5, %v3837_v59 }
 0x1de   :  { %3856 = vmatmul.msk.f32.vlgmr.msrb.gmra.mxu3 %vm457_vm5, %v3836_v56  ;;  %3889 = vmatpush.msk.msrb.mxu0 %vm470_vm4, %v4507_v20  ;;  %v1478_v56 = vsel %vm1475_vm9, %v1468_v27, %v1470_v33  ;;  %v1663_v33 = vpop.permute.xlu0 %1662 }
 0x1df   :  { %3904 = vmatpush.msk.msrb.mxu3 %vm470_vm4, %v4525_v29  ;;  %v1491_v63 = vmul.f32 %v4879_v54, %v1478_v56  ;;  %v3913_v29 = vld [vmem:[%s6930_s5 + $0xb8] sm:$0xff] }
 0x1e4   :  { %3842 = vmatmul.msk.f32.gmra.mxu0 %vm457_vm5, %v3837_v59 }
 0x1e5   :  { %3849 = vmatmul.msk.f32.gmra.mxu1 %vm457_vm5, %v3839_v62  ;;  %3853 = vmatmul.msk.f32.gmra.mxu2 %vm457_vm5, %v3838_v60 }
 0x1e6   :  { %3857 = vmatmul.msk.f32.gmra.mxu3 %vm457_vm5, %v3837_v59 }
 0x1ec   :  { %3843 = vmatmul.msk.f32.gmra.mxu0 %vm457_vm5, %v3838_v60 }
 0x1ed   :  { %3854 = vmatmul.msk.f32.gmra.mxu2 %vm457_vm5, %v3839_v62  ;;  %3871 = vmatmul.msk.f32.vlgmr.msra.gmra.mxu1 %vm457_vm5, %v3861_v16 }
 0x1ee   :  { %3858 = vmatmul.msk.f32.gmra.mxu3 %vm457_vm5, %v3838_v60  ;;  %3919 = vmatpush.msk.msra.mxu1 %vm470_vm4, %v1303_v5  ;;  %v1479_v60 = vsel %vm1475_vm9, %v1474_v44, %v1468_v27 }
 0x1ef   :  { %v1494_v1 = vmul.f32 %v4881_v55, %v1479_v60 }
 0x1f4   :  { %3844 = vmatmul.msk.f32.gmra.mxu0 %vm457_vm5, %v3839_v62 }
 0x1f5   :  { %3872 = vmatmul.msk.f32.gmra.mxu1 %vm457_vm5, %v3862_v11  ;;  %3876 = vmatmul.msk.f32.vlgmr.msra.gmra.mxu2 %vm457_vm5, %v3861_v16 }
 0x1f6   :  { %3859 = vmatmul.msk.f32.gmra.mxu3 %vm457_vm5, %v3839_v62  ;;  %3924 = vmatpush.msk.msra.mxu2 %vm470_vm4, %v1304_v12  ;;  %v3887_v62 = vld [vmem:[%s6930_s5 + $0x90] sm:$0xff]  ;;  %v3959_v12 = vld [vmem:[%s6926_s1 + $0x1c] sm:$0xf] }
 0x1f7   :  { %v4917_v18 = vperm.slane %v3959_v12, 1  ;;  %v4938_v35 = vperm.slane %v3959_v12, 2  ;;  %v4959_v60 = vperm.slane %v3959_v12, 0 }
 0x1f9   :  { %7097 = vst [vmem:[#allocation35_spill] sm:$0xff] %v4917_v18 }
 0x1fa   :  { %7098 = vst [vmem:[#allocation36_spill] sm:$0xff] %v4938_v35 }
 0x1fb   :  { %7099 = vst [vmem:[#allocation37_spill] sm:$0xff] %v4959_v60 }
 0x1fc   :  { %3866 = vmatmul.msk.f32.vlgmr.msra.gmra.mxu0 %vm457_vm5, %v3861_v16 }
 0x1fd   :  { %3873 = vmatmul.msk.f32.gmra.mxu1 %vm457_vm5, %v3863_v22  ;;  %3877 = vmatmul.msk.f32.gmra.mxu2 %vm457_vm5, %v3862_v11 }
 0x1fe   :  { %3881 = vmatmul.msk.f32.vlgmr.msra.gmra.mxu3 %vm457_vm5, %v3861_v16  ;;  %3914 = vmatpush.msk.msra.mxu0 %vm470_vm4, %v1302_v24 }
 0x1ff   :  { %3929 = vmatpush.msk.msra.mxu3 %vm470_vm4, %v1305_v25 }
 0x204   :  { %3867 = vmatmul.msk.f32.gmra.mxu0 %vm457_vm5, %v3862_v11 }
 0x205   :  { %3874 = vmatmul.msk.f32.gmra.mxu1 %vm457_vm5, %v3864_v28  ;;  %3878 = vmatmul.msk.f32.gmra.mxu2 %vm457_vm5, %v3863_v22 }
 0x206   :  { %3882 = vmatmul.msk.f32.gmra.mxu3 %vm457_vm5, %v3862_v11  ;;  %v1659_v11 = vpop.permute.xlu1 %1658 }
 0x207   :  { %v1666_v24 = vsel %vm1664_vm10, %v1659_v11, %v1661_v14 }
 0x208   :  { %v1681_v31 = vmul.f32 %v4917_v18, %v1666_v24 }
 0x20a   :  { %v4853_v37 = vpop.f32.mrf.mxu1 }
 0x20c   :  { %3868 = vmatmul.msk.f32.gmra.mxu0 %vm457_vm5, %v3863_v22 }
 0x20d   :  { %3879 = vmatmul.msk.f32.gmra.mxu2 %vm457_vm5, %v3864_v28  ;;  %3895 = vmatmul.msk.f32.vlgmr.msrb.gmra.mxu1 %vm457_vm5, %v3885_v38 }
 0x20e   :  { %3883 = vmatmul.msk.f32.gmra.mxu3 %vm457_vm5, %v3863_v22  ;;  %3944 = vmatpush.msk.msrb.mxu1 %vm470_vm4, %v1492_v43  ;;  %v1665_v43 = vsel %vm1664_vm10, %v1661_v14, %v1663_v33 }
 0x20f   :  { %v1682_v56 = vmul.f32 %v4938_v35, %v1665_v43  ;;  %v1668_v43 = vsel %vm1664_vm10, %v1663_v33, %v1657_v0  ;;  %v3935_v35 = vld [vmem:[%s6930_s5 + $0xc0] sm:$0xff] }
 0x212   :  { %v4868_v50 = vpop.f32.mrf.mxu1 }
 0x214   :  { %3869 = vmatmul.msk.f32.gmra.mxu0 %vm457_vm5, %v3864_v28 }
 0x215   :  { %3896 = vmatmul.msk.f32.gmra.mxu1 %vm457_vm5, %v3886_v51  ;;  %3900 = vmatmul.msk.f32.vlgmr.msrb.gmra.mxu2 %vm457_vm5, %v3885_v38 }
 0x216   :  { %3884 = vmatmul.msk.f32.gmra.mxu3 %vm457_vm5, %v3864_v28  ;;  %3949 = vmatpush.msk.msrb.mxu2 %vm470_vm4, %v1493_v52  ;;  %v3911_v52 = vld [vmem:[%s6930_s5 + $0xa8] sm:$0xff] }
 0x217   :  { %v558_v53 = vpop.f32.mrf.mxu2 }
 0x219   :  { %v4885_v59 = vpop.f32.mrf.mxu0 }
 0x21a   :  { %7096 = vst [vmem:[#allocation34_spill] sm:$0xff] %v4885_v59  ;;  %v4889_v61 = vpop.f32.mrf.mxu1 }
 0x21c   :  { %3890 = vmatmul.msk.f32.vlgmr.msrb.gmra.mxu0 %vm457_vm5, %v3885_v38 }
 0x21d   :  { %3897 = vmatmul.msk.f32.gmra.mxu1 %vm457_vm5, %v3887_v62  ;;  %3901 = vmatmul.msk.f32.gmra.mxu2 %vm457_vm5, %v3886_v51 }
 0x21e   :  { %3905 = vmatmul.msk.f32.vlgmr.msrb.gmra.mxu3 %vm457_vm5, %v3885_v38  ;;  %3939 = vmatpush.msk.msrb.mxu0 %vm470_vm4, %v1491_v63  ;;  %v4961_v63 = vperm.slane %v3959_v12, 3 }
 0x21f   :  { %3954 = vmatpush.msk.msrb.mxu3 %vm470_vm4, %v1494_v1  ;;  %v561_v15 = vpop.f32.mrf.mxu2  ;;  %v1667_v1 = vsel %vm1664_vm10, %v1657_v0, %v1659_v11 }
 0x220   :  { %v587_v16 = vpop.f32.mrf.mxu3  ;;  %7100 = vst [vmem:[#allocation38_spill] sm:$0xff] %v4961_v63  ;;  %v1680_v12 = vmul.f32 %v4959_v60, %v1667_v1  ;;  %v1683_v11 = vmul.f32 %v4961_v63, %v1668_v43 }
 0x221   :  { %v4902_v5 = vpop.f32.mrf.mxu0 }
 0x222   :  { %v4904_v6 = vpop.f32.mrf.mxu1 }
 0x224   :  { %3891 = vmatmul.msk.f32.gmra.mxu0 %vm457_vm5, %v3886_v51 }
 0x225   :  { %3898 = vmatmul.msk.f32.gmra.mxu1 %vm457_vm5, %v3888_v10  ;;  %3902 = vmatmul.msk.f32.gmra.mxu2 %vm457_vm5, %v3887_v62 }
 0x226   :  { %3906 = vmatmul.msk.f32.gmra.mxu3 %vm457_vm5, %v3886_v51 }
 0x228   :  { %v4919_v22 = vpop.f32.mrf.mxu2 }
 0x229   :  { %v4923_v25 = vpop.f32.mrf.mxu3  ;;  %v4925_v27 = vpop.f32.mrf.mxu0 }
 0x22a   :  { %v4927_v28 = vpop.f32.mrf.mxu1 }
 0x22c   :  { %3892 = vmatmul.msk.f32.gmra.mxu0 %vm457_vm5, %v3887_v62 }
 0x22d   :  { %3903 = vmatmul.msk.f32.gmra.mxu2 %vm457_vm5, %v3888_v10  ;;  %3920 = vmatmul.msk.f32.vlgmr.msra.gmra.mxu1 %vm457_vm5, %v3910_v30 }
 0x22e   :  { %3907 = vmatmul.msk.f32.gmra.mxu3 %vm457_vm5, %v3887_v62  ;;  %3969 = vmatpush.msk.msra.mxu1 %vm470_vm4, %v1681_v31 }
 0x230   :  { %v4940_v38 = vpop.f32.mrf.mxu2 }
 0x231   :  { %v4944_v44 = vpop.f32.mrf.mxu3  ;;  %v4946_v46 = vpop.f32.mrf.mxu0 }
 0x232   :  { %v4948_v51 = vpop.f32.mrf.mxu1 }
 0x234   :  { %3893 = vmatmul.msk.f32.gmra.mxu0 %vm457_vm5, %v3888_v10 }
 0x235   :  { %3921 = vmatmul.msk.f32.gmra.mxu1 %vm457_vm5, %v3911_v52  ;;  %3925 = vmatmul.msk.f32.vlgmr.msra.gmra.mxu2 %vm457_vm5, %v3910_v30 }
 0x236   :  { %3908 = vmatmul.msk.f32.gmra.mxu3 %vm457_vm5, %v3888_v10  ;;  %3974 = vmatpush.msk.msra.mxu2 %vm470_vm4, %v1682_v56  ;;  %v3912_v56 = vld [vmem:[%s6930_s5 + $0xb0] sm:$0xff] }
 0x238   :  { %v698_v62 = vpop.f32.mrf.mxu2 }
 0x239   :  { %v4965_v14 = vpop.f32.mrf.mxu3  ;;  %v4967_v24 = vadd.f32 %v698_v62, %v558_v53  ;;  %v4969_v31 = vpop.f32.mrf.mxu0 }
 0x23a   :  { %7101 = vst [vmem:[#allocation39_spill] sm:$0xff] %v4969_v31  ;;  %v4973_v10 = vpop.f32.mrf.mxu1  ;;  %v1846_v53 = vpop.permute.xlu2 %1845 }
 0x23c   :  { %3915 = vmatmul.msk.f32.vlgmr.msra.gmra.mxu0 %vm457_vm5, %v3910_v30 }
 0x23d   :  { %3922 = vmatmul.msk.f32.gmra.mxu1 %vm457_vm5, %v3912_v56  ;;  %3926 = vmatmul.msk.f32.gmra.mxu2 %vm457_vm5, %v3911_v52 }
 0x23e   :  { %3930 = vmatmul.msk.f32.vlgmr.msra.gmra.mxu3 %vm457_vm5, %v3910_v30  ;;  %3964 = vmatpush.msk.msra.mxu0 %vm470_vm4, %v1680_v12  ;;  %v1850_v30 = vpop.permute.xlu0 %1849 }
 0x23f   :  { %3979 = vmatpush.msk.msra.mxu3 %vm470_vm4, %v1683_v11 }
 0x240   :  { %v701_v0 = vpop.f32.mrf.mxu2 }
 0x241   :  { %v4986_v33 = vadd.f32 %v701_v0, %v561_v15  ;;  %v727_v62 = vpop.f32.mrf.mxu3  ;;  %v4988_v1 = vpop.f32.mrf.mxu0  ;;  %v3984_v15 = vld [vmem:[%s6926_s1 + $0x20] sm:$0xf] }
 0x242   :  { %v4990_v23 = vadd.f32 %v727_v62, %v587_v16  ;;  %v4992_v43 = vpop.f32.mrf.mxu1  ;;  %v1848_v16 = vpop.permute.xlu2 %1847  ;;  %v5005_v12 = vperm.slane %v3984_v15, 1 }
 0x243   :  { %v1855_v0 = vsel %vm1853_vm11, %v1848_v16, %v1850_v30 }
 0x244   :  { %3916 = vmatmul.msk.f32.gmra.mxu0 %vm457_vm5, %v3911_v52  ;;  %7102 = vst [vmem:[#allocation40_spill] sm:$0xff] %v5005_v12  ;;  %v1870_v60 = vmul.f32 %v5005_v12, %v1855_v0 }
 0x245   :  { %3923 = vmatmul.msk.f32.gmra.mxu1 %vm457_vm5, %v3913_v29  ;;  %3927 = vmatmul.msk.f32.gmra.mxu2 %vm457_vm5, %v3912_v56 }
 0x246   :  { %3931 = vmatmul.msk.f32.gmra.mxu3 %vm457_vm5, %v3911_v52 }
 0x248   :  { %v704_v11 = vpop.f32.mrf.mxu2 }
 0x249   :  { %v705_v62 = vadd.f32 %v704_v11, %v4919_v22  ;;  %v730_v20 = vpop.f32.mrf.mxu3  ;;  %v5010_v26 = vpop.f32.mrf.mxu0 }
 0x24a   :  { %v731_v52 = vadd.f32 %v730_v20, %v4923_v25  ;;  %v5013_v63 = vpop.f32.mrf.mxu1  ;;  %v1852_v22 = vpop.permute.xlu1 %1851  ;;  %v5024_v20 = vperm.slane %v3984_v15, 2 }
 0x24b   :  { %v1854_v11 = vsel %vm1853_vm11, %v1850_v30, %v1852_v22  ;;  %v1856_v30 = vsel %vm1853_vm11, %v1846_v53, %v1848_v16  ;;  %v1857_v17 = vsel %vm1853_vm11, %v1852_v22, %v1846_v53 }
 0x24c   :  { %3917 = vmatmul.msk.f32.gmra.mxu0 %vm457_vm5, %v3912_v56  ;;  %7103 = vst [vmem:[#allocation41_spill] sm:$0xff] %v5024_v20 }
 0x24d   :  { %3928 = vmatmul.msk.f32.gmra.mxu2 %vm457_vm5, %v3913_v29  ;;  %3945 = vmatmul.msk.f32.vlgmr.msrb.gmra.mxu1 %vm457_vm5, %v3935_v35 }
 0x24e   :  { %3932 = vmatmul.msk.f32.gmra.mxu3 %vm457_vm5, %v3912_v56  ;;  %3994 = vmatpush.msk.msrb.mxu1 %vm470_vm4, %v1870_v60  ;;  %v3936_v56 = vld [vmem:[%s6930_s5 + $0xc8] sm:$0xff]  ;;  %v1871_v60 = vmul.f32 %v5024_v20, %v1854_v11 }
 0x250   :  { %v707_v25 = vpop.f32.mrf.mxu2 }
 0x251   :  { %v708_v54 = vadd.f32 %v707_v25, %v4940_v38  ;;  %v733_v0 = vpop.f32.mrf.mxu3  ;;  %v5029_v12 = vpop.f32.mrf.mxu0  ;;  %v5043_v38 = vperm.slane %v3984_v15, 0  ;;  %v5047_v25 = vperm.slane %v3984_v15, 3 }
 0x252   :  { %7104 = vst [vmem:[#allocation42_spill] sm:$0xff] %v5029_v12  ;;  %v734_v55 = vadd.f32 %v733_v0, %v4944_v44  ;;  %v5032_v45 = vpop.f32.mrf.mxu1 }
 0x253   :  { %7105 = vst [vmem:[#allocation43_spill] sm:$0xff] %v5043_v38  ;;  %v1869_v15 = vmul.f32 %v5043_v38, %v1856_v30  ;;  %v3962_v38 = vld [vmem:[%s6930_s5 + $0xf0] sm:$0xff] }
 0x254   :  { %3918 = vmatmul.msk.f32.gmra.mxu0 %vm457_vm5, %v3913_v29  ;;  %7106 = vst [vmem:[#allocation44_spill] sm:$0xff] %v5047_v25 }
 0x255   :  { %3946 = vmatmul.msk.f32.gmra.mxu1 %vm457_vm5, %v3936_v56  ;;  %3950 = vmatmul.msk.f32.vlgmr.msrb.gmra.mxu2 %vm457_vm5, %v3935_v35 }
 0x256   :  { %3933 = vmatmul.msk.f32.gmra.mxu3 %vm457_vm5, %v3913_v29  ;;  %3999 = vmatpush.msk.msrb.mxu2 %vm470_vm4, %v1871_v60 }
 0x258   :  { %v871_v44 = vpop.f32.mrf.mxu2 }
 0x259   :  { %v736_v0 = vpop.f32.mrf.mxu3  ;;  %v5050_v11 = vadd.f32 %v871_v44, %v4967_v24  ;;  %v5052_v20 = vpop.f32.mrf.mxu0  ;;  %v1872_v24 = vmul.f32 %v5047_v25, %v1857_v17  ;;  %v3961_v25 = vld [vmem:[%s6930_s5 + $0xe8] sm:$0xff] }
 0x25a   :  { %7108 = vst [vmem:[#allocation46_spill] sm:$0xff] %v5052_v20  ;;  %v737_v29 = vadd.f32 %v736_v0, %v4965_v14  ;;  %v5057_v60 = vpop.f32.mrf.mxu1 }
 0x25b   :  { %7107 = vst [vmem:[#allocation45_spill] sm:$0xff] %v5050_v11 }
 0x25c   :  { %3940 = vmatmul.msk.f32.vlgmr.msrb.gmra.mxu0 %vm457_vm5, %v3935_v35 }
 0x25d   :  { %3947 = vmatmul.msk.f32.gmra.mxu1 %vm457_vm5, %v3937_v13  ;;  %3951 = vmatmul.msk.f32.gmra.mxu2 %vm457_vm5, %v3936_v56 }
 0x25e   :  { %3955 = vmatmul.msk.f32.vlgmr.msrb.gmra.mxu3 %vm457_vm5, %v3935_v35  ;;  %3989 = vmatpush.msk.msrb.mxu0 %vm470_vm4, %v1869_v15  ;;  %v3938_v35 = vld [vmem:[%s6930_s5 + $0xd8] sm:$0xff] }
 0x25f   :  { %4004 = vmatpush.msk.msrb.mxu3 %vm470_vm4, %v1872_v24 }
 0x260   :  { %v874_v14 = vpop.f32.mrf.mxu2 }
 0x261   :  { %v5071_v53 = vadd.f32 %v874_v14, %v4986_v33  ;;  %v900_v16 = vpop.f32.mrf.mxu3  ;;  %v5073_v22 = vpop.f32.mrf.mxu0  ;;  %v3960_v14 = vld [vmem:[%s6930_s5 + $0xe0] sm:$0xff] }
 0x262   :  { %v5076_v44 = vadd.f32 %v900_v16, %v4990_v23  ;;  %v5078_v17 = vpop.f32.mrf.mxu1 }
 0x264   :  { %7109 = vst [vmem:[#allocation47_spill] sm:$0xff] %v5076_v44  ;;  %3941 = vmatmul.msk.f32.gmra.mxu0 %vm457_vm5, %v3936_v56 }
 0x265   :  { %3948 = vmatmul.msk.f32.gmra.mxu1 %vm457_vm5, %v3938_v35  ;;  %3952 = vmatmul.msk.f32.gmra.mxu2 %vm457_vm5, %v3937_v13 }
 0x266   :  { %3956 = vmatmul.msk.f32.gmra.mxu3 %vm457_vm5, %v3936_v56 }
 0x268   :  { %v877_v33 = vpop.f32.mrf.mxu2 }
 0x269   :  { %v5087_v30 = vadd.f32 %v877_v33, %v705_v62  ;;  %v903_v0 = vpop.f32.mrf.mxu3  ;;  %v5089_v23 = vpop.f32.mrf.mxu0 }
 0x26a   :  { %v5091_v15 = vadd.f32 %v903_v0, %v731_v52  ;;  %v5093_v24 = vpop.f32.mrf.mxu1 }
 0x26c   :  { %3942 = vmatmul.msk.f32.gmra.mxu0 %vm457_vm5, %v3937_v13 }
 0x26d   :  { %3953 = vmatmul.msk.f32.gmra.mxu2 %vm457_vm5, %v3938_v35  ;;  %3970 = vmatmul.msk.f32.vlgmr.msra.gmra.mxu1 %vm457_vm5, %v3960_v14 }
 0x26e   :  { %3957 = vmatmul.msk.f32.gmra.mxu3 %vm457_vm5, %v3937_v13 }
 0x270   :  { %v880_v62 = vpop.f32.mrf.mxu2 }
 0x271   :  { %v5102_v56 = vadd.f32 %v880_v62, %v708_v54  ;;  %v906_v16 = vpop.f32.mrf.mxu3  ;;  %v5104_v52 = vpop.f32.mrf.mxu0 }
 0x272   :  { %7111 = vst [vmem:[#allocation49_spill] sm:$0xff] %v5104_v52  ;;  %v5106_v33 = vadd.f32 %v906_v16, %v734_v55  ;;  %v5108_v0 = vpop.f32.mrf.mxu1 }
 0x273   :  { %7110 = vst [vmem:[#allocation48_spill] sm:$0xff] %v5102_v56 }
 0x274   :  { %3943 = vmatmul.msk.f32.gmra.mxu0 %vm457_vm5, %v3938_v35 }
 0x275   :  { %3971 = vmatmul.msk.f32.gmra.mxu1 %vm457_vm5, %v3961_v25  ;;  %3975 = vmatmul.msk.f32.vlgmr.msra.gmra.mxu2 %vm457_vm5, %v3960_v14 }
 0x276   :  { %3958 = vmatmul.msk.f32.gmra.mxu3 %vm457_vm5, %v3938_v35 }
 0x278   :  { %v5117_v13 = vpop.f32.mrf.mxu2 }
 0x279   :  { %7112 = vst [vmem:[#allocation50_spill] sm:$0xff] %v5117_v13  ;;  %v909_v54 = vpop.f32.mrf.mxu3  ;;  %v5119_v62 = vpop.f32.mrf.mxu0 }
 0x27a   :  { %7113 = vst [vmem:[#allocation51_spill] sm:$0xff] %v5119_v62  ;;  %v5121_v55 = vadd.f32 %v909_v54, %v737_v29  ;;  %v5123_v16 = vpop.f32.mrf.mxu1 }
 0x27c   :  { %7114 = vst [vmem:[#allocation52_spill] sm:$0xff] %v5121_v55  ;;  %3965 = vmatmul.msk.f32.vlgmr.msra.gmra.mxu0 %vm457_vm5, %v3960_v14 }
 0x27d   :  { %3972 = vmatmul.msk.f32.gmra.mxu1 %vm457_vm5, %v3962_v38  ;;  %3976 = vmatmul.msk.f32.gmra.mxu2 %vm457_vm5, %v3961_v25 }
 0x27e   :  { %3980 = vmatmul.msk.f32.vlgmr.msra.gmra.mxu3 %vm457_vm5, %v3960_v14  ;;  %v2036_v14 = vld [vmem:[%s6931_s6 + $0x10] sm:$0xff] }
 0x27f   :  { %2050 = vperm.xlu1 %4091, %v2036_v14  }
 0x280   :  { %v5132_v35 = vpop.f32.mrf.mxu2 }
 0x281   :  { %v5134_v18 = vpop.f32.mrf.mxu3  ;;  %v5136_v29 = vpop.f32.mrf.mxu0 }
 0x282   :  { %7115 = vst [vmem:[#allocation53_spill] sm:$0xff] %v5134_v18  ;;  %v5138_v54 = vpop.f32.mrf.mxu1 }
 0x284   :  { %3966 = vmatmul.msk.f32.gmra.mxu0 %vm457_vm5, %v3961_v25 }
 0x285   :  { %3973 = vmatmul.msk.f32.gmra.mxu1 %vm457_vm5, %v3963_v47  ;;  %3977 = vmatmul.msk.f32.gmra.mxu2 %vm457_vm5, %v3962_v38 }
 0x286   :  { %3981 = vmatmul.msk.f32.gmra.mxu3 %vm457_vm5, %v3961_v25  ;;  %v2094_v25 = vld [vmem:[%s6933_s8] sm:$0xff] }
 0x287   :  { %2100 = vperm.xlu1 %4091, %v2094_v25  }
 0x288   :  { %v5150_v42 = vpop.f32.mrf.mxu2 }
 0x289   :  { %v5152_v34 = vpop.f32.mrf.mxu3  ;;  %v5154_v21 = vpop.f32.mrf.mxu0 }
 0x28a   :  { %v5156_v7 = vpop.f32.mrf.mxu1 }
 0x28c   :  { %3967 = vmatmul.msk.f32.gmra.mxu0 %vm457_vm5, %v3962_v38 }
 0x28d   :  { %3978 = vmatmul.msk.f32.gmra.mxu2 %vm457_vm5, %v3963_v47  ;;  %3995 = vmatmul.msk.f32.vlgmr.msrb.gmra.mxu1 %vm457_vm5, %v3985_v9 }
 0x28e   :  { %3982 = vmatmul.msk.f32.gmra.mxu3 %vm457_vm5, %v3962_v38  ;;  %v2095_v38 = vld [vmem:[%s6933_s8 + $0x8] sm:$0xff] }
 0x28f   :  { %2105 = vperm.xlu1 %4091, %v2095_v38  }
 0x290   :  { %v5168_v14 = vpop.f32.mrf.mxu2 }
 0x291   :  { %7116 = vst [vmem:[#allocation54_spill] sm:$0xff] %v5168_v14  ;;  %v5170_v2 = vpop.f32.mrf.mxu3  ;;  %v5172_v4 = vpop.f32.mrf.mxu0 }
 0x292   :  { %7117 = vst [vmem:[#allocation55_spill] sm:$0xff] %v5172_v4  ;;  %v1195_v3 = vpop.f32.mrf.mxu1 }
 0x294   :  { %3968 = vmatmul.msk.f32.gmra.mxu0 %vm457_vm5, %v3963_v47 }
 0x295   :  { %3996 = vmatmul.msk.f32.gmra.mxu1 %vm457_vm5, %v3986_v58  ;;  %4000 = vmatmul.msk.f32.vlgmr.msrb.gmra.mxu2 %vm457_vm5, %v3985_v9 }
 0x296   :  { %3983 = vmatmul.msk.f32.gmra.mxu3 %vm457_vm5, %v3963_v47 }
 0x298   :  { %v5184_v25 = vpop.f32.mrf.mxu2 }
 0x299   :  { %7118 = vst [vmem:[#allocation56_spill] sm:$0xff] %v5184_v25  ;;  %v5186_v57 = vpop.f32.mrf.mxu3  ;;  %v5188_v39 = vpop.f32.mrf.mxu0 }
 0x29a   :  { %7119 = vst [vmem:[#allocation57_spill] sm:$0xff] %v5186_v57  ;;  %v1198_v32 = vpop.f32.mrf.mxu1 }
 0x29b   :  { %7120 = vst [vmem:[#allocation58_spill] sm:$0xff] %v5188_v39 }
 0x29c   :  { %3990 = vmatmul.msk.f32.vlgmr.msrb.gmra.mxu0 %vm457_vm5, %v3985_v9 }
 0x29d   :  { %3997 = vmatmul.msk.f32.gmra.mxu1 %vm457_vm5, %v3987_v8  ;;  %4001 = vmatmul.msk.f32.gmra.mxu2 %vm457_vm5, %v3986_v58 }
 0x29e   :  { %4005 = vmatmul.msk.f32.vlgmr.msrb.gmra.mxu3 %vm457_vm5, %v3985_v9 }
 0x2a0   :  { %v1224_v47 = vpop.f32.mrf.mxu2 }
 0x2a1   :  { %v5200_v38 = vpop.f32.mrf.mxu3  ;;  %v1166_v40 = vpop.f32.mrf.mxu0 }
 0x2a2   :  { %7121 = vst [vmem:[#allocation59_spill] sm:$0xff] %v5200_v38  ;;  %v5202_v19 = vpop.f32.mrf.mxu1  ;;  %v2097_v38 = vld [vmem:[%s6933_s8 + $0x18] sm:$0xff] }
 0x2a3   :  { %2115 = vperm.xlu2 %4092, %v2097_v38  }
 0x2a4   :  { %3991 = vmatmul.msk.f32.gmra.mxu0 %vm457_vm5, %v3986_v58 }
 0x2a5   :  { %3998 = vmatmul.msk.f32.gmra.mxu1 %vm457_vm5, %v3988_v49  ;;  %4002 = vmatmul.msk.f32.gmra.mxu2 %vm457_vm5, %v3987_v8 }
 0x2a6   :  { %4006 = vmatmul.msk.f32.gmra.mxu3 %vm457_vm5, %v3986_v58 }
 0x2a8   :  { %v5211_v41 = vpop.f32.mrf.mxu2 }
 0x2a9   :  { %v5213_v9 = vpop.f32.mrf.mxu3  ;;  %v5215_v48 = vpop.f32.mrf.mxu0 }
 0x2aa   :  { %v5217_v36 = vpop.f32.mrf.mxu1 }
 0x2ac   :  { %3992 = vmatmul.msk.f32.gmra.mxu0 %vm457_vm5, %v3987_v8 }
 0x2ad   :  { %4003 = vmatmul.msk.f32.gmra.mxu2 %vm457_vm5, %v3988_v49 }
 0x2ae   :  { %4007 = vmatmul.msk.f32.gmra.mxu3 %vm457_vm5, %v3987_v8 }
 0x2b0   :  { %v5225_v18 = vpop.f32.mrf.mxu2 }
 0x2b1   :  { %7122 = vst [vmem:[#allocation60_spill] sm:$0xff] %v5225_v18  ;;  %v5227_v58 = vpop.f32.mrf.mxu3  ;;  %v5229_v44 = vpop.f32.mrf.mxu0 }
 0x2b2   :  { %7123 = vst [vmem:[#allocation61_spill] sm:$0xff] %v5229_v44  ;;  %v1384_v57 = vpop.f32.mrf.mxu1  ;;  %v673_v44 = vadd.f32 %v4948_v51, %v4868_v50 }
 0x2b4   :  { %3993 = vmatmul.msk.f32.gmra.mxu0 %vm457_vm5, %v3988_v49 }
 0x2b6   :  { %4008 = vmatmul.msk.f32.gmra.mxu3 %vm457_vm5, %v3988_v49 }
 0x2b8   :  { %v5233_v55 = vpop.f32.mrf.mxu2 }
 0x2b9   :  { %7124 = vst [vmem:[#allocation62_spill] sm:$0xff] %v5233_v55  ;;  %v5235_v39 = vpop.f32.mrf.mxu3  ;;  %v5237_v8 = vpop.f32.mrf.mxu0  ;;  %v917_v55 = vadd.f32 %v5032_v45, %v673_v44 }
 0x2ba   :  { %7125 = vst [vmem:[#allocation63_spill] sm:$0xff] %v5235_v39  ;;  %v1387_v25 = vpop.f32.mrf.mxu1 }
 0x2bb   :  { %7126 = vst [vmem:[#allocation64_spill] sm:$0xff] %v5237_v8  ;;  %v1106_v39 = vadd.f32 %v5108_v0, %v917_v55 }
 0x2bd   :  { %v1267_v8 = vadd.f32 %v1195_v3, %v1106_v39  ;;  %v644_v3 = vadd.f32 %v4988_v1, %v4902_v5  ;;  %v647_v1 = vadd.f32 %v5010_v26, %v4925_v27 }
 0x2bf   :  { %v1456_v56 = vadd.f32 %v1384_v57, %v1267_v8  ;;  %v920_v8 = vadd.f32 %v5089_v23, %v647_v1 }
 0x2c0   :  { %v1413_v62 = vpop.f32.mrf.mxu2 }
 0x2c1   :  { %v5239_v4 = vpop.f32.mrf.mxu3  ;;  %v1355_v38 = vpop.f32.mrf.mxu0  ;;  %v1109_v26 = vadd.f32 %v5154_v21, %v920_v8  ;;  %v1112_v21 = vadd.f32 %v5170_v2, %v5106_v33 }
 0x2c2   :  { %7127 = vst [vmem:[#allocation65_spill] sm:$0xff] %v5239_v4  ;;  %v5241_v18 = vpop.f32.mrf.mxu1  ;;  %v676_v4 = vadd.f32 %v4973_v10, %v4889_v61  ;;  %v916_v61 = vadd.f32 %v5073_v22, %v644_v3 }
 0x2c4   :  { %v921_v50 = vadd.f32 %v5057_v60, %v676_v4  ;;  %v1107_v4 = vadd.f32 %v5132_v35, %v5071_v53 }
 0x2c6   :  { %v1110_v12 = vadd.f32 %v5123_v16, %v921_v50 }
 0x2c8   :  { %v1416_v13 = vpop.f32.mrf.mxu2  ;;  %v1271_v45 = vadd.f32 %v1198_v32, %v1110_v12  ;;  %v1105_v32 = vadd.f32 %v5136_v29, %v916_v61  ;;  %v1268_v12 = vadd.f32 %v1224_v47, %v1107_v4  ;;  %v1111_v29 = vadd.f32 %v5150_v42, %v5087_v30 }
 0x2c9   :  { %v1442_v11 = vpop.f32.mrf.mxu3  ;;  %v1358_v20 = vpop.f32.mrf.mxu0  ;;  %v1270_v47 = vadd.f32 %v5215_v48, %v1109_v26  ;;  %v670_v26 = vadd.f32 %v4927_v28, %v4853_v37 }
 0x2ca   :  { %v5245_v49 = vpop.f32.mrf.mxu1  ;;  %v1460_v44 = vadd.f32 %v1387_v25, %v1271_v45  ;;  %v1266_v60 = vadd.f32 %v1166_v40, %v1105_v32  ;;  %v1457_v5 = vadd.f32 %v1413_v62, %v1268_v12  ;;  %v1108_v40 = vadd.f32 %v5152_v34, %v5091_v15  ;;  %v5346_v28 = vpop.permute.xlu0 %2055 }
 0x2cb   :  { %v1272_v27 = vadd.f32 %v5211_v41, %v1111_v29  ;;  %v1459_v23 = vadd.f32 %v1358_v20, %v1270_v47  ;;  %v1273_v15 = vadd.f32 %v5227_v58, %v1112_v21  ;;  %v913_v47 = vadd.f32 %v5013_v63, %v670_v26 }
 0x2cc   :  { %v1269_v62 = vadd.f32 %v5213_v9, %v1108_v40  ;;  %v679_v40 = vadd.f32 %v4992_v43, %v4904_v6 }
 0x2ce   :  { %v1458_v50 = vadd.f32 %v1442_v11, %v1269_v62 }
 0x2d0   :  { %v5249_v14 = vpop.f32.mrf.mxu2 }
 0x2d1   :  { %v1445_v52 = vpop.f32.mrf.mxu3  ;;  %v5253_v31 = vpop.f32.mrf.mxu0 }
 0x2d2   :  { %v1573_v59 = vpop.f32.mrf.mxu1  ;;  %v1462_v41 = vadd.f32 %v1445_v52, %v1273_v15 }
 0x2d3   :  { %v5256_v51 = vadd.f32 %v1573_v59, %v1456_v56  ;;  %v1455_v56 = vadd.f32 %v1355_v38, %v1266_v60  ;;  %v1461_v38 = vadd.f32 %v1416_v13, %v1272_v27  ;;  %v925_v27 = vadd.f32 %v5078_v17, %v679_v40 }
 0x2d8   :  { %v5261_v39 = vpop.f32.mrf.mxu2 }
 0x2d9   :  { %v5263_v0 = vpop.f32.mrf.mxu3  ;;  %v5265_v57 = vpop.f32.mrf.mxu0 }
 0x2da   :  { %v1576_v10 = vpop.f32.mrf.mxu1 }
 0x2db   :  { %v5270_v59 = vadd.f32 %v1576_v10, %v1460_v44 }
 0x2e0   :  { %v1602_v55 = vpop.f32.mrf.mxu2 }
 0x2e1   :  { %v5275_v16 = vadd.f32 %v1602_v55, %v1457_v5  ;;  %v5277_v25 = vpop.f32.mrf.mxu3  ;;  %v1544_v22 = vpop.f32.mrf.mxu0 }
 0x2e2   :  { %v5280_v53 = vadd.f32 %v1544_v22, %v1455_v56  ;;  %v1579_v35 = vpop.f32.mrf.mxu1 }
 0x2e8   :  { %v1605_v45 = vpop.f32.mrf.mxu2 }
 0x2e9   :  { %v5290_v3 = vadd.f32 %v1605_v45, %v1461_v38  ;;  %v1631_v44 = vpop.f32.mrf.mxu3  ;;  %v1547_v61 = vpop.f32.mrf.mxu0  ;;  %v1114_v38 = vadd.f32 %v5138_v54, %v925_v27  ;;  %v7130_v27 = vld [vmem:[#allocation39_spill] sm:$0xff] }
 0x2ea   :  { %v5292_v42 = vadd.f32 %v1631_v44, %v1458_v50  ;;  %v5294_v30 = vadd.f32 %v1547_v61, %v1459_v23  ;;  %v1759_v34 = vpop.f32.mrf.mxu1  ;;  %v1102_v44 = vadd.f32 %v5093_v24, %v913_v47 }
 0x2eb   :  { %v1275_v6 = vadd.f32 %v5202_v19, %v1114_v38  ;;  %v7131_v38 = vld [vmem:[#allocation49_spill] sm:$0xff] }
 0x2ec   :  { %v1263_v43 = vadd.f32 %v5156_v7, %v1102_v44 }
 0x2ed   :  { %v1464_v37 = vadd.f32 %v5241_v18, %v1275_v6 }
 0x2ee   :  { %v1452_v17 = vadd.f32 %v5217_v36, %v1263_v43  ;;  %v7128_v36 = vld [vmem:[#allocation42_spill] sm:$0xff]  ;;  %v5372_v43 = vpop.permute.xlu0 %2040 }
 0x2ef   :  { %v1653_v63 = vadd.f32 %v1579_v35, %v1464_v37  ;;  %v650_v35 = vadd.f32 %v7128_v36, %v4946_v46  ;;  %v7134_v37 = vld [vmem:[#allocation46_spill] sm:$0xff] }
 0x2f0   :  { %v5299_v48 = vpop.f32.mrf.mxu2  ;;  %v1641_v21 = vadd.f32 %v5245_v49, %v1452_v17 }
 0x2f1   :  { %v1634_v11 = vpop.f32.mrf.mxu3  ;;  %v5301_v20 = vpop.f32.mrf.mxu0 }
 0x2f2   :  { %v5303_v13 = vadd.f32 %v1634_v11, %v1462_v41  ;;  %v1762_v9 = vpop.f32.mrf.mxu1  ;;  %v1830_v11 = vadd.f32 %v1759_v34, %v1641_v21  ;;  %v7132_v34 = vld [vmem:[#allocation48_spill] sm:$0xff]  ;;  %v7137_v21 = vld [vmem:[#allocation55_spill] sm:$0xff] }
 0x2f3   :  { %v1834_v15 = vadd.f32 %v1762_v9, %v5256_v51 }
 0x2f8   :  { %v5305_v10 = vpop.f32.mrf.mxu2 }
 0x2f9   :  { %v5307_v4 = vpop.f32.mrf.mxu3  ;;  %v5309_v32 = vpop.f32.mrf.mxu0 }
 0x2fa   :  { %v1765_v12 = vpop.f32.mrf.mxu1 }
 0x2fb   :  { %v1838_v54 = vadd.f32 %v1765_v12, %v5270_v59  ;;  %v5360_v59 = vpop.permute.xlu2 %2045  ;;  %v5362_v12 = vpop.permute.xlu1 %2050 }
 0x300   :  { %v5311_v60 = vpop.f32.mrf.mxu2 }
 0x301   :  { %v5313_v2 = vpop.f32.mrf.mxu3  ;;  %v5315_v52 = vpop.f32.mrf.mxu0 }
 0x302   :  { %v1768_v33 = vpop.f32.mrf.mxu1 }
 0x303   :  { %v1842_v24 = vadd.f32 %v1768_v33, %v1653_v63  ;;  %v7129_v33 = vld [vmem:[#allocation34_spill] sm:$0xff] }
 0x304   :  { %v641_v47 = vadd.f32 %v7130_v27, %v7129_v33  ;;  %v7136_v63 = vld [vmem:[#allocation50_spill] sm:$0xff]  ;;  %v7140_v33 = vld [vmem:[#allocation56_spill] sm:$0xff] }
 0x306   :  { %v912_v17 = vadd.f32 %v7134_v37, %v641_v47  ;;  %v7141_v47 = vld [vmem:[#allocation61_spill] sm:$0xff] }
 0x308   :  { %v5317_v58 = vpop.f32.mrf.mxu2 }
 0x309   :  { %v5319_v5 = vpop.f32.mrf.mxu3  ;;  %v5321_v1 = vpop.f32.mrf.mxu0 }
 0x30a   :  { %v1948_v56 = vpop.f32.mrf.mxu1 }
 0x30b   :  { %v2019_v49 = vadd.f32 %v1948_v56, %v1830_v11  ;;  %v7135_v56 = vld [vmem:[#allocation45_spill] sm:$0xff] }
 0x30d   :  { %v2059_v11 = vadd.f32 %v5372_v43, %v2019_v49 }
 0x310   :  { %v5323_v55 = vpop.f32.mrf.mxu2 }
 0x311   :  { %v5325_v22 = vpop.f32.mrf.mxu3  ;;  %v5327_v8 = vpop.f32.mrf.mxu0 }
 0x312   :  { %v1951_v29 = vpop.f32.mrf.mxu1 }
 0x313   :  { %v2023_v40 = vadd.f32 %v1951_v29, %v1834_v15  ;;  %v7133_v29 = vld [vmem:[#allocation54_spill] sm:$0xff] }
 0x314   :  { %v1115_v44 = vadd.f32 %v7133_v29, %v7132_v34  ;;  %v7142_v29 = vld [vmem:[#allocation58_spill] sm:$0xff] }
 0x315   :  { %v2063_v46 = vadd.f32 %v5360_v59, %v2023_v40  ;;  %v7139_v40 = vld [vmem:[#allocation51_spill] sm:$0xff] }
 0x318   :  { %v5334_v62 = vpop.f32.mrf.mxu2 }
 0x319   :  { %v5338_v50 = vpop.f32.mrf.mxu3  ;;  %v5340_v23 = vpop.f32.mrf.mxu0 }
 0x31a   :  { %v1954_v45 = vpop.f32.mrf.mxu1 }
 0x31b   :  { %v2027_v41 = vadd.f32 %v1954_v45, %v1838_v54  ;;  %v924_v45 = vadd.f32 %v7131_v38, %v650_v35  ;;  %v1103_v54 = vadd.f32 %v7136_v63, %v7135_v56  ;;  %v5395_v63 = vld [vmem:[%s6932_s7] sm:$0xff] }
 0x31d   :  { %v2067_v9 = vadd.f32 %v5362_v12, %v2027_v41  ;;  %v1113_v15 = vadd.f32 %v7137_v21, %v924_v45  ;;  %v7138_v41 = vld [vmem:[#allocation60_spill] sm:$0xff]  ;;  %v1264_v27 = vadd.f32 %v7140_v33, %v1103_v54  ;;  %v2079_v45 = vmax.f32 %v2063_v46, 0.0  ;;  %v7145_v46 = vld [vmem:[#allocation57_spill] sm:$0xff]  ;;  %v7149_v33 = vld [vmem:[#allocation63_spill] sm:$0xff] }
 0x31e   :  { %v7146_v21 = vld [vmem:[#allocation64_spill] sm:$0xff] }
 0x31f   :  { %v2083_v35 = vmax.f32 %v2067_v9, 0.0  ;;  %v1274_v38 = vadd.f32 %v7141_v47, %v1113_v15  ;;  %v1839_v9 = vadd.f32 %v5317_v58, %v5290_v3  ;;  %v1835_v58 = vadd.f32 %v5311_v60, %v5275_v16 }
 0x320   :  { %v5350_v61 = vpop.f32.mrf.mxu2 }
 0x321   :  { %v5354_v19 = vpop.f32.mrf.mxu3  ;;  %v5356_v7 = vpop.f32.mrf.mxu0  ;;  %v1463_v49 = vadd.f32 %v5253_v31, %v1274_v38  ;;  %v2024_v60 = vadd.f32 %v5350_v61, %v1835_v58 }
 0x322   :  { %v1957_v18 = vpop.f32.mrf.mxu1 }
 0x323   :  { %v2031_v26 = vadd.f32 %v1957_v18, %v1842_v24  ;;  %v1276_v18 = vadd.f32 %v7138_v41, %v1115_v44  ;;  %v7143_v44 = vld [vmem:[#allocation62_spill] sm:$0xff]  ;;  %v1652_v31 = vadd.f32 %v5301_v20, %v1463_v49 }
 0x324   :  { %v1453_v56 = vadd.f32 %v7143_v44, %v1264_v27 }
 0x325   :  { %v2071_v51 = vadd.f32 %v5346_v28, %v2031_v26  ;;  %v1465_v34 = vadd.f32 %v5249_v14, %v1276_v18  ;;  %v7144_v14 = vld [vmem:[#allocation52_spill] sm:$0xff] }
 0x326   :  { %v1116_v54 = vadd.f32 %v7145_v46, %v7144_v14  ;;  %v1642_v3 = vadd.f32 %v5261_v39, %v1453_v56  ;;  %v7147_v39 = vld [vmem:[#allocation47_spill] sm:$0xff] }
 0x327   :  { %v2087_v6 = vmax.f32 %v2071_v51, 0.0  ;;  %v1101_v51 = vadd.f32 %v7139_v40, %v912_v17  ;;  %v2075_v17 = vmax.f32 %v2059_v11, 0.0  ;;  %v1841_v40 = vadd.f32 %v5327_v8, %v1652_v31 }
 0x328   :  { %v1983_v24 = vpop.f32.mrf.mxu2  ;;  %v1831_v16 = vadd.f32 %v5305_v10, %v1642_v3  ;;  %v1277_v27 = vadd.f32 %v7149_v33, %v1116_v54 }
 0x329   :  { %v5380_v26 = vpop.f32.mrf.mxu3  ;;  %2172 = vmatpush.msra.mxu1 %v2087_v6  ;;  %v1925_v36 = vpop.f32.mrf.mxu0  ;;  %v1262_v37 = vadd.f32 %v7142_v29, %v1101_v51  ;;  %v1654_v6 = vadd.f32 %v5299_v48, %v1465_v34  ;;  %v1837_v48 = vadd.f32 %v5321_v1, %v5294_v30  ;;  %v2028_v18 = vadd.f32 %v1983_v24, %v1839_v9  ;;  %v7148_v30 = vld [vmem:[#allocation53_spill] sm:$0xff] }
 0x32a   :  { %v1104_v1 = vadd.f32 %v7148_v30, %v7147_v39  ;;  %v2020_v38 = vadd.f32 %v5334_v62, %v1831_v16  ;;  %v1466_v61 = vadd.f32 %v5263_v0, %v1277_v27  ;;  %v2091_v62 = vld [vmem:[%s6932_s7 + $0x8] sm:$0xff]  ;;  %v1840_v0 = vadd.f32 %v5325_v22, %v5303_v13  ;;  %v5530_v27 = vpop.permute.xlu0 %2110 }
 0x32b   :  { %2173 = vmatpush.msra.mxu1 %v2083_v35  ;;  %v1451_v15 = vadd.f32 %v7146_v21, %v1262_v37  ;;  %v1843_v41 = vadd.f32 %v5323_v55, %v1654_v6  ;;  %v1833_v35 = vadd.f32 %v5315_v52, %v5280_v53  ;;  %v2026_v20 = vadd.f32 %v1925_v36, %v1837_v48  ;;  %v7150_v36 = vld [vmem:[#allocation59_spill] sm:$0xff] }
 0x32c   :  { %v1265_v47 = vadd.f32 %v7150_v36, %v1104_v1  ;;  %v2068_v34 = vadd.f32 %v5362_v12, %v2028_v18  ;;  %v1655_v49 = vadd.f32 %v5307_v4, %v1466_v61  ;;  %v2060_v14 = vadd.f32 %v5372_v43, %v2020_v38 }
 0x32d   :  { %2174 = vmatpush.msra.mxu1 %v2079_v45  ;;  %v1640_v11 = vadd.f32 %v5265_v57, %v1451_v15  ;;  %v2022_v52 = vadd.f32 %v5356_v7, %v1833_v35  ;;  %v2066_v29 = vadd.f32 %v5362_v12, %v2026_v20  ;;  %v2064_v7 = vadd.f32 %v5360_v59, %v2024_v60 }
 0x32e   :  { %v2084_v46 = vmax.f32 %v2068_v34, 0.0  ;;  %v1844_v54 = vadd.f32 %v5338_v50, %v1655_v49  ;;  %v2076_v48 = vmax.f32 %v2060_v14, 0.0  ;;  %v5564_v34 = vpop.permute.xlu2 %2115 }
 0x32f   :  { %2175 = vmatpush.msra.mxu1 %v2075_v17  ;;  %v1829_v53 = vadd.f32 %v5309_v32, %v1640_v11  ;;  %v7151_v32 = vld [vmem:[#allocation65_spill] sm:$0xff]  ;;  %v1836_v17 = vadd.f32 %v5319_v5, %v5292_v42  ;;  %v2082_v4 = vmax.f32 %v2066_v29, 0.0  ;;  %v2080_v13 = vmax.f32 %v2064_v7, 0.0 }
 0x330   :  { %v1986_v51 = vpop.f32.mrf.mxu2  ;;  %4013 = vmatmul.msk.f32.vlgmr.msra.gmra.mxu1 %vm2118_vm12, %v5395_v63  ;;  %v1454_v44 = vadd.f32 %v7151_v32, %v1265_v47 }
 0x331   :  { %v2032_v55 = vadd.f32 %v1986_v51, %v1843_v41  ;;  %v2012_v24 = vpop.f32.mrf.mxu3  ;;  %v1928_v57 = vpop.f32.mrf.mxu0  ;;  %v2018_v45 = vadd.f32 %v5340_v23, %v1829_v53  ;;  %v2062_v23 = vadd.f32 %v5360_v59, %v2022_v52  ;;  %v2025_v42 = vadd.f32 %v5380_v26, %v1836_v17 }
 0x332   :  { %v2030_v8 = vadd.f32 %v1928_v57, %v1841_v40  ;;  %v1643_v9 = vadd.f32 %v5277_v25, %v1454_v44  ;;  %v2029_v15 = vadd.f32 %v2012_v24, %v1840_v0 }
 0x333   :  { %v2072_v10 = vadd.f32 %v5346_v28, %v2032_v55  ;;  %v2058_v21 = vadd.f32 %v5372_v43, %v2018_v45  ;;  %v2078_v31 = vmax.f32 %v2062_v23, 0.0  ;;  %v2065_v18 = vadd.f32 %v5360_v59, %v2025_v42  ;;  %v2093_v59 = vld [vmem:[%s6932_s7 + $0x18] sm:$0xff] }
 0x334   :  { %v2070_v37 = vadd.f32 %v5346_v28, %v2030_v8  ;;  %v1832_v25 = vadd.f32 %v5313_v2, %v1643_v9  ;;  %v2069_v58 = vadd.f32 %v5362_v12, %v2029_v15  ;;  %v2092_v2 = vld [vmem:[%s6932_s7 + $0x10] sm:$0xff] }
 0x335   :  { %v2088_v56 = vmax.f32 %v2072_v10, 0.0  ;;  %v2074_v50 = vmax.f32 %v2058_v21, 0.0 }
 0x336   :  { %v2086_v6 = vmax.f32 %v2070_v37, 0.0  ;;  %v2021_v3 = vadd.f32 %v5354_v19, %v1832_v25  ;;  %v2085_v12 = vmax.f32 %v2069_v58, 0.0 }
 0x337   :  { %2201 = vmatpush.msra.mxu2 %v2088_v56 }
 0x338   :  { %4014 = vmatmul.msk.f32.gmra.mxu1 %vm2118_vm12, %v2091_v62  ;;  %2143 = vmatpush.msra.mxu0 %v2086_v6  ;;  %v2061_v19 = vadd.f32 %v5372_v43, %v2021_v3  ;;  %v5474_v43 = vpop.permute.xlu1 %2100 }
 0x339   :  { %v2015_v22 = vpop.f32.mrf.mxu3  ;;  %2202 = vmatpush.msra.mxu2 %v2084_v46 }
 0x33a   :  { %v2033_v5 = vadd.f32 %v2015_v22, %v1844_v54  ;;  %2144 = vmatpush.msra.mxu0 %v2082_v4  ;;  %v2077_v11 = vmax.f32 %v2061_v19, 0.0 }
 0x33b   :  { %2203 = vmatpush.msra.mxu2 %v2080_v13 }
 0x33c   :  { %v2073_v41 = vadd.f32 %v5346_v28, %v2033_v5  ;;  %2145 = vmatpush.msra.mxu0 %v2078_v31  ;;  %v2081_v28 = vmax.f32 %v2065_v18, 0.0 }
 0x33d   :  { %2204 = vmatpush.msra.mxu2 %v2076_v48 }
 0x33e   :  { %v2089_v26 = vmax.f32 %v2073_v41, 0.0  ;;  %4017 = vmatmul.msk.f32.vlgmr.msra.gmra.mxu2 %vm2118_vm12, %v5395_v63  ;;  %2146 = vmatpush.msra.mxu0 %v2074_v50 }
 0x33f   :  { %4009 = vmatmul.msk.f32.vlgmr.msra.gmra.mxu0 %vm2118_vm12, %v5395_v63 }
 0x340   :  { %2230 = vmatpush.msra.mxu3 %v2089_v26  ;;  %4015 = vmatmul.msk.f32.gmra.mxu1 %vm2118_vm12, %v2092_v2  ;;  %v5485_v20 = vpop.permute.xlu1 %2105 }
 0x342   :  { %2231 = vmatpush.msra.mxu3 %v2085_v12 }
 0x344   :  { %2232 = vmatpush.msra.mxu3 %v2081_v28 }
 0x346   :  { %2233 = vmatpush.msra.mxu3 %v2077_v11  ;;  %4018 = vmatmul.msk.f32.gmra.mxu2 %vm2118_vm12, %v2091_v62 }
 0x347   :  { %4021 = vmatmul.msk.f32.vlgmr.msra.gmra.mxu3 %vm2118_vm12, %v5395_v63  ;;  %4010 = vmatmul.msk.f32.gmra.mxu0 %vm2118_vm12, %v2091_v62 }
 0x348   :  { %4016 = vmatmul.msk.f32.gmra.mxu1 %vm2118_vm12, %v2093_v59 }
 0x34e   :  { %4019 = vmatmul.msk.f32.gmra.mxu2 %vm2118_vm12, %v2092_v2 }
 0x34f   :  { %4022 = vmatmul.msk.f32.gmra.mxu3 %vm2118_vm12, %v2091_v62  ;;  %4011 = vmatmul.msk.f32.gmra.mxu0 %vm2118_vm12, %v2092_v2 }
 0x356   :  { %4020 = vmatmul.msk.f32.gmra.mxu2 %vm2118_vm12, %v2093_v59 }
 0x357   :  { %4023 = vmatmul.msk.f32.gmra.mxu3 %vm2118_vm12, %v2092_v2  ;;  %4012 = vmatmul.msk.f32.gmra.mxu0 %vm2118_vm12, %v2093_v59 }
 0x35f   :  { %4024 = vmatmul.msk.f32.gmra.mxu3 %vm2118_vm12, %v2093_v59 }
 0x3ad   :  { %v2177_v63 = vpop.f32.mrf.mxu1 }
 0x3ae   :  { %v2178_v35 = vadd.f32 %v2177_v63, %v5474_v43 }
 0x3b0   :  { %v5477_v40 = vmax.f32 %v2178_v35, 0.0 }
 0x3b2   :  { %7152 = vst [vmem:[#allocation42_spill] sm:$0xff] %v5477_v40  ;;  %3116 = vrot.lane.b32.xlu1 %v5477_v40, %s4159_s18  ;;  %2336 = vrot.lane.b32.xlu2 %v5477_v40, %s4153_s27 }
 0x3b3   :  { %2271 = vrot.lane.b32.xlu0 %v5477_v40, %s4155_s0 }
 0x3b5   :  { %v2180_v51 = vpop.f32.mrf.mxu1 }
 0x3b6   :  { %v2181_v39 = vadd.f32 %v2180_v51, %v5485_v20 }
 0x3b8   :  { %v5488_v30 = vmax.f32 %v2181_v39, 0.0 }
 0x3ba   :  { %7153 = vst [vmem:[#allocation34_spill] sm:$0xff] %v5488_v30  ;;  %2568 = vrot.lane.b32.xlu2 %v5477_v40, %s4156_s2  ;;  %2273 = vrot.lane.b32.xlu1 %v5488_v30, %s4155_s0 }
 0x3bb   :  { %2721 = vrot.lane.b32.xlu0 %v5477_v40, %s4157_s3 }
 0x3bc   :  { %v2148_v1 = vpop.f32.mrf.mxu0 }
 0x3bd   :  { %v2149_v16 = vadd.f32 %v2148_v1, %v5474_v43  ;;  %v2183_v33 = vpop.f32.mrf.mxu1 }
 0x3be   :  { %v2184_v53 = vadd.f32 %v2183_v33, %v5530_v27 }
 0x3bf   :  { %v5509_v60 = vmax.f32 %v2149_v16, 0.0 }
 0x3c0   :  { %v5535_v52 = vmax.f32 %v2184_v53, 0.0 }
 0x3c1   :  { %7154 = vst [vmem:[#allocation39_spill] sm:$0xff] %v5509_v60  ;;  %v2206_v55 = vpop.f32.mrf.mxu2 }
 0x3c2   :  { %2723 = vrot.lane.b32.xlu2 %v5488_v30, %s4157_s3  ;;  %2338 = vrot.lane.b32.xlu1 %v5488_v30, %s4153_s27  ;;  %v2207_v24 = vadd.f32 %v2206_v55, %v5474_v43  ;;  %7156 = vst [vmem:[#allocation48_spill] sm:$0xff] %v5535_v52 }
 0x3c3   :  { %2963 = vrot.lane.b32.xlu0 %v5477_v40, %s4158_s17 }
 0x3c4   :  { %v5518_v57 = vmax.f32 %v2207_v24, 0.0  ;;  %v2151_v8 = vpop.f32.mrf.mxu0 }
 0x3c5   :  { %v2152_v36 = vadd.f32 %v2151_v8, %v5485_v20  ;;  %v2186_v38 = vpop.f32.mrf.mxu1 }
 0x3c6   :  { %7155 = vst [vmem:[#allocation49_spill] sm:$0xff] %v5518_v57  ;;  %v2187_v10 = vadd.f32 %v2186_v38, %v5564_v34 }
 0x3c7   :  { %v5544_v47 = vmax.f32 %v2152_v36, 0.0 }
 0x3c8   :  { %v5567_v61 = vmax.f32 %v2187_v10, 0.0 }
 0x3c9   :  { %7157 = vst [vmem:[#allocation54_spill] sm:$0xff] %v5544_v47  ;;  %v2209_v7 = vpop.f32.mrf.mxu2 }
 0x3ca   :  { %2965 = vrot.lane.b32.xlu2 %v5488_v30, %s4158_s17  ;;  %2570 = vrot.lane.b32.xlu1 %v5488_v30, %s4156_s2  ;;  %v2235_v29 = vpop.f32.mrf.mxu3  ;;  %v2210_v56 = vadd.f32 %v2209_v7, %v5485_v20 }
 0x3cb   :  { %3118 = vrot.lane.b32.xlu0 %v5488_v30, %s4159_s18  ;;  %v2236_v37 = vadd.f32 %v2235_v29, %v5474_v43 }
 0x3cc   :  { %v5597_v49 = vmax.f32 %v2210_v56, 0.0  ;;  %v2154_v46 = vpop.f32.mrf.mxu0 }
 0x3cd   :  { %v5586_v44 = vmax.f32 %v2236_v37, 0.0  ;;  %v2155_v4 = vadd.f32 %v2154_v46, %v5530_v27 }
 0x3cf   :  { %7158 = vst [vmem:[#allocation46_spill] sm:$0xff] %v5586_v44  ;;  %v5636_v13 = vmax.f32 %v2155_v4, 0.0 }
 0x3d1   :  { %7162 = vst [vmem:[#allocation60_spill] sm:$0xff] %v5636_v13  ;;  %v2212_v41 = vpop.f32.mrf.mxu2 }
 0x3d2   :  { %2263 = vrot.lane.b32.xlu2 %v5509_v60, %s4155_s0  ;;  %2328 = vrot.lane.b32.xlu1 %v5509_v60, %s4153_s27  ;;  %v2238_v42 = vpop.f32.mrf.mxu3  ;;  %v2213_v2 = vadd.f32 %v2212_v41, %v5530_v27 }
 0x3d3   :  { %2955 = vrot.lane.b32.xlu0 %v5509_v60, %s4158_s17  ;;  %v2239_v5 = vadd.f32 %v2238_v42, %v5485_v20 }
 0x3d4   :  { %v5678_v12 = vmax.f32 %v2213_v2, 0.0  ;;  %v2157_v24 = vpop.f32.mrf.mxu0 }
 0x3d5   :  { %v5663_v58 = vmax.f32 %v2239_v5, 0.0  ;;  %v2158_v8 = vadd.f32 %v2157_v24, %v5564_v34 }
 0x3d7   :  { %7166 = vst [vmem:[#allocation58_spill] sm:$0xff] %v5663_v58  ;;  %v5735_v38 = vmax.f32 %v2158_v8, 0.0 }
 0x3d9   :  { %7175 = vst [vmem:[#allocation59_spill] sm:$0xff] %v5735_v38 }
 0x3da   :  { %2713 = vrot.lane.b32.xlu2 %v5509_v60, %s4157_s3  ;;  %2560 = vrot.lane.b32.xlu1 %v5509_v60, %s4156_s2  ;;  %v2241_v56 = vpop.f32.mrf.mxu3 }
 0x3db   :  { %2344 = vrot.lane.b32.xlu0 %v5518_v57, %s4153_s27  ;;  %v2242_v42 = vadd.f32 %v2241_v56, %v5530_v27 }
 0x3dd   :  { %v5770_v2 = vmax.f32 %v2242_v42, 0.0 }
 0x3df   :  { %7180 = vst [vmem:[#allocation68_spill] sm:$0xff] %v5770_v2 }
 0x3e2   :  { %3261 = vrot.lane.b32.xlu2 %v5509_v60, %s4160_s19  ;;  %3108 = vrot.lane.b32.xlu1 %v5509_v60, %s4159_s18 }
 0x3e3   :  { %2576 = vrot.lane.b32.xlu0 %v5518_v57, %s4156_s2 }
 0x3ea   :  { %2275 = vrot.lane.b32.xlu2 %v5535_v52, %s4155_s0  ;;  %2340 = vrot.lane.b32.xlu1 %v5535_v52, %s4153_s27 }
 0x3eb   :  { %3124 = vrot.lane.b32.xlu0 %v5518_v57, %s4159_s18 }
 0x3f2   :  { %3120 = vrot.lane.b32.xlu2 %v5535_v52, %s4159_s18  ;;  %2572 = vrot.lane.b32.xlu1 %v5535_v52, %s4156_s2 }
 0x3f3   :  { %2265 = vrot.lane.b32.xlu0 %v5544_v47, %s4155_s0 }
 0x3fa   :  { %2279 = vrot.lane.b32.xlu2 %v5518_v57, %s4155_s0  ;;  %2725 = vrot.lane.b32.xlu1 %v5535_v52, %s4157_s3 }
 0x3fb   :  { %2562 = vrot.lane.b32.xlu0 %v5544_v47, %s4156_s2 }
 0x402   :  { %2971 = vrot.lane.b32.xlu2 %v5518_v57, %s4158_s17  ;;  %2967 = vrot.lane.b32.xlu1 %v5535_v52, %s4158_s17 }
 0x403   :  { %2957 = vrot.lane.b32.xlu0 %v5544_v47, %s4158_s17 }
 0x40a   :  { %2729 = vrot.lane.b32.xlu1 %v5518_v57, %s4157_s3  ;;  %3263 = vrot.lane.b32.xlu2 %v5544_v47, %s4160_s19 }
 0x40b   :  { %2277 = vrot.lane.b32.xlu0 %v5567_v61, %s4155_s0 }
 0x40c   :  { %v5575_v45 = vpop.permute.xlu2 %2336 }
 0x412   :  { %3122 = vrot.lane.b32.xlu2 %v5567_v61, %s4159_s18  ;;  %2330 = vrot.lane.b32.xlu1 %v5544_v47, %s4153_s27 }
 0x413   :  { %2727 = vrot.lane.b32.xlu0 %v5567_v61, %s4157_s3 }
 0x414   :  { %v5584_v32 = vpop.permute.xlu2 %2568 }
 0x41a   :  { %2737 = vrot.lane.b32.xlu2 %v5586_v44, %s4157_s3  ;;  %2715 = vrot.lane.b32.xlu1 %v5544_v47, %s4157_s3 }
 0x41b   :  { %2287 = vrot.lane.b32.xlu0 %v5586_v44, %s4155_s0 }
 0x41c   :  { %v5595_v62 = vpop.permute.xlu2 %2723 }
 0x422   :  { %2346 = vrot.lane.b32.xlu2 %v5597_v49, %s4153_s27  ;;  %3110 = vrot.lane.b32.xlu1 %v5544_v47, %s4159_s18 }
 0x423   :  { %2979 = vrot.lane.b32.xlu0 %v5586_v44, %s4158_s17 }
 0x424   :  { %v5605_v0 = vpop.permute.xlu2 %2965  ;;  %v5607_v23 = vpop.permute.xlu1 %3116 }
 0x425   :  { %7159 = vst [vmem:[#allocation45_spill] sm:$0xff] %v5605_v0  ;;  %v5609_v6 = vpop.permute.xlu0 %2271 }
 0x426   :  { %7160 = vst [vmem:[#allocation50_spill] sm:$0xff] %v5607_v23 }
 0x42a   :  { %2281 = vrot.lane.b32.xlu2 %v5597_v49, %s4155_s0  ;;  %2342 = vrot.lane.b32.xlu1 %v5567_v61, %s4153_s27 }
 0x42b   :  { %2731 = vrot.lane.b32.xlu0 %v5597_v49, %s4157_s3 }
 0x42c   :  { %v5617_v9 = vpop.permute.xlu2 %2263  ;;  %v5619_v17 = vpop.permute.xlu1 %2273 }
 0x42d   :  { %v5621_v14 = vpop.permute.xlu0 %2721 }
 0x432   :  { %2578 = vrot.lane.b32.xlu2 %v5597_v49, %s4156_s2  ;;  %2574 = vrot.lane.b32.xlu1 %v5567_v61, %s4156_s2 }
 0x433   :  { %3279 = vrot.lane.b32.xlu0 %v5597_v49, %s4160_s19 }
 0x434   :  { %v5629_v54 = vpop.permute.xlu2 %2713  ;;  %v5631_v21 = vpop.permute.xlu1 %2338 }
 0x435   :  { %v5634_v15 = vpop.permute.xlu0 %2963 }
 0x436   :  { %7161 = vst [vmem:[#allocation55_spill] sm:$0xff] %v5634_v15 }
 0x43a   :  { %3126 = vrot.lane.b32.xlu2 %v5597_v49, %s4159_s18  ;;  %2969 = vrot.lane.b32.xlu1 %v5567_v61, %s4158_s17 }
 0x43b   :  { %2717 = vrot.lane.b32.xlu0 %v5636_v13, %s4157_s3 }
 0x43c   :  { %v5644_v22 = vpop.permute.xlu2 %3261  ;;  %v5646_v25 = vpop.permute.xlu1 %2570 }
 0x43d   :  { %7163 = vst [vmem:[#allocation51_spill] sm:$0xff] %v5644_v22  ;;  %v5648_v31 = vpop.permute.xlu0 %3118 }
 0x43e   :  { %7164 = vst [vmem:[#allocation56_spill] sm:$0xff] %v5648_v31 }
 0x442   :  { %2564 = vrot.lane.b32.xlu2 %v5636_v13, %s4156_s2  ;;  %2352 = vrot.lane.b32.xlu1 %v5586_v44, %s4153_s27 }
 0x443   :  { %2959 = vrot.lane.b32.xlu0 %v5636_v13, %s4158_s17 }
 0x444   :  { %v5657_v48 = vpop.permute.xlu2 %2275  ;;  %v5659_v50 = vpop.permute.xlu1 %2328 }
 0x445   :  { %v5661_v3 = vpop.permute.xlu0 %2955 }
 0x446   :  { %7165 = vst [vmem:[#allocation61_spill] sm:$0xff] %v5661_v3 }
 0x44a   :  { %2981 = vrot.lane.b32.xlu2 %v5663_v58, %s4158_s17  ;;  %2584 = vrot.lane.b32.xlu1 %v5586_v44, %s4156_s2 }
 0x44b   :  { %3112 = vrot.lane.b32.xlu0 %v5636_v13, %s4159_s18 }
 0x44c   :  { %v5672_v18 = vpop.permute.xlu2 %3120  ;;  %v5674_v26 = vpop.permute.xlu1 %2560 }
 0x44d   :  { %7167 = vst [vmem:[#allocation62_spill] sm:$0xff] %v5672_v18  ;;  %v5676_v19 = vpop.permute.xlu0 %2344 }
 0x452   :  { %2348 = vrot.lane.b32.xlu2 %v5678_v12, %s4153_s27  ;;  %3132 = vrot.lane.b32.xlu1 %v5586_v44, %s4159_s18 }
 0x453   :  { %2354 = vrot.lane.b32.xlu0 %v5663_v58, %s4153_s27 }
 0x454   :  { %v2280_v28 = vpop.permute.xlu2 %2279  ;;  %v5686_v11 = vpop.permute.xlu1 %3108 }
 0x455   :  { %7168 = vst [vmem:[#allocation52_spill] sm:$0xff] %v5686_v11  ;;  %v5688_v59 = vpop.permute.xlu0 %2576  ;;  %v5693_v63 = vsel %vm401_vm2, %v5609_v6, %v2280_v28 }
 0x456   :  { %7169 = vst [vmem:[#allocation57_spill] sm:$0xff] %v5688_v59 }
 0x45a   :  { %2283 = vrot.lane.b32.xlu2 %v5678_v12, %s4155_s0  ;;  %2973 = vrot.lane.b32.xlu1 %v5597_v49, %s4158_s17 }
 0x45b   :  { %2289 = vrot.lane.b32.xlu0 %v5663_v58, %s4155_s0 }
 0x45c   :  { %v2972_v35 = vpop.permute.xlu2 %2971  ;;  %v5701_v20 = vpop.permute.xlu1 %2340 }
 0x45d   :  { %v5703_v51 = vpop.permute.xlu0 %3124  ;;  %v5708_v39 = vsel %vm1286_vm8, %v5634_v15, %v2972_v35  ;;  %v2215_v15 = vpop.f32.mrf.mxu2 }
 0x45e   :  { %7171 = vst [vmem:[#allocation64_spill] sm:$0xff] %v5703_v51 }
 0x45f   :  { %7172 = vst [vmem:[#allocation47_spill] sm:$0xff] %v5708_v39 }
 0x462   :  { %2580 = vrot.lane.b32.xlu2 %v5678_v12, %s4156_s2  ;;  %2267 = vrot.lane.b32.xlu1 %v5636_v13, %s4155_s0 }
 0x463   :  { %2586 = vrot.lane.b32.xlu0 %v5663_v58, %s4156_s2 }
 0x464   :  { %v5716_v1 = vpop.permute.xlu2 %3263  ;;  %v5718_v16 = vpop.permute.xlu1 %2572 }
 0x465   :  { %7173 = vst [vmem:[#allocation53_spill] sm:$0xff] %v5716_v1  ;;  %v5720_v55 = vpop.permute.xlu0 %2265 }
 0x46a   :  { %2733 = vrot.lane.b32.xlu2 %v5678_v12, %s4157_s3  ;;  %2332 = vrot.lane.b32.xlu1 %v5636_v13, %s4153_s27 }
 0x46b   :  { %3134 = vrot.lane.b32.xlu0 %v5663_v58, %s4159_s18 }
 0x46c   :  { %v5728_v33 = vpop.permute.xlu2 %3122  ;;  %v5730_v53 = vpop.permute.xlu1 %2725 }
 0x46d   :  { %7174 = vst [vmem:[#allocation63_spill] sm:$0xff] %v5728_v33  ;;  %v5733_v36 = vpop.permute.xlu0 %2562 }
 0x472   :  { %3281 = vrot.lane.b32.xlu2 %v5678_v12, %s4160_s19  ;;  %3265 = vrot.lane.b32.xlu1 %v5636_v13, %s4160_s19 }
 0x473   :  { %2961 = vrot.lane.b32.xlu0 %v5735_v38, %s4158_s17 }
 0x474   :  { %v2738_v10 = vpop.permute.xlu2 %2737  ;;  %v5743_v29 = vpop.permute.xlu1 %2967 }
 0x475   :  { %7176 = vst [vmem:[#allocation65_spill] sm:$0xff] %v5743_v29  ;;  %v5748_v37 = vsel %vm936_vm7, %v2738_v10, %v5629_v54  ;;  %v5750_v7 = vpop.permute.xlu0 %2957 }
 0x476   :  { %7177 = vst [vmem:[#allocation9_spill] sm:$0xff] %v5748_v37 }
 0x477   :  { %7178 = vst [vmem:[#allocation66_spill] sm:$0xff] %v5750_v7 }
 0x47a   :  { %2269 = vrot.lane.b32.xlu2 %v5735_v38, %s4155_s0  ;;  %2739 = vrot.lane.b32.xlu1 %v5663_v58, %s4157_s3 }
 0x47b   :  { %3267 = vrot.lane.b32.xlu0 %v5735_v38, %s4160_s19 }
 0x47c   :  { %v5758_v46 = vpop.permute.xlu2 %2346  ;;  %v5760_v4 = vpop.permute.xlu1 %2729 }
 0x47d   :  { %v5763_v5 = vpop.permute.xlu0 %2277  ;;  %v5768_v41 = vsel %vm936_vm7, %v5760_v4, %v2738_v10 }
 0x47e   :  { %7179 = vst [vmem:[#allocation67_spill] sm:$0xff] %v5768_v41  ;;  %v2216_v41 = vadd.f32 %v2215_v15, %v5564_v34 }
 0x482   :  { %2719 = vrot.lane.b32.xlu2 %v5735_v38, %s4157_s3  ;;  %3287 = vrot.lane.b32.xlu1 %v5663_v58, %s4160_s19 }
 0x483   :  { %2356 = vrot.lane.b32.xlu0 %v5770_v2, %s4153_s27 }
 0x484   :  { %v5778_v24 = vpop.permute.xlu2 %2281  ;;  %v5780_v27 = vpop.permute.xlu1 %2330 }
 0x485   :  { %v5782_v8 = vpop.permute.xlu0 %2727 }
 0x48a   :  { %3114 = vrot.lane.b32.xlu2 %v5735_v38, %s4159_s18  ;;  %2975 = vrot.lane.b32.xlu1 %v5678_v12, %s4158_s17 }
 0x48b   :  { %2291 = vrot.lane.b32.xlu0 %v5770_v2, %s4155_s0 }
 0x48c   :  { %v5790_v10 = vpop.permute.xlu2 %2578  ;;  %v5792_v56 = vpop.permute.xlu1 %2715 }
 0x48d   :  { %7181 = vst [vmem:[#allocation69_spill] sm:$0xff] %v5790_v10  ;;  %v5794_v42 = vpop.permute.xlu0 %2287 }
 0x48e   :  { %7182 = vst [vmem:[#allocation70_spill] sm:$0xff] %v5794_v42  ;;  %v5799_v22 = vsel %vm401_vm2, %v2280_v28, %v5794_v42 }
 0x48f   :  { %7183 = vst [vmem:[#allocation71_spill] sm:$0xff] %v5799_v22 }
 0x492   :  { %2983 = vrot.lane.b32.xlu2 %v5770_v2, %s4158_s17  ;;  %3128 = vrot.lane.b32.xlu1 %v5678_v12, %s4159_s18 }
 0x493   :  { %2588 = vrot.lane.b32.xlu0 %v5770_v2, %s4156_s2 }
 0x494   :  { %v5807_v1 = vpop.permute.xlu2 %3126  ;;  %v5809_v11 = vpop.permute.xlu1 %3110 }
 0x495   :  { %7184 = vst [vmem:[#allocation72_spill] sm:$0xff] %v5807_v1  ;;  %v5811_v3 = vpop.permute.xlu0 %2979 }
 0x496   :  { %7185 = vst [vmem:[#allocation73_spill] sm:$0xff] %v5809_v11  ;;  %v5816_v28 = vsel %vm1286_vm8, %v2972_v35, %v5811_v3  ;;  %v5831_v35 = vmax.f32 %v2216_v41, 0.0  ;;  %v2244_v41 = vpop.f32.mrf.mxu3 }
 0x497   :  { %7186 = vst [vmem:[#allocation74_spill] sm:$0xff] %v5811_v3  ;;  %v2245_v39 = vadd.f32 %v2244_v41, %v5564_v34 }
 0x498   :  { %7187 = vst [vmem:[#allocation75_spill] sm:$0xff] %v5816_v28 }
 0x49a   :  { %3136 = vrot.lane.b32.xlu2 %v5770_v2, %s4159_s18  ;;  %2334 = vrot.lane.b32.xlu1 %v5735_v38, %s4153_s27 }
 0x49b   :  { %2741 = vrot.lane.b32.xlu0 %v5770_v2, %s4157_s3 }
 0x49c   :  { %v5825_v11 = vpop.permute.xlu2 %2564  ;;  %v5827_v37 = vpop.permute.xlu1 %2342 }
 0x49d   :  { %v5829_v18 = vpop.permute.xlu0 %2731 }
 0x4a2   :  { %2350 = vrot.lane.b32.xlu2 %v5831_v35, %s4153_s27  ;;  %2566 = vrot.lane.b32.xlu1 %v5735_v38, %s4156_s2 }
 0x4a3   :  { %3289 = vrot.lane.b32.xlu0 %v5770_v2, %s4160_s19 }
 0x4a4   :  { %v2982_v3 = vpop.permute.xlu2 %2981  ;;  %v5839_v28 = vpop.permute.xlu1 %2574 }
 0x4a5   :  { %v5844_v15 = vsel %vm1286_vm8, %v2982_v3, %v5750_v7  ;;  %v5846_v33 = vpop.permute.xlu0 %3279 }
 0x4a6   :  { %7188 = vst [vmem:[#allocation76_spill] sm:$0xff] %v5844_v15  ;;  %v5861_v15 = vmax.f32 %v2245_v39, 0.0 }
 0x4a7   :  { %7189 = vst [vmem:[#allocation77_spill] sm:$0xff] %v5846_v33 }
 0x4a8   :  { %7191 = vst [vmem:[#allocation79_spill] sm:$0xff] %v5861_v15 }
 0x4aa   :  { %2285 = vrot.lane.b32.xlu2 %v5831_v35, %s4155_s0  ;;  %2735 = vrot.lane.b32.xlu1 %v5831_v35, %s4157_s3 }
 0x4ab   :  { %3130 = vrot.lane.b32.xlu0 %v5831_v35, %s4159_s18 }
 0x4ac   :  { %v5854_v31 = vpop.permute.xlu2 %2348  ;;  %v5856_v1 = vpop.permute.xlu1 %2969 }
 0x4ad   :  { %7190 = vst [vmem:[#allocation78_spill] sm:$0xff] %v5856_v1  ;;  %v5859_v7 = vpop.permute.xlu0 %2717 }
 0x4b2   :  { %2582 = vrot.lane.b32.xlu2 %v5831_v35, %s4156_s2  ;;  %2977 = vrot.lane.b32.xlu1 %v5831_v35, %s4158_s17 }
 0x4b3   :  { %2358 = vrot.lane.b32.xlu0 %v5861_v15, %s4153_s27 }
 0x4b4   :  { %v5869_v33 = vpop.permute.xlu2 %2283  ;;  %v5871_v22 = vpop.permute.xlu1 %2352 }
 0x4b5   :  { %7192 = vst [vmem:[#allocation80_spill] sm:$0xff] %v5871_v22  ;;  %v5873_v0 = vpop.permute.xlu0 %2959 }
 0x4b6   :  { %7193 = vst [vmem:[#allocation81_spill] sm:$0xff] %v5873_v0 }
 0x4ba   :  { %3285 = vrot.lane.b32.xlu2 %v5586_v44, %s4160_s19  ;;  %3283 = vrot.lane.b32.xlu1 %v5831_v35, %s4160_s19 }
 0x4bb   :  { %2293 = vrot.lane.b32.xlu0 %v5861_v15, %s4155_s0 }
 0x4bc   :  { %v5881_v34 = vpop.permute.xlu2 %2580  ;;  %v5883_v39 = vpop.permute.xlu1 %2584 }
 0x4bd   :  { %7194 = vst [vmem:[#allocation82_spill] sm:$0xff] %v5881_v34  ;;  %v5885_v41 = vpop.permute.xlu0 %3112 }
 0x4be   :  { %7195 = vst [vmem:[#allocation83_spill] sm:$0xff] %v5883_v39 }
 0x4bf   :  { %7196 = vst [vmem:[#allocation84_spill] sm:$0xff] %v5885_v41 }
 0x4c2   :  { %3436 = vrot.lane.b32.xlu2 %v5831_v35, %s4161_s20  ;;  %3277 = vrot.lane.b32.xlu1 %v5518_v57, %s4160_s19 }
 0x4c3   :  { %2590 = vrot.lane.b32.xlu0 %v5861_v15, %s4156_s2 }
 0x4c4   :  { %v5893_v42 = vpop.permute.xlu2 %2733  ;;  %v5895_v29 = vpop.permute.xlu1 %3132 }
 0x4c5   :  { %7197 = vst [vmem:[#allocation85_spill] sm:$0xff] %v5895_v29  ;;  %v5897_v23 = vpop.permute.xlu0 %2354 }
 0x4ca   :  { %2743 = vrot.lane.b32.xlu2 %v5861_v15, %s4157_s3  ;;  %3420 = vrot.lane.b32.xlu1 %v5735_v38, %s4161_s20 }
 0x4cb   :  { %3275 = vrot.lane.b32.xlu0 %v5567_v61, %s4160_s19 }
 0x4cc   :  { %v5905_v39 = vpop.permute.xlu2 %3281  ;;  %v5907_v51 = vpop.permute.xlu1 %2973 }
 0x4cd   :  { %7198 = vst [vmem:[#allocation86_spill] sm:$0xff] %v5905_v39  ;;  %v5909_v1 = vpop.permute.xlu0 %2289  ;;  %v5914_v29 = vsel %vm1286_vm8, %v5907_v51, %v2982_v3 }
 0x4ce   :  { %7199 = vst [vmem:[#allocation87_spill] sm:$0xff] %v5907_v51 }
 0x4cf   :  { %7200 = vst [vmem:[#allocation88_spill] sm:$0xff] %v5909_v1 }
 0x4d0   :  { %7201 = vst [vmem:[#allocation89_spill] sm:$0xff] %v5914_v29 }
 0x4d2   :  { %3418 = vrot.lane.b32.xlu2 %v5636_v13, %s4161_s20  ;;  %3271 = vrot.lane.b32.xlu1 %v5488_v30, %s4160_s19 }
 0x4d3   :  { %3273 = vrot.lane.b32.xlu0 %v5535_v52, %s4160_s19 }
 0x4d4   :  { %v5922_v38 = vpop.permute.xlu2 %2269  ;;  %v5924_v39 = vpop.permute.xlu1 %2267 }
 0x4d5   :  { %v5926_v22 = vpop.permute.xlu0 %2586 }
 0x4d6   :  { %7202 = vst [vmem:[#allocation90_spill] sm:$0xff] %v5926_v22 }
 0x4da   :  { %2985 = vrot.lane.b32.xlu2 %v5861_v15, %s4158_s17  ;;  %3442 = vrot.lane.b32.xlu1 %v5770_v2, %s4161_s20 }
 0x4db   :  { %3434 = vrot.lane.b32.xlu0 %v5678_v12, %s4161_s20 }
 0x4dc   :  { %v5934_v3 = vpop.permute.xlu2 %2719  ;;  %v5936_v13 = vpop.permute.xlu1 %2332 }
 0x4dd   :  { %v5938_v29 = vpop.permute.xlu0 %3134 }
 0x4de   :  { %7203 = vst [vmem:[#allocation91_spill] sm:$0xff] %v5938_v29 }
 0x4e2   :  { %3269 = vrot.lane.b32.xlu2 %v5477_v40, %s4160_s19  ;;  %3138 = vrot.lane.b32.xlu1 %v5861_v15, %s4159_s18 }
 0x4e3   :  { %3416 = vrot.lane.b32.xlu0 %v5544_v47, %s4161_s20 }
 0x4e4   :  { %v5946_v22 = vpop.permute.xlu2 %3114  ;;  %v5948_v2 = vpop.permute.xlu1 %3265 }
 0x4e5   :  { %7204 = vst [vmem:[#allocation92_spill] sm:$0xff] %v5946_v22  ;;  %v5950_v51 = vpop.permute.xlu0 %2961 }
 0x4e6   :  { %7205 = vst [vmem:[#allocation93_spill] sm:$0xff] %v5948_v2 }
 0x4e7   :  { %7206 = vst [vmem:[#allocation94_spill] sm:$0xff] %v5950_v51 }
 0x4ea   :  { %3291 = vrot.lane.b32.xlu2 %v5861_v15, %s4160_s19  ;;  %3432 = vrot.lane.b32.xlu1 %v5597_v49, %s4161_s20 }
 0x4eb   :  { %3414 = vrot.lane.b32.xlu0 %v5509_v60, %s4161_s20 }
 0x4ec   :  { %v5958_v29 = vpop.permute.xlu2 %2983  ;;  %v5960_v1 = vpop.permute.xlu1 %2739 }
 0x4ed   :  { %7207 = vst [vmem:[#allocation95_spill] sm:$0xff] %v5958_v29  ;;  %v5966_v2 = vsel %vm1286_vm8, %v5958_v29, %v5873_v0  ;;  %v5968_v22 = vpop.permute.xlu0 %3267  ;;  %v7214_v0 = vld [vmem:[#allocation12_spill] sm:$0xff] }
 0x4ee   :  { %7208 = vst [vmem:[#allocation96_spill] sm:$0xff] %v5960_v1  ;;  %v2365_v1 = vsel %vm432_vm3, %v5631_v21, %v5758_v46 }
 0x4ef   :  { %7209 = vst [vmem:[#allocation97_spill] sm:$0xff] %v5966_v2 }
 0x4f0   :  { %7210 = vst [vmem:[#allocation98_spill] sm:$0xff] %v5968_v22 }
 0x4f2   :  { %3440 = vrot.lane.b32.xlu2 %v5663_v58, %s4161_s20  ;;  %3428 = vrot.lane.b32.xlu1 %v5567_v61, %s4161_s20 }
 0x4f3   :  { %3444 = vrot.lane.b32.xlu0 %v5861_v15, %s4161_s20 }
 0x4f4   :  { %v3137_v60 = vpop.permute.xlu2 %3136  ;;  %v5976_v47 = vpop.permute.xlu1 %3287 }
 0x4f5   :  { %7211 = vst [vmem:[#allocation99_spill] sm:$0xff] %v5976_v47  ;;  %v5981_v51 = vsel %vm1475_vm9, %v3137_v60, %v5885_v41  ;;  %v5983_v2 = vpop.permute.xlu0 %2356  ;;  %v2366_v41 = vsel %vm432_vm3, %v5701_v20, %v5854_v31 }
 0x4f6   :  { %7212 = vst [vmem:[#allocation100_spill] sm:$0xff] %v5981_v51  ;;  %v2386_v29 = vmul.f32 %v2366_v41, %v7214_v0 }
 0x4fa   :  { %3430 = vrot.lane.b32.xlu2 %v5518_v57, %s4161_s20  ;;  %3426 = vrot.lane.b32.xlu1 %v5535_v52, %s4161_s20  ;;  %v2301_v57 = vsel %vm401_vm2, %v5657_v48, %v5869_v33 }
 0x4fb   :  { %3438 = vrot.lane.b32.xlu0 %v5586_v44, %s4161_s20  ;;  %v3567_v44 = vld [vmem:[%s6935_s10] sm:$0xf] }
 0x4fc   :  { %v5991_v22 = vpop.permute.xlu2 %2350  ;;  %v5993_v58 = vpop.permute.xlu1 %2975 }
 0x4fd   :  { %7213 = vst [vmem:[#allocation101_spill] sm:$0xff] %v5993_v58  ;;  %v2367_v47 = vsel %vm432_vm3, %v5827_v37, %v5991_v22  ;;  %v5999_v51 = vpop.permute.xlu0 %2291  ;;  %v2364_v58 = vsel %vm432_vm3, %v5575_v45, %v5676_v19 }
 0x4fe   :  { %v2390_v15 = vmul.f32 %v2367_v47, %v7214_v0  ;;  %v2382_v47 = vmul.f32 %v2365_v1, %v7214_v0  ;;  %v2378_v41 = vmul.f32 %v2364_v58, %v7214_v0  ;;  %v6047_v58 = vld [vmem:[%s6934_s9 + $0x4] sm:$0xf] }
 0x500   :  { %2449 = vmatpush.msrb.mxu2 %v2390_v15 }
 0x502   :  { %3424 = vrot.lane.b32.xlu2 %v5488_v30, %s4161_s20  ;;  %3570 = vperm.xlu1 %4091, %v3567_v44   ;;  %v2300_v30 = vsel %vm401_vm2, %v5619_v17, %v5778_v24 }
 0x503   :  { %3422 = vrot.lane.b32.xlu0 %v5477_v40, %s4161_s20  ;;  %2450 = vmatpush.msrb.mxu2 %v2386_v29  ;;  %v7218_v40 = vld [vmem:[#allocation13_spill] sm:$0xff] }
 0x504   :  { %v6023_v52 = vpop.permute.xlu2 %2285  ;;  %v6025_v15 = vpop.permute.xlu1 %3128 }
 0x505   :  { %7215 = vst [vmem:[#allocation12_spill] sm:$0xff] %v6025_v15  ;;  %v2302_v44 = vsel %vm401_vm2, %v5763_v5, %v6023_v52  ;;  %v6036_v1 = vpop.permute.xlu0 %2588  ;;  %2451 = vmatpush.msrb.mxu2 %v2382_v47  ;;  %v6041_v29 = vsel %vm1475_vm9, %v6025_v15, %v3137_v60  ;;  %v2321_v47 = vmul.f32 %v2301_v57, %v7218_v40 }
 0x506   :  { %7216 = vst [vmem:[#allocation102_spill] sm:$0xff] %v6036_v1  ;;  %v2325_v0 = vmul.f32 %v2302_v44, %v7218_v40  ;;  %v2317_v60 = vmul.f32 %v2300_v30, %v7218_v40  ;;  %v2313_v44 = vmul.f32 %v5693_v63, %v7218_v40  ;;  %v2598_v57 = vsel %vm747_vm6, %v5718_v16, %v5881_v34 }
 0x507   :  { %7217 = vst [vmem:[#allocation103_spill] sm:$0xff] %v6041_v29  ;;  %2452 = vmatpush.msrb.mxu2 %v2378_v41  ;;  %v2370_v41 = vsel %vm432_vm3, %v5936_v13, %v5701_v20  ;;  %v6086_v20 = vld [vmem:[%s6934_s9] sm:$0xf] }
 0x508   :  { %4028 = vmatmul.msk.f32.vlgmr.msrb.gmra.mxu2 %vm2118_vm12, %v6047_v58 }
 0x509   :  { %2532 = vmatpush.msra.mxu2 %v2325_v0  ;;  %v7220_v0 = vld [vmem:[#allocation20_spill] sm:$0xff] }
 0x50b   :  { %2533 = vmatpush.msra.mxu2 %v2321_v47 }
 0x50c   :  { %v6059_v29 = vpop.permute.xlu2 %2582  ;;  %v6061_v15 = vpop.permute.xlu1 %2334 }
 0x50d   :  { %2534 = vmatpush.msra.mxu2 %v2317_v60  ;;  %v2599_v40 = vsel %vm747_vm6, %v5839_v28, %v6059_v29  ;;  %v6075_v30 = vpop.permute.xlu0 %2741  ;;  %v2371_v63 = vsel %vm432_vm3, %v6061_v15, %v5827_v37  ;;  %v7221_v60 = vld [vmem:[#allocation10_spill] sm:$0xff]  ;;  %v2597_v37 = vsel %vm747_vm6, %v5646_v25, %v5790_v10 }
 0x50e   :  { %7219 = vst [vmem:[#allocation13_spill] sm:$0xff] %v6075_v30  ;;  %v2622_v47 = vmul.f32 %v2599_v40, %v7220_v0  ;;  %v2389_v34 = vmul.f32 %v2371_v63, %v7221_v60  ;;  %v2369_v30 = vsel %vm432_vm3, %v5780_v27, %v5631_v21  ;;  %v2618_v40 = vmul.f32 %v2598_v57, %v7220_v0 }
 0x50f   :  { %2535 = vmatpush.msra.mxu2 %v2313_v44  ;;  %v2385_v63 = vmul.f32 %v2370_v41, %v7221_v60  ;;  %v2368_v44 = vsel %vm432_vm3, %v5659_v50, %v5575_v45  ;;  %v2596_v21 = vsel %vm747_vm6, %v5584_v32, %v5688_v59  ;;  %v2381_v10 = vmul.f32 %v2369_v30, %v7221_v60  ;;  %v7222_v59 = vld [vmem:[#allocation11_spill] sm:$0xff] }
 0x510   :  { %2429 = vmatpush.msrb.mxu1 %v2389_v34  ;;  %4032 = vmatmul.msk.f32.vlgmr.msra.gmra.mxu2 %vm2118_vm12, %v6086_v20  ;;  %v2614_v57 = vmul.f32 %v2597_v37, %v7220_v0  ;;  %v2306_v34 = vsel %vm401_vm2, %v5922_v38, %v5763_v5  ;;  %v2377_v45 = vmul.f32 %v2368_v44, %v7221_v60 }
 0x511   :  { %2681 = vmatpush.msrb.mxu2 %v2622_v47  ;;  %v2305_v41 = vsel %vm401_vm2, %v5924_v39, %v5657_v48  ;;  %v2610_v37 = vmul.f32 %v2596_v21, %v7220_v0  ;;  %v2324_v1 = vmul.f32 %v2306_v34, %v7222_v59  ;;  %v2304_v60 = vsel %vm401_vm2, %v5720_v55, %v5619_v17  ;;  %v6134_v48 = vld [vmem:[%s6934_s9 + $0x8] sm:$0xf] }
 0x512   :  { %2430 = vmatpush.msrb.mxu1 %v2385_v63  ;;  %v2303_v0 = vsel %vm401_vm2, %v5617_v9, %v5609_v6  ;;  %v2316_v17 = vmul.f32 %v2304_v60, %v7222_v59  ;;  %v2602_v6 = vsel %vm747_vm6, %v5825_v11, %v5718_v16  ;;  %v7223_v63 = vld [vmem:[#allocation19_spill] sm:$0xff]  ;;  %v2750_v60 = vsel %vm936_vm7, %v5595_v62, %v5829_v18 }
 0x513   :  { %2682 = vmatpush.msrb.mxu2 %v2618_v40 }
 0x514   :  { %v6119_v47 = vpop.permute.xlu2 %3285  ;;  %2431 = vmatpush.msrb.mxu1 %v2381_v10  ;;  %v6121_v30 = vpop.permute.xlu1 %2566  ;;  %v2320_v10 = vmul.f32 %v2305_v41, %v7222_v59  ;;  %v7224_v41 = vld [vmem:[#allocation22_spill] sm:$0xff] }
 0x515   :  { %2683 = vmatpush.msrb.mxu2 %v2614_v57  ;;  %v6125_v5 = vpop.permute.xlu0 %3289  ;;  %v2603_v40 = vsel %vm747_vm6, %v6121_v30, %v5839_v28  ;;  %v2601_v28 = vsel %vm747_vm6, %v5733_v36, %v5646_v25  ;;  %v2600_v25 = vsel %vm747_vm6, %v5674_v26, %v5584_v32  ;;  %v2749_v32 = vsel %vm936_vm7, %v5621_v14, %v5760_v4 }
 0x516   :  { %2432 = vmatpush.msrb.mxu1 %v2377_v45  ;;  %v2621_v44 = vmul.f32 %v2603_v40, %v7223_v63  ;;  %v2617_v45 = vmul.f32 %v2602_v6, %v7223_v63  ;;  %v2609_v40 = vmul.f32 %v2600_v25, %v7223_v63  ;;  %v2755_v6 = vsel %vm936_vm7, %v5859_v7, %v5730_v53 }
 0x517   :  { %2684 = vmatpush.msrb.mxu2 %v2610_v37  ;;  %4027 = vmatmul.msk.f32.vlgmr.msrb.gmra.mxu1 %vm2118_vm12, %v6047_v58 }
 0x518   :  { %2512 = vmatpush.msra.mxu1 %v2324_v1  ;;  %4037 = vmatmul.msk.f32.vlgmr.msrb.gmra.mxu2 %vm2118_vm12, %v6134_v48  ;;  %v2312_v1 = vmul.f32 %v2303_v0, %v7222_v59  ;;  %v2751_v59 = vsel %vm936_vm7, %v5730_v53, %v5893_v42  ;;  %v6212_v53 = vld [vmem:[%s6934_s9 + $0xc] sm:$0xf] }
 0x519   :  { %v2771_v0 = vmul.f32 %v2751_v59, %v7224_v41 }
 0x51a   :  { %2513 = vmatpush.msra.mxu1 %v2320_v10  ;;  %v2613_v10 = vmul.f32 %v2601_v28, %v7223_v63  ;;  %v2763_v28 = vmul.f32 %v2749_v32, %v7224_v41 }
 0x51c   :  { %2514 = vmatpush.msra.mxu1 %v2316_v17  ;;  %v6156_v21 = vpop.permute.xlu2 %3436  ;;  %v6158_v57 = vpop.permute.xlu1 %2735  ;;  %v2756_v17 = vsel %vm936_vm7, %v5934_v3, %v5782_v8 }
 0x51d   :  { %v6168_v34 = vpop.permute.xlu0 %3130  ;;  %v2752_v16 = vsel %vm936_vm7, %v5782_v8, %v6158_v57  ;;  %v7225_v8 = vld [vmem:[#allocation23_spill] sm:$0xff] }
 0x51e   :  { %2515 = vmatpush.msra.mxu1 %v2312_v1  ;;  %v2775_v37 = vmul.f32 %v2752_v16, %v7224_v41  ;;  %v2767_v1 = vmul.f32 %v2750_v60, %v7224_v41  ;;  %v2770_v63 = vmul.f32 %v2755_v6, %v7225_v8  ;;  %v2374_v41 = vsel %vm432_vm3, %v5983_v2, %v5936_v13 }
 0x51f   :  { %4031 = vmatmul.msk.f32.vlgmr.msra.gmra.mxu1 %vm2118_vm12, %v6086_v20  ;;  %v2362_v60 = vsel %vm432_vm3, %v5854_v31, %v5983_v2  ;;  %v2753_v13 = vsel %vm936_vm7, %v5629_v54, %v5621_v14  ;;  %v2361_v2 = vsel %vm432_vm3, %v5758_v46, %v5897_v23  ;;  %v7228_v14 = vld [vmem:[#allocation80_spill] sm:$0xff] }
 0x520   :  { %2661 = vmatpush.msrb.mxu1 %v2621_v44  ;;  %2834 = vmatpush.msra.mxu2 %v2775_v37  ;;  %v2774_v44 = vmul.f32 %v2756_v17, %v7225_v8  ;;  %v2372_v54 = vsel %vm432_vm3, %v7228_v14, %v5659_v50 }
 0x522   :  { %2662 = vmatpush.msrb.mxu1 %v2617_v45  ;;  %2835 = vmatpush.msra.mxu2 %v2771_v0  ;;  %v2754_v45 = vsel %vm936_vm7, %v5792_v56, %v5595_v62  ;;  %v7226_v62 = vld [vmem:[#allocation14_spill] sm:$0xff]  ;;  %v7227_v0 = vld [vmem:[#allocation15_spill] sm:$0xff] }
 0x523   :  { %v2766_v31 = vmul.f32 %v2754_v45, %v7225_v8  ;;  %v2383_v50 = vmul.f32 %v2361_v2, %v7227_v0  ;;  %v7231_v45 = vld [vmem:[#allocation49_spill] sm:$0xff] }
 0x524   :  { %2663 = vmatpush.msrb.mxu1 %v2613_v10  ;;  %v6204_v59 = vpop.permute.xlu2 %2743  ;;  %2836 = vmatpush.msra.mxu2 %v2767_v1  ;;  %v6206_v4 = vpop.permute.xlu1 %2977  ;;  %v7242_v2 = vld [vmem:[#allocation45_spill] sm:$0xff] }
 0x525   :  { %v2359_v16 = vpop.permute.xlu0 %2358 }
 0x526   :  { %2664 = vmatpush.msrb.mxu1 %v2609_v40  ;;  %v2363_v37 = vsel %vm432_vm3, %v5991_v22, %v2359_v16  ;;  %v2375_v25 = vsel %vm432_vm3, %v2359_v16, %v6061_v15  ;;  %2837 = vmatpush.msra.mxu2 %v2763_v28  ;;  %v2373_v22 = vsel %vm432_vm3, %v5897_v23, %v5780_v27 }
 0x527   :  { %v2388_v10 = vmul.f32 %v2375_v25, %v7226_v62  ;;  %v2391_v17 = vmul.f32 %v2363_v37, %v7227_v0  ;;  %4042 = vmatmul.msk.f32.vlgmr.msra.gmra.mxu2 %vm2118_vm12, %v6212_v53  ;;  %v2387_v27 = vmul.f32 %v2362_v60, %v7227_v0  ;;  %4036 = vmatmul.msk.f32.vlgmr.msrb.gmra.mxu1 %vm2118_vm12, %v6134_v48  ;;  %v7235_v60 = vld [vmem:[#allocation64_spill] sm:$0xff] }
 0x528   :  { %2814 = vmatpush.msra.mxu1 %v2774_v44  ;;  %2923 = vmatpush.msrb.mxu2 %v5831_v35  ;;  %v2384_v35 = vmul.f32 %v2374_v41, %v7226_v62  ;;  %v2762_v15 = vmul.f32 %v2753_v13, %v7225_v8  ;;  %v2360_v23 = vsel %vm432_vm3, %v5676_v19, %v7228_v14  ;;  %v7229_v44 = vld [vmem:[#allocation16_spill] sm:$0xff]  ;;  %v7239_v13 = vld [vmem:[#allocation34_spill] sm:$0xff] }
 0x529   :  { %2409 = vmatpush.msrb.mxu0 %v2388_v10  ;;  %2469 = vmatpush.msrb.mxu3 %v2391_v17  ;;  %v2380_v46 = vmul.f32 %v2373_v22, %v7226_v62  ;;  %v2379_v19 = vmul.f32 %v2360_v23, %v7227_v0  ;;  %v2309_v8 = vsel %vm401_vm2, %v5999_v51, %v5924_v39  ;;  %v7233_v39 = vld [vmem:[#allocation78_spill] sm:$0xff]  ;;  %v7237_v0 = vld [vmem:[#allocation101_spill] sm:$0xff] }
 0x52a   :  { %2815 = vmatpush.msra.mxu1 %v2770_v63  ;;  %2924 = vmatpush.msrb.mxu2 %v5678_v12  ;;  %v2376_v12 = vmul.f32 %v2372_v54, %v7226_v62  ;;  %v7230_v63 = vld [vmem:[#allocation17_spill] sm:$0xff]  ;;  %v2994_v41 = vsel %vm1286_vm8, %v7233_v39, %v6206_v4  ;;  %v2319_v25 = vmul.f32 %v2309_v8, %v7229_v44  ;;  %v7236_v62 = vld [vmem:[#allocation50_spill] sm:$0xff] }
 0x52b   :  { %2410 = vmatpush.msrb.mxu0 %v2384_v35  ;;  %2470 = vmatpush.msrb.mxu3 %v2387_v27  ;;  %v6318_v10 = vsel %vm1475_vm9, %v7236_v62, %v7235_v60  ;;  %v7238_v17 = vld [vmem:[#allocation65_spill] sm:$0xff]  ;;  %v7243_v14 = vld [vmem:[#allocation26_spill] sm:$0xff] }
 0x52c   :  { %2816 = vmatpush.msra.mxu1 %v2766_v31  ;;  %2925 = vmatpush.msrb.mxu2 %v5597_v49  ;;  %v6267_v32 = vpop.permute.xlu2 %3418  ;;  %v6269_v40 = vpop.permute.xlu1 %3283  ;;  %v7241_v31 = vld [vmem:[#allocation87_spill] sm:$0xff]  ;;  %v3016_v54 = vmul.f32 %v2994_v41, %v7243_v14 }
 0x52d   :  { %v2294_v1 = vpop.permute.xlu0 %2293  ;;  %2411 = vmatpush.msrb.mxu0 %v2380_v46  ;;  %2471 = vmatpush.msrb.mxu3 %v2383_v50  ;;  %v2992_v35 = vsel %vm1286_vm8, %v7242_v2, %v7241_v31  ;;  %v7256_v31 = vld [vmem:[#allocation63_spill] sm:$0xff] }
 0x52e   :  { %2817 = vmatpush.msra.mxu1 %v2762_v15  ;;  %v2298_v6 = vsel %vm401_vm2, %v6023_v52, %v2294_v1  ;;  %v2310_v49 = vsel %vm401_vm2, %v2294_v1, %v5922_v38  ;;  %2926 = vmatpush.msrb.mxu2 %v7231_v45  ;;  %v2297_v52 = vsel %vm401_vm2, %v5869_v33, %v5999_v51  ;;  %v7232_v38 = vld [vmem:[#allocation48_spill] sm:$0xff] }
 0x52f   :  { %v2323_v28 = vmul.f32 %v2310_v49, %v7229_v44  ;;  %v2326_v16 = vmul.f32 %v2298_v6, %v7230_v63  ;;  %2412 = vmatpush.msrb.mxu0 %v2376_v12  ;;  %2472 = vmatpush.msrb.mxu3 %v2379_v19  ;;  %v7234_v51 = vld [vmem:[#allocation88_spill] sm:$0xff]  ;;  %v7245_v19 = vld [vmem:[#allocation27_spill] sm:$0xff] }
 0x530   :  { %2903 = vmatpush.msrb.mxu1 %v5567_v61  ;;  %v6295_v61 = vld [vmem:[%s6934_s9 + $0x10] sm:$0xf]  ;;  %4026 = vmatmul.msk.f32.vlgmr.msrb.gmra.mxu0 %vm2118_vm12, %v6047_v58  ;;  %v2296_v33 = vsel %vm401_vm2, %v5778_v24, %v7234_v51  ;;  %v2308_v37 = vsel %vm401_vm2, %v7234_v51, %v5720_v55  ;;  %v2993_v24 = vsel %vm1286_vm8, %v7238_v17, %v7237_v0 }
 0x531   :  { %4029 = vmatmul.msk.f32.vlgmr.msrb.gmra.mxu3 %vm2118_vm12, %v6047_v58  ;;  %2492 = vmatpush.msra.mxu0 %v2323_v28  ;;  %v2322_v58 = vmul.f32 %v2297_v52, %v7230_v63  ;;  %v7240_v55 = vld [vmem:[#allocation70_spill] sm:$0xff]  ;;  %v2315_v23 = vmul.f32 %v2308_v37, %v7229_v44  ;;  %v2318_v46 = vmul.f32 %v2296_v33, %v7230_v63  ;;  %v7250_v33 = vld [vmem:[#allocation21_spill] sm:$0xff] }
 0x532   :  { %2904 = vmatpush.msrb.mxu1 %v7232_v38  ;;  %2552 = vmatpush.msra.mxu3 %v2326_v16  ;;  %v2307_v22 = vsel %vm401_vm2, %v7240_v55, %v5617_v9  ;;  %v7244_v9 = vld [vmem:[#allocation42_spill] sm:$0xff]  ;;  %v3012_v1 = vmul.f32 %v2993_v24, %v7243_v14  ;;  %v7246_v16 = vld [vmem:[#allocation71_spill] sm:$0xff]  ;;  %v7253_v24 = vld [vmem:[#allocation72_spill] sm:$0xff] }
 0x533   :  { %4047 = vmatmul.msk.f32.vlgmr.msrb.gmra.mxu2 %vm2118_vm12, %v6295_v61  ;;  %4041 = vmatmul.msk.f32.vlgmr.msra.gmra.mxu1 %vm2118_vm12, %v6212_v53  ;;  %v2311_v28 = vmul.f32 %v2307_v22, %v7229_v44  ;;  %v2314_v45 = vmul.f32 %v7246_v16, %v7230_v63  ;;  %v7248_v38 = vld [vmem:[#allocation47_spill] sm:$0xff]  ;;  %v7249_v51 = vld [vmem:[#allocation102_spill] sm:$0xff] }
 0x534   :  { %2905 = vmatpush.msrb.mxu1 %v7239_v13  ;;  %2493 = vmatpush.msra.mxu0 %v2319_v25  ;;  %v6339_v27 = vpop.permute.xlu2 %2985  ;;  %v6341_v15 = vpop.permute.xlu1 %3277  ;;  %v3004_v41 = vmul.f32 %v7248_v38, %v7243_v14  ;;  %v7251_v44 = vld [vmem:[#allocation95_spill] sm:$0xff]  ;;  %v7252_v25 = vld [vmem:[#allocation82_spill] sm:$0xff]  ;;  %v7264_v38 = vld [vmem:[#allocation89_spill] sm:$0xff] }
 0x535   :  { %2553 = vmatpush.msra.mxu3 %v2322_v58  ;;  %v2990_v50 = vsel %vm1286_vm8, %v6206_v4, %v6339_v27  ;;  %v2591_v12 = vpop.permute.xlu0 %2590  ;;  %v7247_v4 = vld [vmem:[#allocation18_spill] sm:$0xff]  ;;  %v2989_v63 = vsel %vm1286_vm8, %v7237_v0, %v7251_v44  ;;  %v2594_v58 = vsel %vm747_vm6, %v7252_v25, %v7249_v51  ;;  %v3147_v0 = vsel %vm1475_vm9, %v7256_v31, %v6168_v34 }
 0x536   :  { %2906 = vmatpush.msrb.mxu1 %v7244_v9  ;;  %v3017_v6 = vmul.f32 %v2990_v50, %v7245_v19  ;;  %v2595_v49 = vsel %vm747_vm6, %v6059_v29, %v2591_v12  ;;  %v2607_v8 = vsel %vm747_vm6, %v2591_v12, %v6121_v30  ;;  %2494 = vmatpush.msra.mxu0 %v2315_v23  ;;  %v7255_v55 = vld [vmem:[#allocation90_spill] sm:$0xff]  ;;  %v7259_v50 = vld [vmem:[#allocation12_spill] sm:$0xff] }
 0x537   :  { %v2620_v52 = vmul.f32 %v2607_v8, %v7247_v4  ;;  %2554 = vmatpush.msra.mxu3 %v2318_v46  ;;  %v2606_v29 = vsel %vm747_vm6, %v7249_v51, %v5825_v11  ;;  %v2623_v37 = vmul.f32 %v2595_v49, %v7250_v33  ;;  %v3008_v30 = vmul.f32 %v2992_v35, %v7243_v14  ;;  %v7254_v11 = vld [vmem:[#allocation56_spill] sm:$0xff]  ;;  %v7257_v35 = vld [vmem:[#allocation83_spill] sm:$0xff]  ;;  %v7262_v8 = vld [vmem:[#allocation30_spill] sm:$0xff] }
 0x538   :  { %3056 = vmatpush.msra.mxu1 %v3016_v54  ;;  %3076 = vmatpush.msra.mxu2 %v3017_v6  ;;  %v3145_v13 = vsel %vm1475_vm9, %v7254_v11, %v7253_v24  ;;  %v2605_v22 = vsel %vm747_vm6, %v7255_v55, %v5733_v36  ;;  %v2604_v14 = vsel %vm747_vm6, %v7257_v35, %v5674_v26  ;;  %v7258_v54 = vld [vmem:[#allocation69_spill] sm:$0xff] }
 0x539   :  { %2495 = vmatpush.msra.mxu0 %v2311_v28  ;;  %2555 = vmatpush.msra.mxu3 %v2314_v45  ;;  %v2593_v36 = vsel %vm747_vm6, %v7258_v54, %v7255_v55  ;;  %v2616_v23 = vmul.f32 %v2606_v29, %v7247_v4  ;;  %v3013_v46 = vmul.f32 %v2989_v63, %v7245_v19  ;;  %v7263_v45 = vld [vmem:[#allocation75_spill] sm:$0xff] }
 0x53a   :  { %3057 = vmatpush.msra.mxu1 %v3012_v1  ;;  %4030 = vmatmul.msk.f32.vlgmr.msra.gmra.mxu0 %vm2118_vm12, %v6086_v20  ;;  %v2619_v9 = vmul.f32 %v2594_v58, %v7250_v33  ;;  %v7261_v1 = vld [vmem:[#allocation57_spill] sm:$0xff]  ;;  %v2612_v49 = vmul.f32 %v2605_v22, %v7247_v4  ;;  %v3169_v28 = vmul.f32 %v3147_v0, %v7262_v8  ;;  %v7266_v58 = vld [vmem:[#allocation24_spill] sm:$0xff] }
 0x53b   :  { %4033 = vmatmul.msk.f32.vlgmr.msra.gmra.mxu3 %vm2118_vm12, %v6086_v20  ;;  %2641 = vmatpush.msrb.mxu0 %v2620_v52  ;;  %v7260_v20 = vld [vmem:[#allocation62_spill] sm:$0xff]  ;;  %v2592_v6 = vsel %vm747_vm6, %v7261_v1, %v7257_v35  ;;  %v3005_v52 = vmul.f32 %v7263_v45, %v7245_v19  ;;  %v3009_v51 = vmul.f32 %v7264_v38, %v7245_v19  ;;  %v7268_v22 = vld [vmem:[#allocation25_spill] sm:$0xff]  ;;  %v7269_v35 = vld [vmem:[#allocation35_spill] sm:$0xff] }
 0x53c   :  { %3058 = vmatpush.msra.mxu1 %v3008_v30  ;;  %v3146_v12 = vsel %vm1475_vm9, %v7260_v20, %v7259_v50  ;;  %2701 = vmatpush.msrb.mxu3 %v2623_v37  ;;  %v6411_v26 = vpop.permute.xlu1 %3420  ;;  %v2615_v29 = vmul.f32 %v2593_v36, %v7250_v33  ;;  %v2608_v37 = vmul.f32 %v2604_v14, %v7247_v4  ;;  %v7274_v38 = vld [vmem:[#allocation59_spill] sm:$0xff] }
 0x53d   :  { %4046 = vmatmul.msk.f32.vlgmr.msrb.gmra.mxu1 %vm2118_vm12, %v6295_v61  ;;  %2642 = vmatpush.msrb.mxu0 %v2616_v23  ;;  %v6419_v16 = vpop.permute.xlu0 %3275  ;;  %v3165_v30 = vmul.f32 %v3146_v12, %v7262_v8  ;;  %v2611_v44 = vmul.f32 %v2592_v6, %v7250_v33  ;;  %v2748_v19 = vsel %vm936_vm7, %v6158_v57, %v6204_v59  ;;  %v6446_v33 = vpop.permute.xlu2 %3269  ;;  %v7271_v12 = vld [vmem:[#allocation9_spill] sm:$0xff]  ;;  %v7272_v6 = vld [vmem:[#allocation67_spill] sm:$0xff] }
 0x53e   :  { %3059 = vmatpush.msra.mxu1 %v3004_v41  ;;  %2702 = vmatpush.msrb.mxu3 %v2619_v9  ;;  %v2760_v41 = vsel %vm936_vm7, %v6204_v59, %v5934_v3  ;;  %v3300_v4 = vsel %vm1664_vm10, %v6419_v16, %v6269_v40  ;;  %v3161_v63 = vmul.f32 %v3145_v13, %v7262_v8  ;;  %v7265_v3 = vld [vmem:[#allocation13_spill] sm:$0xff]  ;;  %v7267_v13 = vld [vmem:[#allocation96_spill] sm:$0xff] }
 0x53f   :  { %3077 = vmatpush.msra.mxu2 %v3013_v46  ;;  %2643 = vmatpush.msrb.mxu0 %v2612_v49  ;;  %v2759_v25 = vsel %vm936_vm7, %v7265_v3, %v5859_v7  ;;  %v3157_v57 = vmul.f32 %v6318_v10, %v7262_v8  ;;  %v2747_v59 = vsel %vm936_vm7, %v5893_v42, %v7265_v3  ;;  %v6466_v42 = vld [vmem:[%s6934_s9 + $0x14] sm:$0xf]  ;;  %v7273_v8 = vld [vmem:[#allocation77_spill] sm:$0xff] }
 0x540   :  { %3209 = vmatpush.msrb.mxu1 %v3169_v28  ;;  %2703 = vmatpush.msrb.mxu3 %v2615_v29  ;;  %v2773_v55 = vmul.f32 %v2760_v41, %v7266_v58  ;;  %v2758_v7 = vsel %vm936_vm7, %v7267_v13, %v5792_v56  ;;  %v2776_v0 = vmul.f32 %v2748_v19, %v7268_v22  ;;  %v7275_v29 = vld [vmem:[#allocation79_spill] sm:$0xff]  ;;  %v7276_v41 = vld [vmem:[#allocation94_spill] sm:$0xff]  ;;  %v7277_v19 = vld [vmem:[#allocation60_spill] sm:$0xff] }
 0x541   :  { %3078 = vmatpush.msra.mxu2 %v3009_v51  ;;  %2644 = vmatpush.msrb.mxu0 %v2608_v37  ;;  %v3322_v14 = vmul.f32 %v3300_v4, %v7269_v35  ;;  %v2746_v10 = vsel %vm936_vm7, %v5829_v18, %v7267_v13  ;;  %v2769_v56 = vmul.f32 %v2759_v25, %v7266_v58  ;;  %v7270_v18 = vld [vmem:[#allocation86_spill] sm:$0xff]  ;;  %v7278_v25 = vld [vmem:[#allocation68_spill] sm:$0xff] }
 0x542   :  { %3210 = vmatpush.msrb.mxu1 %v3165_v30  ;;  %2704 = vmatpush.msrb.mxu3 %v2611_v44  ;;  %v2772_v36 = vmul.f32 %v2747_v59, %v7268_v22  ;;  %v2765_v46 = vmul.f32 %v2758_v7, %v7266_v58  ;;  %v2768_v9 = vmul.f32 %v2746_v10, %v7268_v22  ;;  %v6515_v30 = vld [vmem:[%s6934_s9 + $0x18] sm:$0xf]  ;;  %v7281_v59 = vld [vmem:[#allocation28_spill] sm:$0xff]  ;;  %v7284_v7 = vld [vmem:[#allocation29_spill] sm:$0xff] }
 0x543   :  { %3079 = vmatpush.msra.mxu2 %v3005_v52  ;;  %4035 = vmatmul.msk.f32.vlgmr.msrb.gmra.mxu0 %vm2118_vm12, %v6134_v48  ;;  %v2761_v1 = vmul.f32 %v7271_v12, %v7266_v58  ;;  %v2764_v49 = vmul.f32 %v7272_v6, %v7268_v22  ;;  %v3297_v45 = vsel %vm1664_vm10, %v6446_v33, %v6341_v15  ;;  %v7288_v10 = vld [vmem:[#allocation61_spill] sm:$0xff]  ;;  %v6565_v12 = vld [vmem:[%s6934_s9 + $0x1c] sm:$0xf] }
 0x544   :  { %3211 = vmatpush.msrb.mxu1 %v3161_v63  ;;  %4038 = vmatmul.msk.f32.vlgmr.msrb.gmra.mxu3 %vm2118_vm12, %v6134_v48  ;;  %v6475_v54 = vpop.permute.xlu1 %3271  ;;  %v2998_v44 = vsel %vm1286_vm8, %v7276_v41, %v7233_v39  ;;  %v3002_v63 = vsel %vm1286_vm8, %v6339_v27, %v7276_v41  ;;  %v3310_v3 = vmul.f32 %v3297_v45, %v7269_v35  ;;  %v7283_v27 = vld [vmem:[#allocation66_spill] sm:$0xff] }
 0x545   :  { %2794 = vmatpush.msra.mxu0 %v2773_v55  ;;  %2854 = vmatpush.msra.mxu3 %v2776_v0  ;;  %v6478_v23 = vpop.permute.xlu0 %3273  ;;  %v3298_v28 = vsel %vm1664_vm10, %v6475_v54, %v7273_v8  ;;  %v6503_v52 = vpop.permute.xlu2 %3291  ;;  %v3015_v58 = vmul.f32 %v2998_v44, %v7281_v59  ;;  %v7282_v55 = vld [vmem:[#allocation58_spill] sm:$0xff]  ;;  %v2996_v13 = vsel %vm1286_vm8, %v7283_v27, %v7242_v2  ;;  %v7285_v0 = vld [vmem:[#allocation39_spill] sm:$0xff] }
 0x546   :  { %3212 = vmatpush.msrb.mxu1 %v3157_v57  ;;  %v3299_v48 = vsel %vm1664_vm10, %v6478_v23, %v7270_v18  ;;  %4052 = vmatmul.msk.f32.vlgmr.msra.gmra.mxu2 %vm2118_vm12, %v6466_v42  ;;  %v3314_v51 = vmul.f32 %v3298_v28, %v7269_v35  ;;  %v7279_v57 = vld [vmem:[#allocation54_spill] sm:$0xff]  ;;  %v3018_v22 = vmul.f32 %v3002_v63, %v7284_v7  ;;  %v7295_v63 = vld [vmem:[#allocation33_spill] sm:$0xff] }
 0x547   :  { %2795 = vmatpush.msra.mxu0 %v2769_v56  ;;  %4051 = vmatmul.msk.f32.vlgmr.msra.gmra.mxu1 %vm2118_vm12, %v6466_v42  ;;  %v3318_v50 = vmul.f32 %v3299_v48, %v7269_v35  ;;  %v7286_v35 = vld [vmem:[#allocation46_spill] sm:$0xff]  ;;  %v7290_v48 = vld [vmem:[#allocation97_spill] sm:$0xff] }
 0x548   :  { %2855 = vmatpush.msra.mxu3 %v2772_v36  ;;  %3362 = vmatpush.msra.mxu1 %v3322_v14  ;;  %v3007_v36 = vmul.f32 %v2996_v13, %v7281_v59  ;;  %v7300_v13 = vld [vmem:[#allocation91_spill] sm:$0xff] }
 0x549   :  { %2796 = vmatpush.msra.mxu0 %v2765_v46  ;;  %v7289_v46 = vld [vmem:[#allocation74_spill] sm:$0xff] }
 0x54a   :  { %2856 = vmatpush.msra.mxu3 %v2768_v9  ;;  %3363 = vmatpush.msra.mxu1 %v3318_v50  ;;  %v2999_v2 = vsel %vm1286_vm8, %v7289_v46, %v7288_v10  ;;  %v3014_v9 = vmul.f32 %v7290_v48, %v7284_v7  ;;  %v7304_v48 = vld [vmem:[#allocation93_spill] sm:$0xff] }
 0x54b   :  { %2797 = vmatpush.msra.mxu0 %v2761_v1  ;;  %v7291_v1 = vld [vmem:[#allocation92_spill] sm:$0xff] }
 0x54c   :  { %2857 = vmatpush.msra.mxu3 %v2764_v49  ;;  %4040 = vmatmul.msk.f32.vlgmr.msra.gmra.mxu0 %vm2118_vm12, %v6212_v53  ;;  %v6510_v37 = vpop.permute.xlu1 %3442  ;;  %v3151_v6 = vsel %vm1475_vm9, %v7291_v1, %v7256_v31  ;;  %v7293_v31 = vld [vmem:[#allocation31_spill] sm:$0xff] }
 0x54d   :  { %2883 = vmatpush.msrb.mxu0 %v7274_v38  ;;  %4043 = vmatmul.msk.f32.vlgmr.msra.gmra.mxu3 %vm2118_vm12, %v6212_v53  ;;  %v6524_v4 = vpop.permute.xlu0 %3434  ;;  %v7280_v53 = vld [vmem:[#allocation81_spill] sm:$0xff]  ;;  %v6571_v49 = vpop.permute.xlu2 %3440 }
 0x54e   :  { %2943 = vmatpush.msrb.mxu3 %v7275_v29  ;;  %3364 = vmatpush.msra.mxu1 %v3314_v51  ;;  %v2997_v39 = vsel %vm1286_vm8, %v7280_v53, %v7238_v17  ;;  %v7287_v17 = vld [vmem:[#allocation55_spill] sm:$0xff]  ;;  %v7292_v51 = vld [vmem:[#allocation76_spill] sm:$0xff] }
 0x54f   :  { %2884 = vmatpush.msrb.mxu0 %v7277_v19  ;;  %4056 = vmatmul.msk.f32.vlgmr.msrb.gmra.mxu1 %vm2118_vm12, %v6515_v30  ;;  %v3011_v14 = vmul.f32 %v2997_v39, %v7281_v59  ;;  %v2995_v56 = vsel %vm1286_vm8, %v7288_v10, %v7287_v17  ;;  %v3010_v29 = vmul.f32 %v7292_v51, %v7284_v7  ;;  %v7297_v53 = vld [vmem:[#allocation32_spill] sm:$0xff]  ;;  %v7303_v17 = vld [vmem:[#allocation98_spill] sm:$0xff] }
 0x550   :  { %2944 = vmatpush.msrb.mxu3 %v7278_v25  ;;  %3365 = vmatpush.msra.mxu1 %v3310_v3  ;;  %v3003_v44 = vmul.f32 %v2995_v56, %v7281_v59  ;;  %v3006_v3 = vmul.f32 %v2999_v2, %v7284_v7  ;;  %v7296_v25 = vld [vmem:[#allocation73_spill] sm:$0xff]  ;;  %v3168_v39 = vmul.f32 %v3151_v6, %v7297_v53  ;;  %v7298_v59 = vld [vmem:[#allocation103_spill] sm:$0xff] }
 0x551   :  { %2885 = vmatpush.msrb.mxu0 %v7279_v57  ;;  %v3149_v57 = vsel %vm1475_vm9, %v7296_v25, %v7254_v11  ;;  %v3141_v11 = vsel %vm1475_vm9, %v7253_v24, %v7300_v13  ;;  %v3304_v10 = vsel %vm1664_vm10, %v7303_v17, %v6419_v16  ;;  %v3296_v16 = vsel %vm1664_vm10, %v6269_v40, %v6503_v52  ;;  %v7306_v40 = vld [vmem:[#allocation99_spill] sm:$0xff] }
 0x552   :  { %2945 = vmatpush.msrb.mxu3 %v7282_v55  ;;  %v3160_v7 = vmul.f32 %v3149_v57, %v7297_v53  ;;  %v3295_v51 = vsel %vm1664_vm10, %v7270_v18, %v6125_v5  ;;  %v7309_v18 = vld [vmem:[#allocation51_spill] sm:$0xff] }
 0x553   :  { %2886 = vmatpush.msrb.mxu0 %v7285_v0  ;;  %v7301_v0 = vld [vmem:[#allocation85_spill] sm:$0xff] }
 0x554   :  { %2946 = vmatpush.msrb.mxu3 %v7286_v35  ;;  %4045 = vmatmul.msk.f32.vlgmr.msrb.gmra.mxu0 %vm2118_vm12, %v6295_v61  ;;  %v3139_v50 = vpop.permute.xlu1 %3138  ;;  %v7302_v35 = vld [vmem:[#allocation100_spill] sm:$0xff] }
 0x555   :  { %3036 = vmatpush.msra.mxu0 %v3015_v58  ;;  %4048 = vmatmul.msk.f32.vlgmr.msrb.gmra.mxu3 %vm2118_vm12, %v6295_v61  ;;  %v6575_v28 = vpop.permute.xlu0 %3416  ;;  %v3143_v45 = vsel %vm1475_vm9, %v6168_v34, %v3139_v50  ;;  %v3155_v38 = vsel %vm1475_vm9, %v3139_v50, %v7291_v1  ;;  %v7294_v61 = vld [vmem:[#allocation84_spill] sm:$0xff]  ;;  %v7305_v1 = vld [vmem:[#allocation37_spill] sm:$0xff] }
 0x556   :  { %3096 = vmatpush.msra.mxu3 %v3018_v22  ;;  %v3170_v41 = vmul.f32 %v3143_v45, %v7293_v31  ;;  %v3150_v19 = vsel %vm1475_vm9, %v7294_v61, %v7260_v20  ;;  %v3171_v34 = vmul.f32 %v3155_v38, %v7295_v63  ;;  %v3166_v20 = vmul.f32 %v7298_v59, %v7293_v31  ;;  %v7299_v58 = vld [vmem:[#allocation52_spill] sm:$0xff]  ;;  %v6656_v38 = vpop.permute.xlu2 %3430 }
 0x557   :  { %3037 = vmatpush.msra.mxu0 %v3011_v14  ;;  %4061 = vmatmul.msk.f32.vlgmr.msra.gmra.mxu1 %vm2118_vm12, %v6565_v12  ;;  %v3148_v55 = vsel %vm1475_vm9, %v7299_v58, %v7236_v62  ;;  %v3164_v27 = vmul.f32 %v3150_v19, %v7297_v53  ;;  %v3153_v22 = vsel %vm1475_vm9, %v7300_v13, %v7296_v25  ;;  %v7310_v19 = vld [vmem:[#allocation38_spill] sm:$0xff] }
 0x558   :  { %3097 = vmatpush.msra.mxu3 %v3014_v9  ;;  %3229 = vmatpush.msrb.mxu2 %v3170_v41  ;;  %v3140_v62 = vsel %vm1475_vm9, %v7235_v60, %v7301_v0  ;;  %v3152_v24 = vsel %vm1475_vm9, %v7301_v0, %v7299_v58  ;;  %v3167_v14 = vmul.f32 %v7302_v35, %v7295_v63 }
 0x559   :  { %3038 = vmatpush.msra.mxu0 %v3007_v36  ;;  %v3156_v36 = vmul.f32 %v3148_v55, %v7297_v53  ;;  %v3162_v60 = vmul.f32 %v3141_v11, %v7293_v31  ;;  %v3163_v2 = vmul.f32 %v3153_v22, %v7295_v63  ;;  %v3303_v9 = vsel %vm1664_vm10, %v7304_v48, %v6478_v23  ;;  %v7312_v11 = vld [vmem:[#allocation40_spill] sm:$0xff] }
 0x55a   :  { %3098 = vmatpush.msra.mxu3 %v3010_v29  ;;  %3230 = vmatpush.msrb.mxu2 %v3166_v20  ;;  %v3158_v50 = vmul.f32 %v3140_v62, %v7293_v31  ;;  %v3321_v6 = vmul.f32 %v3304_v10, %v7305_v1  ;;  %v3308_v45 = vsel %vm1664_vm10, %v6503_v52, %v7303_v17  ;;  %v7307_v52 = vld [vmem:[#allocation36_spill] sm:$0xff] }
 0x55b   :  { %3039 = vmatpush.msra.mxu0 %v3003_v44  ;;  %v3294_v23 = vsel %vm1664_vm10, %v7273_v8, %v7306_v40  ;;  %v3307_v29 = vsel %vm1664_vm10, %v6125_v5, %v7304_v48  ;;  %v3323_v31 = vmul.f32 %v3296_v16, %v7307_v52  ;;  %v3317_v41 = vmul.f32 %v3303_v9, %v7305_v1  ;;  %v7308_v44 = vld [vmem:[#allocation53_spill] sm:$0xff]  ;;  %v7314_v62 = vld [vmem:[#allocation44_spill] sm:$0xff] }
 0x55c   :  { %3099 = vmatpush.msra.mxu3 %v3006_v3  ;;  %v6630_v56 = vpop.permute.xlu1 %3432  ;;  %4050 = vmatmul.msk.f32.vlgmr.msra.gmra.mxu0 %vm2118_vm12, %v6466_v42  ;;  %v3302_v8 = vsel %vm1664_vm10, %v7308_v44, %v6475_v54  ;;  %v3301_v61 = vsel %vm1664_vm10, %v7309_v18, %v6446_v33  ;;  %v3324_v5 = vmul.f32 %v3308_v45, %v7310_v19  ;;  %v4064_v45 = vld [vmem:[%s6934_s9 + $0x20] sm:$0xf] }
 0x55d   :  { %3189 = vmatpush.msrb.mxu0 %v3168_v39  ;;  %4053 = vmatmul.msk.f32.vlgmr.msra.gmra.mxu3 %vm2118_vm12, %v6466_v42  ;;  %v6638_v46 = vpop.permute.xlu0 %3414  ;;  %v3159_v42 = vmul.f32 %v3152_v24, %v7295_v63  ;;  %v3306_v63 = vsel %vm1664_vm10, %v7306_v40, %v7308_v44  ;;  %v3315_v54 = vmul.f32 %v3294_v23, %v7307_v52 }
 0x55e   :  { %3249 = vmatpush.msrb.mxu3 %v3171_v34  ;;  %3231 = vmatpush.msrb.mxu2 %v3162_v60  ;;  %v3305_v34 = vsel %vm1664_vm10, %v6119_v47, %v7309_v18  ;;  %v3319_v33 = vmul.f32 %v3295_v51, %v7307_v52  ;;  %v3320_v3 = vmul.f32 %v3307_v29, %v7310_v19  ;;  %v3425_v17 = vpop.permute.xlu2 %3424 }
 0x55f   :  { %3190 = vmatpush.msrb.mxu0 %v3164_v27  ;;  %v3293_v25 = vsel %vm1664_vm10, %v6341_v15, %v6119_v47  ;;  %v3313_v57 = vmul.f32 %v3302_v8, %v7305_v1  ;;  %v3309_v39 = vmul.f32 %v3301_v61, %v7305_v1  ;;  %v3316_v27 = vmul.f32 %v3306_v63, %v7310_v19 }
 0x560   :  { %3250 = vmatpush.msrb.mxu3 %v3167_v14  ;;  %3232 = vmatpush.msrb.mxu2 %v3158_v50  ;;  %v3311_v13 = vmul.f32 %v3293_v25, %v7307_v52  ;;  %v3460_v22 = vsel %vm1853_vm11, %v6510_v37, %v6267_v32  ;;  %v3312_v24 = vmul.f32 %v3305_v34, %v7310_v19 }
 0x561   :  { %3191 = vmatpush.msrb.mxu0 %v3160_v7  ;;  %4057 = vmatmul.msk.f32.vlgmr.msrb.gmra.mxu2 %vm2118_vm12, %v6515_v30  ;;  %v3448_v35 = vsel %vm1853_vm11, %v6524_v4, %v6510_v37  ;;  %v3459_v14 = vsel %vm1853_vm11, %v6571_v49, %v6575_v28  ;;  %v3447_v10 = vsel %vm1853_vm11, %v6630_v56, %v6571_v49 }
 0x562   :  { %3251 = vmatpush.msrb.mxu3 %v3163_v2  ;;  %3382 = vmatpush.msra.mxu2 %v3323_v31  ;;  %v3469_v60 = vmul.f32 %v3459_v14, %v7314_v62  ;;  %v3455_v2 = vsel %vm1853_vm11, %v6575_v28, %v3425_v17 }
 0x563   :  { %3192 = vmatpush.msrb.mxu0 %v3156_v36  ;;  %v3473_v36 = vmul.f32 %v3460_v22, %v7314_v62 }
 0x564   :  { %3252 = vmatpush.msrb.mxu3 %v3159_v42  ;;  %v3429_v53 = vpop.permute.xlu1 %3428  ;;  %4055 = vmatmul.msk.f32.vlgmr.msrb.gmra.mxu0 %vm2118_vm12, %v6515_v30 }
 0x565   :  { %3342 = vmatpush.msra.mxu0 %v3321_v6  ;;  %4058 = vmatmul.msk.f32.vlgmr.msrb.gmra.mxu3 %vm2118_vm12, %v6515_v30  ;;  %v3445_v59 = vpop.permute.xlu0 %3444  ;;  %v3453_v20 = vsel %vm1853_vm11, %v3429_v53, %v6156_v21  ;;  %v3457_v47 = vsel %vm1853_vm11, %v6411_v26, %v3429_v53  ;;  %v7311_v30 = vld [vmem:[#allocation43_spill] sm:$0xff] }
 0x566   :  { %3402 = vmatpush.msra.mxu3 %v3324_v5  ;;  %3383 = vmatpush.msra.mxu2 %v3319_v33  ;;  %v3449_v15 = vsel %vm1853_vm11, %v6156_v21, %v3445_v59  ;;  %v3461_v58 = vsel %vm1853_vm11, %v3445_v59, %v6411_v26  ;;  %v3474_v55 = vmul.f32 %v3457_v47, %v7311_v30  ;;  %v7313_v21 = vld [vmem:[#allocation41_spill] sm:$0xff] }
 0x567   :  { %3343 = vmatpush.msra.mxu0 %v3317_v41  ;;  %v3475_v7 = vmul.f32 %v3453_v20, %v7312_v11  ;;  %v3476_v0 = vmul.f32 %v3449_v15, %v7313_v21  ;;  %v3477_v26 = vmul.f32 %v3461_v58, %v7314_v62  ;;  %v3472_v37 = vmul.f32 %v3448_v35, %v7313_v21 }
 0x568   :  { %3403 = vmatpush.msra.mxu3 %v3320_v3  ;;  %3384 = vmatpush.msra.mxu2 %v3315_v54  ;;  %v3468_v49 = vmul.f32 %v3447_v10, %v7313_v21  ;;  %v3466_v40 = vmul.f32 %v3455_v2, %v7311_v30 }
 0x569   :  { %3344 = vmatpush.msra.mxu0 %v3313_v57  ;;  %3515 = vmatpush.msrb.mxu1 %v3475_v7 }
 0x56a   :  { %3404 = vmatpush.msra.mxu3 %v3316_v27  ;;  %3385 = vmatpush.msra.mxu2 %v3311_v13 }
 0x56b   :  { %3345 = vmatpush.msra.mxu0 %v3309_v39  ;;  %4062 = vmatmul.msk.f32.vlgmr.msra.gmra.mxu2 %vm2118_vm12, %v6565_v12 }
 0x56c   :  { %3405 = vmatpush.msra.mxu3 %v3312_v24  ;;  %3535 = vmatpush.msrb.mxu2 %v3476_v0  ;;  %v3427_v16 = vpop.permute.xlu1 %3426 }
 0x56d   :  { %3495 = vmatpush.msrb.mxu0 %v3474_v55  ;;  %4063 = vmatmul.msk.f32.vlgmr.msra.gmra.mxu3 %vm2118_vm12, %v6565_v12  ;;  %v3439_v48 = vpop.permute.xlu0 %3438  ;;  %v3452_v9 = vsel %vm1853_vm11, %v3427_v16, %v6524_v4  ;;  %v3456_v28 = vsel %vm1853_vm11, %v6267_v32, %v3427_v16  ;;  %v3451_v4 = vsel %vm1853_vm11, %v3425_v17, %v6630_v56 }
 0x56e   :  { %3555 = vmatpush.msrb.mxu3 %v3477_v26  ;;  %4060 = vmatmul.msk.f32.vlgmr.msra.gmra.mxu0 %vm2118_vm12, %v6565_v12  ;;  %v3446_v50 = vsel %vm1853_vm11, %v6656_v38, %v3439_v48  ;;  %v3458_v42 = vsel %vm1853_vm11, %v3439_v48, %v6638_v46  ;;  %v3470_v12 = vmul.f32 %v3456_v28, %v7311_v30 }
 0x56f   :  { %3536 = vmatpush.msrb.mxu2 %v3472_v37  ;;  %v3464_v1 = vmul.f32 %v3446_v50, %v7313_v21  ;;  %v3465_v32 = vmul.f32 %v3458_v42, %v7314_v62  ;;  %v3471_v6 = vmul.f32 %v3452_v9, %v7312_v11  ;;  %v3467_v23 = vmul.f32 %v3451_v4, %v7312_v11 }
 0x570   :  { %3556 = vmatpush.msrb.mxu3 %v3473_v36  ;;  %3496 = vmatpush.msrb.mxu0 %v3470_v12 }
 0x571   :  { %3537 = vmatpush.msrb.mxu2 %v3468_v49  ;;  %3516 = vmatpush.msrb.mxu1 %v3471_v6 }
 0x572   :  { %3557 = vmatpush.msrb.mxu3 %v3469_v60  ;;  %3497 = vmatpush.msrb.mxu0 %v3466_v40 }
 0x573   :  { %3538 = vmatpush.msrb.mxu2 %v3464_v1  ;;  %3517 = vmatpush.msrb.mxu1 %v3467_v23 }
 0x574   :  { %3558 = vmatpush.msrb.mxu3 %v3465_v32  ;;  %4067 = vmatmul.msk.f32.vlgmr.msrb.gmra.mxu2 %vm2118_vm12, %v4064_v45 }
 0x575   :  { %4068 = vmatmul.msk.f32.vlgmr.msrb.gmra.mxu3 %vm2118_vm12, %v4064_v45  ;;  %v3423_v56 = vpop.permute.xlu0 %3422 }
 0x576   :  { %v3450_v51 = vsel %vm1853_vm11, %v3423_v56, %v6656_v38  ;;  %v3454_v29 = vsel %vm1853_vm11, %v6638_v46, %v3423_v56 }
 0x577   :  { %v3462_v52 = vmul.f32 %v3454_v29, %v7311_v30  ;;  %v3463_v31 = vmul.f32 %v3450_v51, %v7312_v11 }
 0x579   :  { %3498 = vmatpush.msrb.mxu0 %v3462_v52  ;;  %3518 = vmatpush.msrb.mxu1 %v3463_v31 }
 0x57a   :  { %4065 = vmatmul.msk.f32.vlgmr.msrb.gmra.mxu0 %vm2118_vm12, %v4064_v45  ;;  %4066 = vmatmul.msk.f32.vlgmr.msrb.gmra.mxu1 %vm2118_vm12, %v4064_v45 }
 0x58b   :  { %v2454_v44 = vpop.f32.mrf.mxu2 }
 0x593   :  { %v2537_v38 = vpop.f32.mrf.mxu2 }
 0x594   :  { %v2434_v41 = vpop.f32.mrf.mxu1  ;;  %v2538_v55 = vadd.f32 %v2537_v38, %v2454_v44 }
 0x59b   :  { %v2686_v46 = vpop.f32.mrf.mxu2 }
 0x59c   :  { %v2517_v18 = vpop.f32.mrf.mxu1  ;;  %v2711_v22 = vadd.f32 %v2686_v46, %v2538_v55 }
 0x59d   :  { %v2518_v30 = vadd.f32 %v2517_v18, %v2434_v41  ;;  %v3571_v41 = vpop.permute.xlu1 %3570 }
 0x5a4   :  { %v2666_v5 = vpop.f32.mrf.mxu1 }
 0x5a5   :  { %v2710_v7 = vadd.f32 %v2666_v5, %v2518_v30 }
 0x5aa   :  { %v2839_v3 = vpop.f32.mrf.mxu2 }
 0x5ab   :  { %v2864_v24 = vadd.f32 %v2839_v3, %v2711_v22 }
 0x5ad   :  { %v2414_v8 = vpop.f32.mrf.mxu0 }
 0x5b0   :  { %v2819_v54 = vpop.f32.mrf.mxu1 }
 0x5b1   :  { %v2863_v62 = vadd.f32 %v2819_v54, %v2710_v7 }
 0x5b4   :  { %v2474_v61 = vpop.f32.mrf.mxu3 }
 0x5b6   :  { %v2928_v39 = vpop.f32.mrf.mxu2 }
 0x5b7   :  { %v2497_v19 = vpop.f32.mrf.mxu0  ;;  %v2953_v60 = vadd.f32 %v2928_v39, %v2864_v24 }
 0x5b8   :  { %v2498_v0 = vadd.f32 %v2497_v19, %v2414_v8 }
 0x5ba   :  { %v2908_v25 = vpop.f32.mrf.mxu1 }
 0x5bb   :  { %v2952_v17 = vadd.f32 %v2908_v25, %v2863_v62 }
 0x5be   :  { %v2557_v43 = vpop.f32.mrf.mxu3 }
 0x5bf   :  { %v2558_v26 = vadd.f32 %v2557_v43, %v2474_v61 }
 0x5c0   :  { %v2646_v63 = vpop.f32.mrf.mxu0 }
 0x5c1   :  { %v2709_v35 = vadd.f32 %v2646_v63, %v2498_v0 }
 0x5c4   :  { %v3061_v20 = vpop.f32.mrf.mxu1 }
 0x5c5   :  { %v3105_v50 = vadd.f32 %v3061_v20, %v2952_v17 }
 0x5c7   :  { %v2706_v34 = vpop.f32.mrf.mxu3 }
 0x5c8   :  { %v2712_v14 = vadd.f32 %v2706_v34, %v2558_v26 }
 0x5c9   :  { %v2799_v33 = vpop.f32.mrf.mxu0  ;;  %v3081_v15 = vpop.f32.mrf.mxu2 }
 0x5ca   :  { %v2862_v10 = vadd.f32 %v2799_v33, %v2709_v35  ;;  %v3106_v28 = vadd.f32 %v3081_v15, %v2953_v60 }
 0x5cc   :  { %v3214_v27 = vpop.f32.mrf.mxu1 }
 0x5cd   :  { %v3258_v1 = vadd.f32 %v3214_v27, %v3105_v50 }
 0x5d0   :  { %v2859_v57 = vpop.f32.mrf.mxu3 }
 0x5d1   :  { %v2888_v53 = vpop.f32.mrf.mxu0  ;;  %v2865_v37 = vadd.f32 %v2859_v57, %v2712_v14 }
 0x5d2   :  { %v2951_v49 = vadd.f32 %v2888_v53, %v2862_v10 }
 0x5d4   :  { %v3367_v2 = vpop.f32.mrf.mxu1 }
 0x5d5   :  { %v3411_v40 = vadd.f32 %v3367_v2, %v3258_v1 }
 0x5d8   :  { %v2948_v59 = vpop.f32.mrf.mxu3 }
 0x5d9   :  { %v3041_v47 = vpop.f32.mrf.mxu0  ;;  %v2954_v9 = vadd.f32 %v2948_v59, %v2865_v37 }
 0x5da   :  { %v3104_v42 = vadd.f32 %v3041_v47, %v2951_v49 }
 0x5e0   :  { %v3101_v58 = vpop.f32.mrf.mxu3 }
 0x5e1   :  { %v3194_v13 = vpop.f32.mrf.mxu0  ;;  %v3107_v12 = vadd.f32 %v3101_v58, %v2954_v9  ;;  %v7316_v9 = vld [vmem:[#allocation5_spill] sm:$0xff] }
 0x5e2   :  { %v3257_v32 = vadd.f32 %v3194_v13, %v3104_v42 }
 0x5e4   :  { %v3234_v11 = vpop.f32.mrf.mxu2 }
 0x5e5   :  { %v3259_v4 = vadd.f32 %v3234_v11, %v3106_v28 }
 0x5e8   :  { %v3254_v21 = vpop.f32.mrf.mxu3 }
 0x5e9   :  { %v3260_v6 = vadd.f32 %v3254_v21, %v3107_v12 }
 0x5eb   :  { %v3347_v16 = vpop.f32.mrf.mxu0 }
 0x5ec   :  { %v3410_v23 = vadd.f32 %v3347_v16, %v3257_v32  ;;  %v7315_v16 = vld [vmem:[#allocation7_spill] sm:$0xff] }
 0x5ee   :  { %v3387_v36 = vpop.f32.mrf.mxu2 }
 0x5ef   :  { %v3412_v45 = vadd.f32 %v3387_v36, %v3259_v4  ;;  %v7317_v4 = vld [vmem:[#allocation8_spill] sm:$0xff] }
 0x5f0   :  { %v3407_v48 = vpop.f32.mrf.mxu3 }
 0x5f1   :  { %v3413_v51 = vadd.f32 %v3407_v48, %v3260_v6 }
 0x5f7   :  { %v3540_v56 = vpop.f32.mrf.mxu2  ;;  %v3500_v52 = vpop.f32.mrf.mxu0 }
 0x5f8   :  { %v3565_v29 = vadd.f32 %v3540_v56, %v3412_v45  ;;  %v3520_v31 = vpop.f32.mrf.mxu1  ;;  %v3560_v44 = vpop.f32.mrf.mxu3  ;;  %v3563_v8 = vadd.f32 %v3500_v52, %v3410_v23 }
 0x5f9   :  { %v3564_v18 = vadd.f32 %v3520_v31, %v3411_v40  ;;  %v3566_v38 = vadd.f32 %v3560_v44, %v3413_v51 }
 0x5fa   :  { %v3575_v61 = vadd.f32 %v3571_v41, %v3565_v29  ;;  %v3573_v19 = vadd.f32 %v3571_v41, %v3563_v8 }
 0x5fb   :  { %v6788_v5 = vadd.f32 %v3571_v41, %v3564_v18  ;;  %v3576_v46 = vadd.f32 %v3571_v41, %v3566_v38  ;;  %v7318_v41 = vld [vmem:[#allocation6_spill] sm:$0xff] }
 0x5fc   :  { %v6790_v43 = vadd.f32 2.0, %v3575_v61  ;;  %v6792_v63 = vadd.f32 2.0, %v3573_v19  ;;  %v3699_v0 = vrot.slane %v3575_v61, 6  ;;  %v3697_v62 = vrot.slane %v3573_v19, 6 }
 0x5fd   :  { %v6797_v33 = vadd.f32 2.0, %v6788_v5  ;;  %v6799_v3 = vadd.f32 2.0, %v3576_v46  ;;  %v3700_v24 = vrot.slane %v3576_v46, 6  ;;  %v3698_v37 = vrot.slane %v6788_v5, 6 }
 0x5fe   :  { %v4071_v54 = vmul.f32 -1.442695, %v6790_v43  ;;  %v3663_v34 = vand.u32 2147483647, %v6790_v43  ;;  %v4069_v25 = vmul.f32 -1.442695, %v6792_v63  ;;  %v6817_v49 = vadd.f32 %v3699_v0, %v7315_v16 }
 0x5ff   :  { %v3661_v53 = vand.u32 2147483647, %v6792_v63  ;;  %v4072_v39 = vmul.f32 -1.442695, %v6799_v3  ;;  %v3664_v59 = vand.u32 2147483647, %v6799_v3  ;;  %v6822_v28 = vadd.f32 %v3697_v62, %v7316_v9 }
 0x600   :  { %4093 = vpow2.f32 %v4071_v54  ;;  %v3667_v57 = vsub.f32 0.0, %v3663_v34  ;;  %v4070_v15 = vmul.f32 -1.442695, %v6797_v33  ;;  %v3662_v30 = vand.u32 2147483647, %v6797_v33 }
 0x601   :  { %4095 = vpow2.f32 %v4069_v25  ;;  %v3665_v47 = vsub.f32 0.0, %v3661_v53  ;;  %v3668_v58 = vsub.f32 0.0, %v3664_v59  ;;  %v3659_v36 = vmin.f32 %v6790_v43, 0.0 }
 0x602   :  { %v3673_v20 = vmul.f32 1.442695, %v3667_v57  ;;  %4097 = vpow2.f32 %v4072_v39  ;;  %v3666_v13 = vsub.f32 0.0, %v3662_v30  ;;  %v3657_v48 = vmin.f32 %v6792_v63, 0.0 }
 0x603   :  { %v3669_v55 = vmul.f32 1.442695, %v3665_v47  ;;  %v3675_v27 = vmul.f32 1.442695, %v3668_v58  ;;  %v3660_v12 = vmin.f32 %v6799_v3, 0.0  ;;  %v6827_v1 = vadd.f32 %v3700_v24, %v7317_v4 }
 0x604   :  { %4099 = vpow2.f32 %v3673_v20  ;;  %v3671_v22 = vmul.f32 1.442695, %v3666_v13  ;;  %v3658_v45 = vmin.f32 %v6797_v33, 0.0  ;;  %v6840_v44 = vadd.f32 %v3698_v37, %v7318_v41 }
 0x605   :  { %4101 = vpow2.f32 %v4070_v15 }
 0x606   :  { %v4094_v11 = vpop.eup %4093  ;;  %4103 = vpow2.f32 %v3669_v55 }
 0x607   :  { %v6807_v7 = vadd.f32 1.0, %v4094_v11  ;;  %4105 = vpow2.f32 %v3675_v27  ;;  %v4096_v21 = vpop.eup %4095 }
 0x608   :  { %v4098_v26 = vpop.eup %4097  ;;  %v6812_v17 = vadd.f32 1.0, %v4096_v21 }
 0x609   :  { %4107 = vrcp.f32 %v6807_v7  ;;  %v6810_v14 = vadd.f32 1.0, %v4098_v26  ;;  %v3636_v42 = vand.u32 2147483647, %v6807_v7  ;;  %v3638_v32 = vand.u32 2147483648, %v6807_v7 }
 0x60a   :  { %v4100_v35 = vpop.eup %4099  ;;  %4109 = vpow2.f32 %v3671_v22  ;;  %vm3632_vm13 = vweird.f32 %v6807_v7  ;;  %v3606_v18 = vand.u32 2147483647, %v6812_v17  ;;  %v3608_v61 = vand.u32 2147483648, %v6812_v17 }
 0x60b   :  { %v4102_v10 = vpop.eup %4101  ;;  %v3679_v60 = vadd.f32 1.0, %v4100_v35  ;;  %4111 = vrcp.f32 %v6810_v14  ;;  %v3651_v56 = vand.u32 2147483647, %v6810_v14  ;;  %v3653_v51 = vand.u32 2147483648, %v6810_v14 }
 0x60c   :  { %v4104_v2 = vpop.eup %4103  ;;  %4113 = vrcp.f32 %v6812_v17  ;;  %v6831_v6 = vadd.f32 1.0, %v4102_v10  ;;  %vm6842_vm14 = vcmp.eq.f32.partialorder %v3636_v42, 8.507059e+37  ;;  %v3639_v46 = vor.u32 1.1754944e-38, %v3638_v32 }
 0x60d   :  { %v4106_v50 = vpop.eup %4105  ;;  %4115 = vlog2.f32 %v3679_v60  ;;  %v3677_v29 = vadd.f32 1.0, %v4104_v2  ;;  %vm3647_vm15 = vweird.f32 %v6810_v14  ;;  %vm6850_vm1 = vcmp.eq.f32.partialorder %v3651_v56, 8.507059e+37 }
 0x60e   :  { %v3680_v40 = vadd.f32 1.0, %v4106_v50  ;;  %4117 = vrcp.f32 %v6831_v6  ;;  %v3654_v57 = vor.u32 1.1754944e-38, %v3653_v51  ;;  %vm3602_vm2 = vweird.f32 %v6812_v17 }
 0x60f   :  { %v4108_v23 = vpop.eup %4107  ;;  %vm6856_vm5 = vcmp.eq.f32.partialorder %v3606_v18, 8.507059e+37  ;;  %v3609_v15 = vor.u32 1.1754944e-38, %v3608_v61  ;;  %vm3617_vm6 = vweird.f32 %v6831_v6  ;;  %v3621_v58 = vand.u32 2147483647, %v6831_v6 }
 0x610   :  { %v4110_v52 = vpop.eup %4109  ;;  %v3628_v31 = vmul.f32 %v4108_v23, %v6807_v7  ;;  %4119 = vlog2.f32 %v3680_v40  ;;  %vm3633_vm3 = vweird.f32 %v4108_v23  ;;  %v3623_v13 = vand.u32 2147483648, %v6831_v6 }
 0x611   :  { %v3678_v38 = vadd.f32 1.0, %v4110_v52  ;;  %v4112_v19 = vpop.eup %4111  ;;  %4121 = vlog2.f32 %v3677_v29  ;;  %vm6866_vm7 = vmor %vm3632_vm13, %vm3633_vm3 }
 0x612   :  { %v3629_v5 = vsub.f32 1.0, %v3628_v31  ;;  %v4114_v54 = vpop.eup %4113  ;;  %v3643_v34 = vmul.f32 %v4112_v19, %v6810_v14  ;;  %vm3648_vm8 = vweird.f32 %v4112_v19  ;;  %v3624_v52 = vor.u32 1.1754944e-38, %v3623_v13 }
 0x613   :  { %v3598_v39 = vmul.f32 %v4114_v54, %v6812_v17  ;;  %4123 = vlog2.f32 %v3678_v38  ;;  %v4116_v59 = vpop.eup %4115  ;;  %vm3603_vm9 = vweird.f32 %v4114_v54  ;;  %vm3649_vm11 = vmor %vm3647_vm15, %vm3648_vm8 }
 0x614   :  { %v3630_v53 = vmul.f32 %v4108_v23, %v3629_v5  ;;  %v3644_v20 = vsub.f32 1.0, %v3643_v34  ;;  %v4118_v30 = vpop.eup %4117  ;;  %v3686_v11 = vmul.f32 0.6931472, %v4116_v59  ;;  %vm3604_vm12 = vmor %vm3602_vm2, %vm3603_vm9 }
 0x615   :  { %v3599_v27 = vsub.f32 1.0, %v3598_v39  ;;  %v3613_v62 = vmul.f32 %v4118_v30, %v6831_v6  ;;  %vm3618_vm10 = vweird.f32 %v4118_v30 }
 0x616   :  { %v3631_v55 = vadd.f32 %v4108_v23, %v3630_v53  ;;  %v4120_v22 = vpop.eup %4119  ;;  %v3645_v0 = vmul.f32 %v4112_v19, %v3644_v20  ;;  %v3691_v37 = vsub.f32 %v3659_v36, %v3686_v11  ;;  %vm3619_vm13 = vmor %vm3617_vm6, %vm3618_vm10 }
 0x617   :  { %v4122_v26 = vpop.eup %4121  ;;  %v3600_v35 = vmul.f32 %v4114_v54, %v3599_v27  ;;  %v3688_v10 = vmul.f32 0.6931472, %v4120_v22  ;;  %v3614_v7 = vsub.f32 1.0, %v3613_v62 }
 0x618   :  { %v3635_v24 = vsel %vm6866_vm7, %v4108_v23, %v3631_v55  ;;  %v3646_v60 = vadd.f32 %v4112_v19, %v3645_v0  ;;  %v3682_v2 = vmul.f32 0.6931472, %v4122_v26  ;;  %v3753_v23 = vrot.slane %v3691_v37, 2 }
 0x619   :  { %v4124_v50 = vpop.eup %4123  ;;  %v3640_v42 = vsel %vm6842_vm14, %v3639_v46, %v3635_v24  ;;  %v3601_v32 = vadd.f32 %v4114_v54, %v3600_v35  ;;  %v3692_v40 = vsub.f32 %v3660_v12, %v3688_v10  ;;  %v3615_v43 = vmul.f32 %v4118_v30, %v3614_v7 }
 0x61a   :  { %v3650_v56 = vsel %vm3649_vm11, %v4112_v19, %v3646_v60  ;;  %v3684_v36 = vmul.f32 0.6931472, %v4124_v50  ;;  %v3689_v51 = vsub.f32 %v3657_v48, %v3682_v2  ;;  %v3711_v3 = vmul.f32 %v6817_v49, %v3640_v42 }
 0x61b   :  { %v3655_v29 = vsel %vm6850_vm1, %v3654_v57, %v3650_v56  ;;  %v3605_v14 = vsel %vm3604_vm12, %v4114_v54, %v3601_v32  ;;  %v3754_v31 = vrot.slane %v3692_v40, 2  ;;  %v3616_v8 = vadd.f32 %v4118_v30, %v3615_v43 }
 0x61c   :  { %v3712_v12 = vmul.f32 %v6827_v1, %v3655_v29  ;;  %v3757_v18 = vsel %vm470_vm4, %v3753_v23, 0.0  ;;  %v3610_v17 = vsel %vm6856_vm5, %v3609_v15, %v3605_v14  ;;  %v3690_v48 = vsub.f32 %v3658_v45, %v3684_v36 }
 0x61d   :  { %v3758_v63 = vsel %vm470_vm4, %v3754_v31, 0.0  ;;  %v3723_v61 = vrot.slane %v3689_v51, 2  ;;  %v3620_v1 = vsel %vm3619_vm13, %v4118_v30, %v3616_v8  ;;  %vm3622_vm14 = vcmp.eq.f32.partialorder %v3621_v58, 8.507059e+37 }
 0x61e   :  { %v3743_v49 = vsel %vm470_vm4, %v7317_v4, %v3712_v12  ;;  %v3759_v38 = vadd.f32 %v3758_v63, %v3757_v18  ;;  %v3625_v5 = vsel %vm3622_vm14, %v3624_v52, %v3620_v1  ;;  %v3724_v46 = vrot.slane %v3690_v48, 2 }
 0x61f   :  { %v3746_v19 = vrot.slane %v3743_v49, 4  ;;  %v3742_v54 = vsel %vm470_vm4, %v7315_v16, %v3711_v3  ;;  %v3709_v6 = vmul.f32 %v6822_v28, %v3610_v17  ;;  %v3710_v34 = vmul.f32 %v6840_v44, %v3625_v5 }
 0x620   :  { %3760 = vadd.xlane.f32.xlu0 %v3759_v38  ;;  %v3727_v33 = vsel %vm470_vm4, %v3723_v61, 0.0  ;;  %v3728_v4 = vsel %vm470_vm4, %v3724_v46, 0.0 }
 0x621   :  { %v3747_v45 = vsel %vm78_vm0, %v3742_v54, %v3746_v19  ;;  %v3714_v25 = vsel %vm470_vm4, %v7318_v41, %v3710_v34  ;;  %v3729_v57 = vadd.f32 %v3728_v4, %v3727_v33  ;;  %v3713_v28 = vsel %vm470_vm4, %v7316_v9, %v3709_v6 }
 0x622   :  { %4073 = vst [vmem:[%s6936_s11 + $0x8] sm:$0xff] %v3747_v45  ;;  %v3717_v16 = vrot.slane %v3714_v25, 4 }
 0x623   :  { %3730 = vadd.xlane.f32.xlu2 %v3729_v57 }
 0x624   :  { %v3718_v44 = vsel %vm78_vm0, %v3713_v28, %v3717_v16  ;;  %vm3740_vm0 = vcmask 0  }
 0x625   :  { %3720 = vst [vmem:[%s6936_s11] sm:$0xff] %v3718_v44 }
 0x693   :  { %v3761_v53 = vpop.xlane.xlu0 %3760 }
 0x694   :  { %v3762_v39 = vrot.slane %v3761_v53, 4 }
 0x696   :  { %v3763_v59 = vadd.f32 %v3762_v39, %v3761_v53  ;;  %v3731_v20 = vpop.xlane.xlu2 %3730 }
 0x697   :  { %v3732_v15 = vrot.slane %v3731_v20, 4 }
 0x698   :  { %v3764_v47 = vrot.slane %v3763_v59, 2 }
 0x699   :  { %v3733_v58 = vadd.f32 %v3732_v15, %v3731_v20 }
 0x69a   :  { %v3765_v41 = vadd.f32 %v3764_v47, %v3763_v59 }
 0x69b   :  { %v3734_v30 = vrot.slane %v3733_v58, 2 }
 0x69c   :  { %v3766_v27 = vrot.slane %v3765_v41, 1 }
 0x69d   :  { %v3735_v55 = vadd.f32 %v3734_v30, %v3733_v58 }
 0x69e   :  { %v3767_v11 = vadd.f32 %v3766_v27, %v3765_v41 }
 0x69f   :  { %v3736_v13 = vrot.slane %v3735_v55, 1 }
 0x6a1   :  { %v3737_v9 = vadd.f32 %v3736_v13, %v3735_v55 }
 0x6a3   :  { %4075 = vpush %v3737_v9 }
 0x6a4   :  { %4077 = vpush %v3767_v11 }
 0x6d4   :  { %s4076_s24 = spop %4075 }
 0x6d5   :  { %v3739_v22 = vstv %s4076_s24  ;;  %s4078_s11 = spop %4077 }
 0x6d6   :  { %3741 = vst.msk [vmem:[%s6937_s12] sm:$0x1] %vm3740_vm0, %v3739_v22  ;;  %v3769_v21 = vstv %s4078_s11 }
 0x6d7   :  { %4074 = vst.msk [vmem:[%s6937_s12 + $0x1] sm:$0x1] %vm3740_vm0, %v3769_v21 }
 0x6d8   :  { %3780 = vsyncpa [#allocation3], 1 }

</bundles_post_ra>
